<compile_context>
chip_gen: v7x
topology: tpu7x:2x2x1
jax: 0.10.0
libtpu: 0.0.40
codegen_flags: <defaults>
</compile_context>

<pallas_src>
import functools

import jax
import jax.numpy as jnp
from jax.experimental import pallas as pl
from jax.experimental.pallas import tpu as pltpu


_CP = 128            # lane-padded channel width
_C1, _C2 = 32, 18    # real conv1 / conv2 output channels
_K1 = 32             # conv1 tap count, padded 25 -> 32
_H0, _H1, _P1, _H2, _P2 = 20, 16, 8, 6, 3   # 20 -c5-> 16 -p2-> 8 -c3-> 6 -p2-> 3


# ----------------------------------------------------------------------------
# Fused forward kernel (one batch tile of n samples per grid step)
# ----------------------------------------------------------------------------
def _convnet_kernel(taps_ref, w1_ref, b1_ref, w2_ref, b2_ref,
                    w3_ref, b3_ref, w4_ref, b4_ref, o_ref, *, n):
    """taps_ref: (1, 256*n, 32) f32  im2col, row = (e*2+f)*64n + (U*8+V)*n + i
       w1_ref  : (32, 128)   f32   conv1  [tap, padded c_out]
       w2_ref  : (128, 1152) bf16  conv2  [padded c_in, tap*128 + padded c_out]
       w3_ref  : (1152, 128) bf16  fc1    [(sy*3+sx)*128 + padded c, out]
       w4_ref  : (1, 128)    f32   fc2 row;  b*: biases;  o_ref: (n, 1) f32."""
    f32, bf16 = jnp.float32, jnp.bfloat16

    # ---- conv1 (5x5, C_in=1) on the MXU, pool1 fused as a running phase max.
    pm = None
    for p in range(4):
        blk = taps_ref[0, p * 64 * n:(p + 1) * 64 * n, :]            # (64n, 32)
        z = jnp.dot(blk, w1_ref[...], preferred_element_type=f32)    # (64n, 128)
        pm = z if p == 0 else jnp.maximum(pm, z)
    p1 = jnp.maximum(pm + b1_ref[...], 0.0)       # (64n,128), row=(U*8+V)*n+i
    p1b = p1.astype(bf16)                         # single bf16 cast for conv2

    # ---- conv2 (3x3, 32->18): one wide matmul against all 9 taps at once.
    # zz[(U*8+V)*n+i, k*128+c] = p1[i,U,V,:] @ w2_tap_k[:, c]
    zz = jnp.dot(p1b, w2_ref[...], preferred_element_type=f32)       # (64n, 1152)

    # Tap accumulation + pool2 + bias + ReLU via static aligned slices of zz.
    b2 = b2_ref[...]
    p2_chunks = []
    for sy in range(3):
        rowmax = None
        for dy in range(2):
            oy = 2 * sy + dy
            acc = None
            for ki in range(3):
                for kj in range(3):
                    k = ki * 3 + kj
                    r0 = ((oy + ki) * 8 + kj) * n
                    blk = zz[r0:r0 + 6 * n, k * 128:(k + 1) * 128]   # (6n, 128)
                    acc = blk if acc is None else acc + blk
            rowmax = acc if dy == 0 else jnp.maximum(rowmax, acc)
        for sx in range(3):
            lo = rowmax[(2 * sx) * n:(2 * sx + 1) * n, :]
            hi = rowmax[(2 * sx + 1) * n:(2 * sx + 2) * n, :]
            p2_chunks.append(jnp.maximum(jnp.maximum(lo, hi) + b2, 0.0))  # (n,128)

    # ---- fc1 (162 -> 128): one K-stacked matmul (NCHW flatten absorbed in w3).
    p2w = jnp.concatenate(p2_chunks, axis=-1).astype(bf16)           # (n, 1152)
    h = jnp.dot(p2w, w3_ref[...], preferred_element_type=f32)        # (n, 128)
    h = jnp.maximum(h + b3_ref[...], 0.0)

    # ---- fc2 (128 -> 1): lane reduction; nn.Dropout(0.1) is identity at inference.
    o = jnp.sum(h * w4_ref[...], axis=-1, keepdims=True) + b4_ref[...]
    o_ref[...] = o.astype(o_ref.dtype)


# ----------------------------------------------------------------------------
# One-time parameter packing (PyTorch layouts -> kernel layouts)
# ----------------------------------------------------------------------------
def pack_params(params):
    f32, bf16 = jnp.float32, jnp.bfloat16
    # conv1 (32,1,5,5) -> (32,128): [tap ki*5+kj (padded 25->32), padded c_out]
    w1 = jnp.transpose(params["conv1_w"][:, 0], (1, 2, 0)).reshape(25, _C1)
    w1 = jnp.pad(w1, ((0, _K1 - 25), (0, _CP - _C1))).astype(f32)
    b1 = jnp.pad(params["conv1_b"], (0, _CP - _C1)).reshape(1, _CP).astype(f32)
    # conv2 (18,32,3,3) -> (128, 9*128): [padded c_in, tap*128 + padded c_out]
    w2 = jnp.transpose(params["conv2_w"], (2, 3, 1, 0)).reshape(9, _C1, _C2)
    w2 = jnp.pad(w2, ((0, 0), (0, _CP - _C1), (0, _CP - _C2)))
    w2 = jnp.transpose(w2, (1, 0, 2)).reshape(_CP, 9 * _CP).astype(bf16)
    b2 = jnp.pad(params["conv2_b"], (0, _CP - _C2)).reshape(1, _CP).astype(f32)
    # fc1 (in=162, out=128); original NCHW flatten index = c*9 + (sy*3+sx)
    #   -> (9*128, 128): row = (sy*3+sx)*128 + padded c
    w3 = jnp.transpose(params["fc1_w"].reshape(_C2, 9, 128), (1, 0, 2))
    w3 = jnp.pad(w3, ((0, 0), (0, _CP - _C2), (0, 0))).reshape(9 * _CP, 128)
    w3 = w3.astype(bf16)
    b3 = params["fc1_b"].reshape(1, 128).astype(f32)
    # fc2 (128, 1) -> (1, 128) row for an in-kernel lane reduction.
    w4 = params["fc2_w"].reshape(128, 1).T.astype(f32)
    b4 = params["fc2_b"].reshape(1, 1).astype(f32)
    # Invariant the kernel relies on: padded channels carry zero bias / weight,
    # so they stay exactly 0 through ReLU and never contribute downstream.
    assert float(jnp.max(jnp.abs(b1[0, _C1:]))) == 0.0
    assert float(jnp.max(jnp.abs(b2[0, _C2:]))) == 0.0
    assert float(jnp.max(jnp.abs(w1[25:, :]))) == 0.0
    return dict(w1=w1, b1=b1, w2=w2, b2=b2, w3=w3, b3=b3, w4=w4, b4=b4)


# ----------------------------------------------------------------------------
# Forward wrapper: wrapper-side im2col (layout plumbing) + batch-tiled pallas_call
# ----------------------------------------------------------------------------
@functools.partial(jax.jit, static_argnames=("n_tile",))
def convnet_forward(x_nchw, packed, n_tile=8):
    """x_nchw: (N, 1, 20, 20) -> (N, 1) float32."""
    n_batch, c, hh, ww = x_nchw.shape
    assert c == 1 and hh == _H0 and ww == _H0, "demo-size kernel (see TODO at top)"
    assert n_tile % 8 == 0, "n_tile must be a multiple of 8 (sublane alignment)"
    x = x_nchw[:, 0].astype(jnp.float32)                              # (N, 20, 20)

    num_tiles = -(-n_batch // n_tile)
    n_pad = num_tiles * n_tile
    if n_pad != n_batch:
        x = jnp.pad(x, ((0, n_pad - n_batch), (0, 0), (0, 0)))

    # im2col + pool1-phase reorder (pure XLA layout plumbing, taps on lanes):
    #   taps[t, ((e*2+f)*64 + U*8+V)*n + i, ki*5+kj] = x[t*n+i, 2U+e+ki, 2V+f+kj]
    patches = jnp.stack(
        [x[:, ki:ki + _H1, kj:kj + _H1] for ki in range(5) for kj in range(5)],
        axis=-1)                                                      # (Np,16,16,25)
    patches = patches.reshape(num_tiles, n_tile, _P1, 2, _P1, 2, 25)
    patches = jnp.transpose(patches, (0, 3, 5, 2, 4, 1, 6))           # (T,e,f,U,V,i,k)
    taps = patches.reshape(num_tiles, 4 * _P1 * _P1 * n_tile, 25)
    taps = jnp.pad(taps, ((0, 0), (0, 0), (0, _K1 - 25)))             # K: 25 -> 32

    n = n_tile
    rows = 4 * _P1 * _P1 * n                                          # 256 * n

    def const(shape):
        return pl.BlockSpec(shape, lambda t: (0,) * len(shape))

    out = pl.pallas_call(
        functools.partial(_convnet_kernel, n=n),
        grid=(num_tiles,),
        in_specs=[
            pl.BlockSpec((1, rows, _K1), lambda t: (t, 0, 0)),        # taps
            const(packed["w1"].shape), const(packed["b1"].shape),
            const(packed["w2"].shape), const(packed["b2"].shape),
            const(packed["w3"].shape), const(packed["b3"].shape),
            const(packed["w4"].shape), const(packed["b4"].shape),
        ],
        out_specs=pl.BlockSpec((n, 1), lambda t: (t, 0)),
        out_shape=jax.ShapeDtypeStruct((n_pad, 1), jnp.float32),
        compiler_params=pltpu.CompilerParams(
            dimension_semantics=("parallel",)),
    )(taps, packed["w1"], packed["b1"], packed["w2"], packed["b2"],
      packed["w3"], packed["b3"], packed["w4"], packed["b4"])
    return out[:n_batch]


# ----------------------------------------------------------------------------
# Deterministic parameter init (PyTorch-style uniform(-1/sqrt(fan_in), ...))
# ----------------------------------------------------------------------------
def init_params(key, fc1_in):
    ks = jax.random.split(key, 8)

    def u(k, shape, fan_in):
        bound = 1.0 / jnp.sqrt(float(fan_in))
        return jax.random.uniform(k, shape, jnp.float32, -bound, bound)

    return {
        "conv1_w": u(ks[0], (_C1, 1, 5, 5), 1 * 5 * 5),
        "conv1_b": u(ks[1], (_C1,), 1 * 5 * 5),
        "conv2_w": u(ks[2], (_C2, _C1, 3, 3), _C1 * 3 * 3),
        "conv2_b": u(ks[3], (_C2,), _C1 * 3 * 3),
        # stored (in, out) so the forward computes x @ W + b
        "fc1_w": u(ks[4], (fc1_in, 128), fc1_in),
        "fc1_b": u(ks[5], (128,), fc1_in),
        "fc2_w": u(ks[6], (128, 1), 128),
        "fc2_b": u(ks[7], (1,), 128),
    }


# ----------------------------------------------------------------------------
# Plain-JAX f32 reference (in-script sanity check only)
# ----------------------------------------------------------------------------
def _reference_forward(x_nchw, params):
    hi = jax.lax.Precision.HIGHEST
    y = jax.lax.conv_general_dilated(
        x_nchw.astype(jnp.float32), params["conv1_w"].astype(jnp.float32),
        (1, 1), "VALID", dimension_numbers=("NCHW", "OIHW", "NCHW"), precision=hi)
    y = jax.nn.relu(y + params["conv1_b"].reshape(1, -1, 1, 1))
    y = jax.lax.reduce_window(y, -jnp.inf, jax.lax.max,
                              (1, 1, 2, 2), (1, 1, 2, 2), "VALID")
    y = jax.lax.conv_general_dilated(
        y, params["conv2_w"].astype(jnp.float32),
        (1, 1), "VALID", dimension_numbers=("NCHW", "OIHW", "NCHW"), precision=hi)
    y = jax.nn.relu(y + params["conv2_b"].reshape(1, -1, 1, 1))
    y = jax.lax.reduce_window(y, -jnp.inf, jax.lax.max,
                              (1, 1, 2, 2), (1, 1, 2, 2), "VALID")
    y = y.reshape(y.shape[0], -1)                              # NCHW flatten
    y = jax.nn.relu(jnp.dot(y, params["fc1_w"], precision=hi) + params["fc1_b"])
    return jnp.dot(y, params["fc2_w"], precision=hi) + params["fc2_b"]


if __name__ == "__main__":
    key = jax.random.PRNGKey(0)
    k_x, k_p = jax.random.split(key)

    # NCHW input, 1 channel, 20x20 spatial: 20 -> 16 -> 8 -> 6 -> 3 => fc1_in = 162.
    N, C, H, W = 16, 1, 20, 20            # 2 batch tiles of 8 -> exercises the grid
    x = jax.random.normal(k_x, (N, C, H, W), dtype=jnp.float32)

    params = init_params(k_p, fc1_in=_C2 * _P2 * _P2)
    packed = pack_params(params)

    out = convnet_forward(x, packed)
    out = jax.block_until_ready(out)
    assert out.shape == (N, 1), out.shape

    # Sanity-check the fused kernel against the plain-JAX f32 reference
    # (kernel uses bf16 MXU operands for conv2/fc1 -> loose tolerance).
    ref = _reference_forward(x, params)
    err = float(jnp.max(jnp.abs(out - ref)))
    assert err < 5e-2, f"mismatch vs reference: max abs err = {err}"

    print("KERNEL_OK")
</pallas_src>

<mosaic_0001>
module attributes {stable_mosaic.version = 11 : i64} {
  func.func @_convnet_kernel(%arg0: i32, %arg1: memref<1x2048x32xf32, #tpu.memory_space<vmem>>, %arg2: memref<32x128xf32, #tpu.memory_space<vmem>>, %arg3: memref<1x128xf32, #tpu.memory_space<vmem>>, %arg4: memref<128x1152xbf16, #tpu.memory_space<vmem>>, %arg5: memref<1x128xf32, #tpu.memory_space<vmem>>, %arg6: memref<1152x128xbf16, #tpu.memory_space<vmem>>, %arg7: memref<1x128xf32, #tpu.memory_space<vmem>>, %arg8: memref<1x128xf32, #tpu.memory_space<vmem>>, %arg9: memref<1x1xf32, #tpu.memory_space<vmem>>, %arg10: memref<8x1xf32, #tpu.memory_space<vmem>>) attributes {dimension_semantics = [#tpu.dimension_semantics<parallel>], iteration_bounds = array<i64: 2>, scalar_prefetch = 0 : i64, scratch_operands = 0 : i64, tpu.core_type = #tpu.core_type<tc>, window_params = [{transform_indices = @transform_0, window_bounds = array<i64: 1, 2048, 32>}, {pipeline_mode = #tpu.pipeline_mode<synchronous>, transform_indices = @transform_1, window_bounds = array<i64: 32, 128>}, {pipeline_mode = #tpu.pipeline_mode<synchronous>, transform_indices = @transform_2, window_bounds = array<i64: 1, 128>}, {pipeline_mode = #tpu.pipeline_mode<synchronous>, transform_indices = @transform_3, window_bounds = array<i64: 128, 1152>}, {pipeline_mode = #tpu.pipeline_mode<synchronous>, transform_indices = @transform_4, window_bounds = array<i64: 1, 128>}, {pipeline_mode = #tpu.pipeline_mode<synchronous>, transform_indices = @transform_5, window_bounds = array<i64: 1152, 128>}, {pipeline_mode = #tpu.pipeline_mode<synchronous>, transform_indices = @transform_6, window_bounds = array<i64: 1, 128>}, {pipeline_mode = #tpu.pipeline_mode<synchronous>, transform_indices = @transform_7, window_bounds = array<i64: 1, 128>}, {pipeline_mode = #tpu.pipeline_mode<synchronous>, transform_indices = @transform_8, window_bounds = array<i64: 1, 1>}, {transform_indices = @transform_9, window_bounds = array<i64: 8, 1>}]} {
    %c0 = arith.constant 0 : index
    %c0_0 = arith.constant 0 : index
    %c0_1 = arith.constant 0 : index
    %0 = vector.load %arg1[%c0, %c0_0, %c0_1] : memref<1x2048x32xf32, #tpu.memory_space<vmem>>, vector<1x512x32xf32>
    %1 = vector.shape_cast %0 : vector<1x512x32xf32> to vector<512x32xf32>
    %c0_2 = arith.constant 0 : index
    %c0_3 = arith.constant 0 : index
    %2 = vector.load %arg2[%c0_2, %c0_3] : memref<32x128xf32, #tpu.memory_space<vmem>>, vector<32x128xf32>
    %cst = arith.constant dense<0.000000e+00> : vector<512x128xf32>
    %3 = tpu.matmul %1, %2, %cst {dimension_numbers = #tpu.dot_dimension_numbers<[1], [0], [0], [1], [0, 0, 1, 1], [], []>} : vector<512x32xf32>, vector<32x128xf32>, vector<512x128xf32> -> vector<512x128xf32>
    %c0_4 = arith.constant 0 : index
    %c512 = arith.constant 512 : index
    %c0_5 = arith.constant 0 : index
    %4 = vector.load %arg1[%c0_4, %c512, %c0_5] : memref<1x2048x32xf32, #tpu.memory_space<vmem>>, vector<1x512x32xf32>
    %5 = vector.shape_cast %4 : vector<1x512x32xf32> to vector<512x32xf32>
    %c0_6 = arith.constant 0 : index
    %c0_7 = arith.constant 0 : index
    %6 = vector.load %arg2[%c0_6, %c0_7] : memref<32x128xf32, #tpu.memory_space<vmem>>, vector<32x128xf32>
    %cst_8 = arith.constant dense<0.000000e+00> : vector<512x128xf32>
    %7 = tpu.matmul %5, %6, %cst_8 {dimension_numbers = #tpu.dot_dimension_numbers<[1], [0], [0], [1], [0, 0, 1, 1], [], []>} : vector<512x32xf32>, vector<32x128xf32>, vector<512x128xf32> -> vector<512x128xf32>
    %8 = arith.maximumf %3, %7 : vector<512x128xf32>
    %c0_9 = arith.constant 0 : index
    %c1024 = arith.constant 1024 : index
    %c0_10 = arith.constant 0 : index
    %9 = vector.load %arg1[%c0_9, %c1024, %c0_10] : memref<1x2048x32xf32, #tpu.memory_space<vmem>>, vector<1x512x32xf32>
    %10 = vector.shape_cast %9 : vector<1x512x32xf32> to vector<512x32xf32>
    %c0_11 = arith.constant 0 : index
    %c0_12 = arith.constant 0 : index
    %11 = vector.load %arg2[%c0_11, %c0_12] : memref<32x128xf32, #tpu.memory_space<vmem>>, vector<32x128xf32>
    %cst_13 = arith.constant dense<0.000000e+00> : vector<512x128xf32>
    %12 = tpu.matmul %10, %11, %cst_13 {dimension_numbers = #tpu.dot_dimension_numbers<[1], [0], [0], [1], [0, 0, 1, 1], [], []>} : vector<512x32xf32>, vector<32x128xf32>, vector<512x128xf32> -> vector<512x128xf32>
    %13 = arith.maximumf %8, %12 : vector<512x128xf32>
    %c0_14 = arith.constant 0 : index
    %c1536 = arith.constant 1536 : index
    %c0_15 = arith.constant 0 : index
    %14 = vector.load %arg1[%c0_14, %c1536, %c0_15] : memref<1x2048x32xf32, #tpu.memory_space<vmem>>, vector<1x512x32xf32>
    %15 = vector.shape_cast %14 : vector<1x512x32xf32> to vector<512x32xf32>
    %c0_16 = arith.constant 0 : index
    %c0_17 = arith.constant 0 : index
    %16 = vector.load %arg2[%c0_16, %c0_17] : memref<32x128xf32, #tpu.memory_space<vmem>>, vector<32x128xf32>
    %cst_18 = arith.constant dense<0.000000e+00> : vector<512x128xf32>
    %17 = tpu.matmul %15, %16, %cst_18 {dimension_numbers = #tpu.dot_dimension_numbers<[1], [0], [0], [1], [0, 0, 1, 1], [], []>} : vector<512x32xf32>, vector<32x128xf32>, vector<512x128xf32> -> vector<512x128xf32>
    %18 = arith.maximumf %13, %17 : vector<512x128xf32>
    %c0_19 = arith.constant 0 : index
    %c0_20 = arith.constant 0 : index
    %19 = vector.load %arg3[%c0_19, %c0_20] : memref<1x128xf32, #tpu.memory_space<vmem>>, vector<1x128xf32>
    %20 = vector.broadcast %19 : vector<1x128xf32> to vector<512x128xf32>
    %21 = arith.addf %18, %20 : vector<512x128xf32>
    %cst_21 = arith.constant 0.000000e+00 : f32
    %22 = vector.broadcast %cst_21 : f32 to vector<512x128xf32>
    %23 = arith.maximumf %21, %22 : vector<512x128xf32>
    %24 = arith.truncf %23 : vector<512x128xf32> to vector<512x128xbf16>
    %c0_22 = arith.constant 0 : index
    %c0_23 = arith.constant 0 : index
    %25 = vector.load %arg4[%c0_22, %c0_23] : memref<128x1152xbf16, #tpu.memory_space<vmem>>, vector<128x1152xbf16>
    %cst_24 = arith.constant dense<0.000000e+00> : vector<512x1152xf32>
    %26 = tpu.matmul %24, %25, %cst_24 {dimension_numbers = #tpu.dot_dimension_numbers<[1], [0], [0], [1], [0, 0, 1, 1], [], []>} : vector<512x128xbf16>, vector<128x1152xbf16>, vector<512x1152xf32> -> vector<512x1152xf32>
    %c0_25 = arith.constant 0 : index
    %c0_26 = arith.constant 0 : index
    %27 = vector.load %arg5[%c0_25, %c0_26] : memref<1x128xf32, #tpu.memory_space<vmem>>, vector<1x128xf32>
    %28 = vector.extract_strided_slice %26 {offsets = [0, 0], sizes = [48, 128], strides = [1, 1]} : vector<512x1152xf32> to vector<48x128xf32>
    %29 = vector.extract_strided_slice %26 {offsets = [8, 128], sizes = [48, 128], strides = [1, 1]} : vector<512x1152xf32> to vector<48x128xf32>
    %30 = arith.addf %28, %29 : vector<48x128xf32>
    %31 = vector.extract_strided_slice %26 {offsets = [16, 256], sizes = [48, 128], strides = [1, 1]} : vector<512x1152xf32> to vector<48x128xf32>
    %32 = arith.addf %30, %31 : vector<48x128xf32>
    %33 = vector.extract_strided_slice %26 {offsets = [64, 384], sizes = [48, 128], strides = [1, 1]} : vector<512x1152xf32> to vector<48x128xf32>
    %34 = arith.addf %32, %33 : vector<48x128xf32>
    %35 = vector.extract_strided_slice %26 {offsets = [72, 512], sizes = [48, 128], strides = [1, 1]} : vector<512x1152xf32> to vector<48x128xf32>
    %36 = arith.addf %34, %35 : vector<48x128xf32>
    %37 = vector.extract_strided_slice %26 {offsets = [80, 640], sizes = [48, 128], strides = [1, 1]} : vector<512x1152xf32> to vector<48x128xf32>
    %38 = arith.addf %36, %37 : vector<48x128xf32>
    %39 = vector.extract_strided_slice %26 {offsets = [128, 768], sizes = [48, 128], strides = [1, 1]} : vector<512x1152xf32> to vector<48x128xf32>
    %40 = arith.addf %38, %39 : vector<48x128xf32>
    %41 = vector.extract_strided_slice %26 {offsets = [136, 896], sizes = [48, 128], strides = [1, 1]} : vector<512x1152xf32> to vector<48x128xf32>
    %42 = arith.addf %40, %41 : vector<48x128xf32>
    %43 = vector.extract_strided_slice %26 {offsets = [144, 1024], sizes = [48, 128], strides = [1, 1]} : vector<512x1152xf32> to vector<48x128xf32>
    %44 = arith.addf %42, %43 : vector<48x128xf32>
    %45 = vector.extract_strided_slice %26 {offsets = [64, 0], sizes = [48, 128], strides = [1, 1]} : vector<512x1152xf32> to vector<48x128xf32>
    %46 = vector.extract_strided_slice %26 {offsets = [72, 128], sizes = [48, 128], strides = [1, 1]} : vector<512x1152xf32> to vector<48x128xf32>
    %47 = arith.addf %45, %46 : vector<48x128xf32>
    %48 = vector.extract_strided_slice %26 {offsets = [80, 256], sizes = [48, 128], strides = [1, 1]} : vector<512x1152xf32> to vector<48x128xf32>
    %49 = arith.addf %47, %48 : vector<48x128xf32>
    %50 = vector.extract_strided_slice %26 {offsets = [128, 384], sizes = [48, 128], strides = [1, 1]} : vector<512x1152xf32> to vector<48x128xf32>
    %51 = arith.addf %49, %50 : vector<48x128xf32>
    %52 = vector.extract_strided_slice %26 {offsets = [136, 512], sizes = [48, 128], strides = [1, 1]} : vector<512x1152xf32> to vector<48x128xf32>
    %53 = arith.addf %51, %52 : vector<48x128xf32>
    %54 = vector.extract_strided_slice %26 {offsets = [144, 640], sizes = [48, 128], strides = [1, 1]} : vector<512x1152xf32> to vector<48x128xf32>
    %55 = arith.addf %53, %54 : vector<48x128xf32>
    %56 = vector.extract_strided_slice %26 {offsets = [192, 768], sizes = [48, 128], strides = [1, 1]} : vector<512x1152xf32> to vector<48x128xf32>
    %57 = arith.addf %55, %56 : vector<48x128xf32>
    %58 = vector.extract_strided_slice %26 {offsets = [200, 896], sizes = [48, 128], strides = [1, 1]} : vector<512x1152xf32> to vector<48x128xf32>
    %59 = arith.addf %57, %58 : vector<48x128xf32>
    %60 = vector.extract_strided_slice %26 {offsets = [208, 1024], sizes = [48, 128], strides = [1, 1]} : vector<512x1152xf32> to vector<48x128xf32>
    %61 = arith.addf %59, %60 : vector<48x128xf32>
    %62 = arith.maximumf %44, %61 : vector<48x128xf32>
    %63 = vector.extract_strided_slice %62 {offsets = [0, 0], sizes = [8, 128], strides = [1, 1]} : vector<48x128xf32> to vector<8x128xf32>
    %64 = vector.extract_strided_slice %62 {offsets = [8, 0], sizes = [8, 128], strides = [1, 1]} : vector<48x128xf32> to vector<8x128xf32>
    %65 = arith.maximumf %63, %64 : vector<8x128xf32>
    %66 = vector.broadcast %27 : vector<1x128xf32> to vector<8x128xf32>
    %67 = arith.addf %65, %66 : vector<8x128xf32>
    %cst_27 = arith.constant 0.000000e+00 : f32
    %68 = vector.broadcast %cst_27 : f32 to vector<8x128xf32>
    %69 = arith.maximumf %67, %68 : vector<8x128xf32>
    %70 = vector.extract_strided_slice %62 {offsets = [16, 0], sizes = [8, 128], strides = [1, 1]} : vector<48x128xf32> to vector<8x128xf32>
    %71 = vector.extract_strided_slice %62 {offsets = [24, 0], sizes = [8, 128], strides = [1, 1]} : vector<48x128xf32> to vector<8x128xf32>
    %72 = arith.maximumf %70, %71 : vector<8x128xf32>
    %73 = vector.broadcast %27 : vector<1x128xf32> to vector<8x128xf32>
    %74 = arith.addf %72, %73 : vector<8x128xf32>
    %cst_28 = arith.constant 0.000000e+00 : f32
    %75 = vector.broadcast %cst_28 : f32 to vector<8x128xf32>
    %76 = arith.maximumf %74, %75 : vector<8x128xf32>
    %77 = vector.extract_strided_slice %62 {offsets = [32, 0], sizes = [8, 128], strides = [1, 1]} : vector<48x128xf32> to vector<8x128xf32>
    %78 = vector.extract_strided_slice %62 {offsets = [40, 0], sizes = [8, 128], strides = [1, 1]} : vector<48x128xf32> to vector<8x128xf32>
    %79 = arith.maximumf %77, %78 : vector<8x128xf32>
    %80 = vector.broadcast %27 : vector<1x128xf32> to vector<8x128xf32>
    %81 = arith.addf %79, %80 : vector<8x128xf32>
    %cst_29 = arith.constant 0.000000e+00 : f32
    %82 = vector.broadcast %cst_29 : f32 to vector<8x128xf32>
    %83 = arith.maximumf %81, %82 : vector<8x128xf32>
    %84 = vector.extract_strided_slice %26 {offsets = [128, 0], sizes = [48, 128], strides = [1, 1]} : vector<512x1152xf32> to vector<48x128xf32>
    %85 = vector.extract_strided_slice %26 {offsets = [136, 128], sizes = [48, 128], strides = [1, 1]} : vector<512x1152xf32> to vector<48x128xf32>
    %86 = arith.addf %84, %85 : vector<48x128xf32>
    %87 = vector.extract_strided_slice %26 {offsets = [144, 256], sizes = [48, 128], strides = [1, 1]} : vector<512x1152xf32> to vector<48x128xf32>
    %88 = arith.addf %86, %87 : vector<48x128xf32>
    %89 = vector.extract_strided_slice %26 {offsets = [192, 384], sizes = [48, 128], strides = [1, 1]} : vector<512x1152xf32> to vector<48x128xf32>
    %90 = arith.addf %88, %89 : vector<48x128xf32>
    %91 = vector.extract_strided_slice %26 {offsets = [200, 512], sizes = [48, 128], strides = [1, 1]} : vector<512x1152xf32> to vector<48x128xf32>
    %92 = arith.addf %90, %91 : vector<48x128xf32>
    %93 = vector.extract_strided_slice %26 {offsets = [208, 640], sizes = [48, 128], strides = [1, 1]} : vector<512x1152xf32> to vector<48x128xf32>
    %94 = arith.addf %92, %93 : vector<48x128xf32>
    %95 = vector.extract_strided_slice %26 {offsets = [256, 768], sizes = [48, 128], strides = [1, 1]} : vector<512x1152xf32> to vector<48x128xf32>
    %96 = arith.addf %94, %95 : vector<48x128xf32>
    %97 = vector.extract_strided_slice %26 {offsets = [264, 896], sizes = [48, 128], strides = [1, 1]} : vector<512x1152xf32> to vector<48x128xf32>
    %98 = arith.addf %96, %97 : vector<48x128xf32>
    %99 = vector.extract_strided_slice %26 {offsets = [272, 1024], sizes = [48, 128], strides = [1, 1]} : vector<512x1152xf32> to vector<48x128xf32>
    %100 = arith.addf %98, %99 : vector<48x128xf32>
    %101 = vector.extract_strided_slice %26 {offsets = [192, 0], sizes = [48, 128], strides = [1, 1]} : vector<512x1152xf32> to vector<48x128xf32>
    %102 = vector.extract_strided_slice %26 {offsets = [200, 128], sizes = [48, 128], strides = [1, 1]} : vector<512x1152xf32> to vector<48x128xf32>
    %103 = arith.addf %101, %102 : vector<48x128xf32>
    %104 = vector.extract_strided_slice %26 {offsets = [208, 256], sizes = [48, 128], strides = [1, 1]} : vector<512x1152xf32> to vector<48x128xf32>
    %105 = arith.addf %103, %104 : vector<48x128xf32>
    %106 = vector.extract_strided_slice %26 {offsets = [256, 384], sizes = [48, 128], strides = [1, 1]} : vector<512x1152xf32> to vector<48x128xf32>
    %107 = arith.addf %105, %106 : vector<48x128xf32>
    %108 = vector.extract_strided_slice %26 {offsets = [264, 512], sizes = [48, 128], strides = [1, 1]} : vector<512x1152xf32> to vector<48x128xf32>
    %109 = arith.addf %107, %108 : vector<48x128xf32>
    %110 = vector.extract_strided_slice %26 {offsets = [272, 640], sizes = [48, 128], strides = [1, 1]} : vector<512x1152xf32> to vector<48x128xf32>
    %111 = arith.addf %109, %110 : vector<48x128xf32>
    %112 = vector.extract_strided_slice %26 {offsets = [320, 768], sizes = [48, 128], strides = [1, 1]} : vector<512x1152xf32> to vector<48x128xf32>
    %113 = arith.addf %111, %112 : vector<48x128xf32>
    %114 = vector.extract_strided_slice %26 {offsets = [328, 896], sizes = [48, 128], strides = [1, 1]} : vector<512x1152xf32> to vector<48x128xf32>
    %115 = arith.addf %113, %114 : vector<48x128xf32>
    %116 = vector.extract_strided_slice %26 {offsets = [336, 1024], sizes = [48, 128], strides = [1, 1]} : vector<512x1152xf32> to vector<48x128xf32>
    %117 = arith.addf %115, %116 : vector<48x128xf32>
    %118 = arith.maximumf %100, %117 : vector<48x128xf32>
    %119 = vector.extract_strided_slice %118 {offsets = [0, 0], sizes = [8, 128], strides = [1, 1]} : vector<48x128xf32> to vector<8x128xf32>
    %120 = vector.extract_strided_slice %118 {offsets = [8, 0], sizes = [8, 128], strides = [1, 1]} : vector<48x128xf32> to vector<8x128xf32>
    %121 = arith.maximumf %119, %120 : vector<8x128xf32>
    %122 = vector.broadcast %27 : vector<1x128xf32> to vector<8x128xf32>
    %123 = arith.addf %121, %122 : vector<8x128xf32>
    %cst_30 = arith.constant 0.000000e+00 : f32
    %124 = vector.broadcast %cst_30 : f32 to vector<8x128xf32>
    %125 = arith.maximumf %123, %124 : vector<8x128xf32>
    %126 = vector.extract_strided_slice %118 {offsets = [16, 0], sizes = [8, 128], strides = [1, 1]} : vector<48x128xf32> to vector<8x128xf32>
    %127 = vector.extract_strided_slice %118 {offsets = [24, 0], sizes = [8, 128], strides = [1, 1]} : vector<48x128xf32> to vector<8x128xf32>
    %128 = arith.maximumf %126, %127 : vector<8x128xf32>
    %129 = vector.broadcast %27 : vector<1x128xf32> to vector<8x128xf32>
    %130 = arith.addf %128, %129 : vector<8x128xf32>
    %cst_31 = arith.constant 0.000000e+00 : f32
    %131 = vector.broadcast %cst_31 : f32 to vector<8x128xf32>
    %132 = arith.maximumf %130, %131 : vector<8x128xf32>
    %133 = vector.extract_strided_slice %118 {offsets = [32, 0], sizes = [8, 128], strides = [1, 1]} : vector<48x128xf32> to vector<8x128xf32>
    %134 = vector.extract_strided_slice %118 {offsets = [40, 0], sizes = [8, 128], strides = [1, 1]} : vector<48x128xf32> to vector<8x128xf32>
    %135 = arith.maximumf %133, %134 : vector<8x128xf32>
    %136 = vector.broadcast %27 : vector<1x128xf32> to vector<8x128xf32>
    %137 = arith.addf %135, %136 : vector<8x128xf32>
    %cst_32 = arith.constant 0.000000e+00 : f32
    %138 = vector.broadcast %cst_32 : f32 to vector<8x128xf32>
    %139 = arith.maximumf %137, %138 : vector<8x128xf32>
    %140 = vector.extract_strided_slice %26 {offsets = [256, 0], sizes = [48, 128], strides = [1, 1]} : vector<512x1152xf32> to vector<48x128xf32>
    %141 = vector.extract_strided_slice %26 {offsets = [264, 128], sizes = [48, 128], strides = [1, 1]} : vector<512x1152xf32> to vector<48x128xf32>
    %142 = arith.addf %140, %141 : vector<48x128xf32>
    %143 = vector.extract_strided_slice %26 {offsets = [272, 256], sizes = [48, 128], strides = [1, 1]} : vector<512x1152xf32> to vector<48x128xf32>
    %144 = arith.addf %142, %143 : vector<48x128xf32>
    %145 = vector.extract_strided_slice %26 {offsets = [320, 384], sizes = [48, 128], strides = [1, 1]} : vector<512x1152xf32> to vector<48x128xf32>
    %146 = arith.addf %144, %145 : vector<48x128xf32>
    %147 = vector.extract_strided_slice %26 {offsets = [328, 512], sizes = [48, 128], strides = [1, 1]} : vector<512x1152xf32> to vector<48x128xf32>
    %148 = arith.addf %146, %147 : vector<48x128xf32>
    %149 = vector.extract_strided_slice %26 {offsets = [336, 640], sizes = [48, 128], strides = [1, 1]} : vector<512x1152xf32> to vector<48x128xf32>
    %150 = arith.addf %148, %149 : vector<48x128xf32>
    %151 = vector.extract_strided_slice %26 {offsets = [384, 768], sizes = [48, 128], strides = [1, 1]} : vector<512x1152xf32> to vector<48x128xf32>
    %152 = arith.addf %150, %151 : vector<48x128xf32>
    %153 = vector.extract_strided_slice %26 {offsets = [392, 896], sizes = [48, 128], strides = [1, 1]} : vector<512x1152xf32> to vector<48x128xf32>
    %154 = arith.addf %152, %153 : vector<48x128xf32>
    %155 = vector.extract_strided_slice %26 {offsets = [400, 1024], sizes = [48, 128], strides = [1, 1]} : vector<512x1152xf32> to vector<48x128xf32>
    %156 = arith.addf %154, %155 : vector<48x128xf32>
    %157 = vector.extract_strided_slice %26 {offsets = [320, 0], sizes = [48, 128], strides = [1, 1]} : vector<512x1152xf32> to vector<48x128xf32>
    %158 = vector.extract_strided_slice %26 {offsets = [328, 128], sizes = [48, 128], strides = [1, 1]} : vector<512x1152xf32> to vector<48x128xf32>
    %159 = arith.addf %157, %158 : vector<48x128xf32>
    %160 = vector.extract_strided_slice %26 {offsets = [336, 256], sizes = [48, 128], strides = [1, 1]} : vector<512x1152xf32> to vector<48x128xf32>
    %161 = arith.addf %159, %160 : vector<48x128xf32>
    %162 = vector.extract_strided_slice %26 {offsets = [384, 384], sizes = [48, 128], strides = [1, 1]} : vector<512x1152xf32> to vector<48x128xf32>
    %163 = arith.addf %161, %162 : vector<48x128xf32>
    %164 = vector.extract_strided_slice %26 {offsets = [392, 512], sizes = [48, 128], strides = [1, 1]} : vector<512x1152xf32> to vector<48x128xf32>
    %165 = arith.addf %163, %164 : vector<48x128xf32>
    %166 = vector.extract_strided_slice %26 {offsets = [400, 640], sizes = [48, 128], strides = [1, 1]} : vector<512x1152xf32> to vector<48x128xf32>
    %167 = arith.addf %165, %166 : vector<48x128xf32>
    %168 = vector.extract_strided_slice %26 {offsets = [448, 768], sizes = [48, 128], strides = [1, 1]} : vector<512x1152xf32> to vector<48x128xf32>
    %169 = arith.addf %167, %168 : vector<48x128xf32>
    %170 = vector.extract_strided_slice %26 {offsets = [456, 896], sizes = [48, 128], strides = [1, 1]} : vector<512x1152xf32> to vector<48x128xf32>
    %171 = arith.addf %169, %170 : vector<48x128xf32>
    %172 = vector.extract_strided_slice %26 {offsets = [464, 1024], sizes = [48, 128], strides = [1, 1]} : vector<512x1152xf32> to vector<48x128xf32>
    %173 = arith.addf %171, %172 : vector<48x128xf32>
    %174 = arith.maximumf %156, %173 : vector<48x128xf32>
    %175 = vector.extract_strided_slice %174 {offsets = [0, 0], sizes = [8, 128], strides = [1, 1]} : vector<48x128xf32> to vector<8x128xf32>
    %176 = vector.extract_strided_slice %174 {offsets = [8, 0], sizes = [8, 128], strides = [1, 1]} : vector<48x128xf32> to vector<8x128xf32>
    %177 = arith.maximumf %175, %176 : vector<8x128xf32>
    %178 = vector.broadcast %27 : vector<1x128xf32> to vector<8x128xf32>
    %179 = arith.addf %177, %178 : vector<8x128xf32>
    %cst_33 = arith.constant 0.000000e+00 : f32
    %180 = vector.broadcast %cst_33 : f32 to vector<8x128xf32>
    %181 = arith.maximumf %179, %180 : vector<8x128xf32>
    %182 = vector.extract_strided_slice %174 {offsets = [16, 0], sizes = [8, 128], strides = [1, 1]} : vector<48x128xf32> to vector<8x128xf32>
    %183 = vector.extract_strided_slice %174 {offsets = [24, 0], sizes = [8, 128], strides = [1, 1]} : vector<48x128xf32> to vector<8x128xf32>
    %184 = arith.maximumf %182, %183 : vector<8x128xf32>
    %185 = vector.broadcast %27 : vector<1x128xf32> to vector<8x128xf32>
    %186 = arith.addf %184, %185 : vector<8x128xf32>
    %cst_34 = arith.constant 0.000000e+00 : f32
    %187 = vector.broadcast %cst_34 : f32 to vector<8x128xf32>
    %188 = arith.maximumf %186, %187 : vector<8x128xf32>
    %189 = vector.extract_strided_slice %174 {offsets = [32, 0], sizes = [8, 128], strides = [1, 1]} : vector<48x128xf32> to vector<8x128xf32>
    %190 = vector.extract_strided_slice %174 {offsets = [40, 0], sizes = [8, 128], strides = [1, 1]} : vector<48x128xf32> to vector<8x128xf32>
    %191 = arith.maximumf %189, %190 : vector<8x128xf32>
    %192 = vector.broadcast %27 : vector<1x128xf32> to vector<8x128xf32>
    %193 = arith.addf %191, %192 : vector<8x128xf32>
    %cst_35 = arith.constant 0.000000e+00 : f32
    %194 = vector.broadcast %cst_35 : f32 to vector<8x128xf32>
    %195 = arith.maximumf %193, %194 : vector<8x128xf32>
    %196 = tpu.concatenate %69, %76, %83, %125, %132, %139, %181, %188, %195 in 1 : vector<8x128xf32>, vector<8x128xf32>, vector<8x128xf32>, vector<8x128xf32>, vector<8x128xf32>, vector<8x128xf32>, vector<8x128xf32>, vector<8x128xf32>, vector<8x128xf32> -> vector<8x1152xf32>
    %197 = arith.truncf %196 : vector<8x1152xf32> to vector<8x1152xbf16>
    %c0_36 = arith.constant 0 : index
    %c0_37 = arith.constant 0 : index
    %198 = vector.load %arg6[%c0_36, %c0_37] : memref<1152x128xbf16, #tpu.memory_space<vmem>>, vector<1152x128xbf16>
    %cst_38 = arith.constant dense<0.000000e+00> : vector<8x128xf32>
    %199 = tpu.matmul %197, %198, %cst_38 {dimension_numbers = #tpu.dot_dimension_numbers<[1], [0], [0], [1], [0, 0, 1, 1], [], []>} : vector<8x1152xbf16>, vector<1152x128xbf16>, vector<8x128xf32> -> vector<8x128xf32>
    %c0_39 = arith.constant 0 : index
    %c0_40 = arith.constant 0 : index
    %200 = vector.load %arg7[%c0_39, %c0_40] : memref<1x128xf32, #tpu.memory_space<vmem>>, vector<1x128xf32>
    %201 = vector.broadcast %200 : vector<1x128xf32> to vector<8x128xf32>
    %202 = arith.addf %199, %201 : vector<8x128xf32>
    %cst_41 = arith.constant 0.000000e+00 : f32
    %203 = vector.broadcast %cst_41 : f32 to vector<8x128xf32>
    %204 = arith.maximumf %202, %203 : vector<8x128xf32>
    %c0_42 = arith.constant 0 : index
    %c0_43 = arith.constant 0 : index
    %205 = vector.load %arg8[%c0_42, %c0_43] : memref<1x128xf32, #tpu.memory_space<vmem>>, vector<1x128xf32>
    %206 = vector.broadcast %205 : vector<1x128xf32> to vector<8x128xf32>
    %207 = arith.mulf %204, %206 : vector<8x128xf32>
    %cst_44 = arith.constant dense<0.000000e+00> : vector<8xf32>
    %208 = vector.multi_reduction <add>, %207, %cst_44 [1] : vector<8x128xf32> to vector<8xf32>
    %209 = vector.shape_cast %208 : vector<8xf32> to vector<8x1xf32>
    %c0_45 = arith.constant 0 : index
    %c0_46 = arith.constant 0 : index
    %210 = vector.load %arg9[%c0_45, %c0_46] : memref<1x1xf32, #tpu.memory_space<vmem>>, vector<1x1xf32>
    %211 = vector.broadcast %210 : vector<1x1xf32> to vector<8x1xf32>
    %212 = arith.addf %209, %211 : vector<8x1xf32>
    %c0_47 = arith.constant 0 : index
    %c0_48 = arith.constant 0 : index
    %213 = vector.load %arg10[%c0_47, %c0_48] : memref<8x1xf32, #tpu.memory_space<vmem>>, vector<8x1xf32>
    tpu.vector_store %arg10[%c0_47, %c0_48], %212 {strides = array<i32>} : memref<8x1xf32, #tpu.memory_space<vmem>>, vector<8x1xf32>,
    return
  }
  func.func @transform_0(%arg0: i32) -> (i32, i32, i32) {
    %c0_i32 = arith.constant 0 : i32
    %c0_i32_0 = arith.constant 0 : i32
    %c0_i32_1 = arith.constant 0 : i32
    return %arg0, %c0_i32, %c0_i32_0 : i32, i32, i32
  }
  func.func @transform_1(%arg0: i32) -> (i32, i32) {
    %c0_i32 = arith.constant 0 : i32
    %c0_i32_0 = arith.constant 0 : i32
    %c0_i32_1 = arith.constant 0 : i32
    return %c0_i32, %c0_i32_0 : i32, i32
  }
  func.func @transform_2(%arg0: i32) -> (i32, i32) {
    %c0_i32 = arith.constant 0 : i32
    %c0_i32_0 = arith.constant 0 : i32
    %c0_i32_1 = arith.constant 0 : i32
    return %c0_i32, %c0_i32_0 : i32, i32
  }
  func.func @transform_3(%arg0: i32) -> (i32, i32) {
    %c0_i32 = arith.constant 0 : i32
    %c0_i32_0 = arith.constant 0 : i32
    %c0_i32_1 = arith.constant 0 : i32
    return %c0_i32, %c0_i32_0 : i32, i32
  }
  func.func @transform_4(%arg0: i32) -> (i32, i32) {
    %c0_i32 = arith.constant 0 : i32
    %c0_i32_0 = arith.constant 0 : i32
    %c0_i32_1 = arith.constant 0 : i32
    return %c0_i32, %c0_i32_0 : i32, i32
  }
  func.func @transform_5(%arg0: i32) -> (i32, i32) {
    %c0_i32 = arith.constant 0 : i32
    %c0_i32_0 = arith.constant 0 : i32
    %c0_i32_1 = arith.constant 0 : i32
    return %c0_i32, %c0_i32_0 : i32, i32
  }
  func.func @transform_6(%arg0: i32) -> (i32, i32) {
    %c0_i32 = arith.constant 0 : i32
    %c0_i32_0 = arith.constant 0 : i32
    %c0_i32_1 = arith.constant 0 : i32
    return %c0_i32, %c0_i32_0 : i32, i32
  }
  func.func @transform_7(%arg0: i32) -> (i32, i32) {
    %c0_i32 = arith.constant 0 : i32
    %c0_i32_0 = arith.constant 0 : i32
    %c0_i32_1 = arith.constant 0 : i32
    return %c0_i32, %c0_i32_0 : i32, i32
  }
  func.func @transform_8(%arg0: i32) -> (i32, i32) {
    %c0_i32 = arith.constant 0 : i32
    %c0_i32_0 = arith.constant 0 : i32
    %c0_i32_1 = arith.constant 0 : i32
    return %c0_i32, %c0_i32_0 : i32, i32
  }
  func.func @transform_9(%arg0: i32) -> (i32, i32) {
    %c0_i32 = arith.constant 0 : i32
    %c0_i32_0 = arith.constant 0 : i32
    return %arg0, %c0_i32 : i32, i32
  }
}

</mosaic_0001>

<bundles_post_ra>
// kernel: convnet_forward.1
= control target key start
LH: loop header
LB: loop body
LE: loop exit
PB: predicated region body
PF: predicated region fallthrough
CT: control target
= control target key end

     0   :  { %s7993_s11 = smov 0   ;;  %s10446_s0 = inlined_call_operand.vmem [shape: f32[2,2048,32], index: 0, kind: input, shape index: {}]   ;;  %s10447_s1 = inlined_call_operand.vmem [shape: f32[32,128], index: 1, kind: input, shape index: {}]   ;;  %s10448_s2 = inlined_call_operand.vmem [shape: f32[1,128], index: 2, kind: input, shape index: {}]   ;;  %s10449_s3 = inlined_call_operand.vmem [shape: bf16[128,1152], index: 3, kind: input, shape index: {}]   ;;  %s10450_s4 = inlined_call_operand.vmem [shape: f32[1,128], index: 4, kind: input, shape index: {}]   ;;  %s10451_s5 = inlined_call_operand.vmem [shape: bf16[1152,128], index: 5, kind: input, shape index: {}]   ;;  %s10452_s6 = inlined_call_operand.vmem [shape: f32[1,128], index: 6, kind: input, shape index: {}]   ;;  %s10453_s7 = inlined_call_operand.vmem [shape: f32[1,128], index: 7, kind: input, shape index: {}]   ;;  %s10454_s8 = inlined_call_operand.<no memory space> [shape: f32[1,1], index: 8, kind: input, shape index: {}]   ;;  %s10455_s9 = inlined_call_operand.vmem [shape: f32[16,1], index: 9, kind: output, shape index: {}]  }
   0x1   :  { %v14_v0 = vstv %s10454_s8 }
   0x2   :  { %15 = vst [vmem:[#allocation2] sm:$0x1] %v14_v0 }
   0x3 LB: > { %s6365_s12 = sadd.s32 4294967295, %s7935_s11   ;;  %p6369_p0 = scmp.ge.s32.totalorder %s7935_s11, 1  ;;  %s7935_s11 = sphi %s7993_s11, %s21_s11  }
   0x4   : > { %p289_p1 = scmp.lt.s32.totalorder %s7935_s11, 3 }
   0x6   : > { %p290_p2 = pnand %p6369_p0, %p289_p1 }
   0x8   : > { %293 = sbr.rel (%p290_p2) target bundleno = 1651 (0x673), region = 56 }
   0xf   : > { %v398_v1 = vld [vmem:[%s10447_s1] sm:$0xff]  ;;  %v399_v2 = vld [vmem:[%s10447_s1 + $0x8] sm:$0xff]  ;;  %v400_v3 = vld [vmem:[%s10447_s1 + $0x10] sm:$0xff]  ;;  %p324_p3 = scmp.lt.s32.totalorder %s6365_s12, 1  ;;  %vm402_vm0 = vcmask 261120   ;;  %vm7939_vm1 = vmmov 0  }
  0x10   : > { %v8010_v4 = vpack.c.bf16 %v399_v2, %v398_v1  ;;  %v401_v5 = vld [vmem:[%s10447_s1 + $0x18] sm:$0xff]  ;;  %vm6310_vm2 = vcmask 7168  }
  0x11   : > { %v8015_v6 = vpack.c.bf16 %v401_v5, %v400_v3  ;;  %s10807_s12 = smov (!%p324_p3, %s6365_s12), 1 }
  0x12   : > { %7707 = vmatprep.subr.bf16.mxu0 %v8010_v4  ;;  %7738 = vmatprep.subr.bf16.mxu1 %v8010_v4  ;;  %s6780_s20 = sshll.u32 %s10807_s12, 11  ;;  %s6372_s22 = sshll.u32 %s10807_s12, 3 }
  0x13   : > { %7709 = vmatpush3.bf16.msra.mxu0 %v8010_v4  ;;  %7740 = vmatpush3.bf16.msra.mxu1 %v8010_v4  ;;  %s8029_s23 = scalar_lea.vmem %s10446_s0, %s6780_s20  ;;  %s332_s26 = scalar_lea.vmem %s10455_s9, %s6372_s22 }
  0x14   : > { %7711 = vmatprep.subr.bf16.mxu0 %v8015_v6  ;;  %7739 = vmatprep.subr.bf16.mxu1 %v8015_v6  ;;  %v334_v7 = vld [vmem:[%s8029_s23] sm:$0xff]  ;;  %v335_v9 = vld [vmem:[%s8029_s23 + $0x8] sm:$0xff]  ;;  %v336_v11 = vld [vmem:[%s8029_s23 + $0x10] sm:$0xff] }
  0x15   : > { %v390_v8 = vld [vmem:[%s8029_s23 + $0x1c0] sm:$0xff]  ;;  %7198 = vmatprep.mubr.msk.f32.mxu0 %vm402_vm0, %v334_v7  ;;  %v391_v10 = vld [vmem:[%s8029_s23 + $0x1c8] sm:$0xff]  ;;  %v392_v12 = vld [vmem:[%s8029_s23 + $0x1d0] sm:$0xff] }
  0x16   : > { %7282 = vmatprep.mubr.msk.f32.mxu1 %vm402_vm0, %v390_v8  ;;  %v337_v13 = vld [vmem:[%s8029_s23 + $0x18] sm:$0xff]  ;;  %v338_v15 = vld [vmem:[%s8029_s23 + $0x20] sm:$0xff]  ;;  %v339_v17 = vld [vmem:[%s8029_s23 + $0x28] sm:$0xff] }
  0x17   : > { %7713 = vmatpush3.bf16.msra.mxu0 %v8015_v6  ;;  %7741 = vmatpush3.bf16.msra.mxu1 %v8015_v6  ;;  %v393_v14 = vld [vmem:[%s8029_s23 + $0x1d8] sm:$0xff]  ;;  %v394_v16 = vld [vmem:[%s8029_s23 + $0x1e0] sm:$0xff]  ;;  %v395_v18 = vld [vmem:[%s8029_s23 + $0x1e8] sm:$0xff] }
  0x18   : > { %7715 = vmatprep.subr.bf16.mxu1 %v8010_v4  ;;  %7723 = vmatprep.subr.bf16.mxu0 %v8010_v4  ;;  %v340_v19 = vld [vmem:[%s8029_s23 + $0x30] sm:$0xff]  ;;  %v341_v21 = vld [vmem:[%s8029_s23 + $0x38] sm:$0xff]  ;;  %v342_v23 = vld [vmem:[%s8029_s23 + $0x40] sm:$0xff] }
  0x19   : > { %v396_v20 = vld [vmem:[%s8029_s23 + $0x1f0] sm:$0xff]  ;;  %v397_v22 = vld [vmem:[%s8029_s23 + $0x1f8] sm:$0xff]  ;;  %v980_v24 = vld [vmem:[%s8029_s23 + $0x200] sm:$0xff] }
  0x1a   : > { %7199 = vmatmul.mubr.msk.f32.vlgmr.msra.gmra.mrb[0].mxu0 %vm402_vm0, %v335_v9  ;;  %7283 = vmatmul.mubr.msk.f32.vlgmr.msra.gmra.mrb[0].mxu1 %vm402_vm0, %v391_v10  ;;  %v343_v25 = vld [vmem:[%s8029_s23 + $0x48] sm:$0xff]  ;;  %v344_v27 = vld [vmem:[%s8029_s23 + $0x50] sm:$0xff]  ;;  %v345_v29 = vld [vmem:[%s8029_s23 + $0x58] sm:$0xff] }
  0x1b   : > { %7717 = vmatpush3.bf16.msra.mxu1 %v8010_v4  ;;  %7201 = vmatprep.mubr.msk.f32.mxu0 %vm402_vm0, %v336_v11  ;;  %v981_v26 = vld [vmem:[%s8029_s23 + $0x208] sm:$0xff]  ;;  %v982_v28 = vld [vmem:[%s8029_s23 + $0x210] sm:$0xff]  ;;  %v983_v30 = vld [vmem:[%s8029_s23 + $0x218] sm:$0xff] }
  0x1c   : > { %7285 = vmatprep.mubr.msk.f32.mxu1 %vm402_vm0, %v392_v12  ;;  %7719 = vmatprep.subr.bf16.mxu1 %v8015_v6  ;;  %v346_v31 = vld [vmem:[%s8029_s23 + $0x60] sm:$0xff]  ;;  %v347_v33 = vld [vmem:[%s8029_s23 + $0x68] sm:$0xff]  ;;  %v348_v35 = vld [vmem:[%s8029_s23 + $0x70] sm:$0xff] }
  0x1d   : > { %7725 = vmatpush3.bf16.msra.mxu0 %v8010_v4  ;;  %v984_v32 = vld [vmem:[%s8029_s23 + $0x220] sm:$0xff]  ;;  %v985_v34 = vld [vmem:[%s8029_s23 + $0x228] sm:$0xff]  ;;  %v986_v36 = vld [vmem:[%s8029_s23 + $0x230] sm:$0xff] }
  0x1e   : > { %7202 = vmatmul.mubr.msk.f32.gmra.mrb[2].mxu0 %vm402_vm0, %v337_v13  ;;  %7286 = vmatmul.mubr.msk.f32.gmra.mrb[2].mxu1 %vm402_vm0, %v393_v14  ;;  %v349_v37 = vld [vmem:[%s8029_s23 + $0x78] sm:$0xff]  ;;  %v350_v39 = vld [vmem:[%s8029_s23 + $0x80] sm:$0xff]  ;;  %v351_v41 = vld [vmem:[%s8029_s23 + $0x88] sm:$0xff] }
  0x1f   : > { %7204 = vmatprep.mubr.msk.f32.mxu0 %vm402_vm0, %v338_v15  ;;  %7288 = vmatprep.mubr.msk.f32.mxu1 %vm402_vm0, %v394_v16  ;;  %v987_v38 = vld [vmem:[%s8029_s23 + $0x238] sm:$0xff]  ;;  %v988_v40 = vld [vmem:[%s8029_s23 + $0x240] sm:$0xff]  ;;  %v989_v42 = vld [vmem:[%s8029_s23 + $0x248] sm:$0xff] }
  0x20   : > { %7721 = vmatpush3.bf16.msra.mxu1 %v8015_v6  ;;  %7727 = vmatprep.subr.bf16.mxu0 %v8015_v6  ;;  %v352_v43 = vld [vmem:[%s8029_s23 + $0x90] sm:$0xff]  ;;  %v353_v45 = vld [vmem:[%s8029_s23 + $0x98] sm:$0xff]  ;;  %v354_v47 = vld [vmem:[%s8029_s23 + $0xa0] sm:$0xff] }
  0x21   : > { %7731 = vmatprep.subr.bf16.mxu1 %v8010_v4  ;;  %7729 = vmatpush3.bf16.msra.mxu0 %v8015_v6  ;;  %v990_v44 = vld [vmem:[%s8029_s23 + $0x250] sm:$0xff]  ;;  %v991_v46 = vld [vmem:[%s8029_s23 + $0x258] sm:$0xff]  ;;  %v992_v48 = vld [vmem:[%s8029_s23 + $0x260] sm:$0xff] }
  0x22   : > { %7205 = vmatmul.mubr.msk.f32.gmra.mrb[4].mxu0 %vm402_vm0, %v339_v17  ;;  %7289 = vmatmul.mubr.msk.f32.gmra.mrb[4].mxu1 %vm402_vm0, %v395_v18  ;;  %v355_v49 = vld [vmem:[%s8029_s23 + $0xa8] sm:$0xff]  ;;  %v356_v51 = vld [vmem:[%s8029_s23 + $0xb0] sm:$0xff]  ;;  %v357_v53 = vld [vmem:[%s8029_s23 + $0xb8] sm:$0xff] }
  0x23   : > { %7207 = vmatprep.mubr.msk.f32.mxu0 %vm402_vm0, %v340_v19  ;;  %7291 = vmatprep.mubr.msk.f32.mxu1 %vm402_vm0, %v396_v20  ;;  %v993_v50 = vld [vmem:[%s8029_s23 + $0x268] sm:$0xff]  ;;  %v994_v52 = vld [vmem:[%s8029_s23 + $0x270] sm:$0xff]  ;;  %v995_v54 = vld [vmem:[%s8029_s23 + $0x278] sm:$0xff] }
  0x24   : > { %v358_v55 = vld [vmem:[%s8029_s23 + $0xc0] sm:$0xff]  ;;  %v359_v57 = vld [vmem:[%s8029_s23 + $0xc8] sm:$0xff]  ;;  %v360_v59 = vld [vmem:[%s8029_s23 + $0xd0] sm:$0xff] }
  0x25   : > { %v996_v56 = vld [vmem:[%s8029_s23 + $0x280] sm:$0xff]  ;;  %v997_v58 = vld [vmem:[%s8029_s23 + $0x288] sm:$0xff]  ;;  %v998_v60 = vld [vmem:[%s8029_s23 + $0x290] sm:$0xff] }
  0x26   : > { %7208 = vmatmul.mubr.msk.f32.gmra.mrb[6].mxu0 %vm402_vm0, %v341_v21  ;;  %7292 = vmatmul.mubr.msk.f32.gmra.mrb[6].mxu1 %vm402_vm0, %v397_v22  ;;  %v361_v61 = vld [vmem:[%s8029_s23 + $0xd8] sm:$0xff]  ;;  %v362_v63 = vld [vmem:[%s8029_s23 + $0xe0] sm:$0xff]  ;;  %v363_v1 = vld [vmem:[%s8029_s23 + $0xe8] sm:$0xff] }
  0x27   : > { %7210 = vmatprep.mubr.msk.f32.mxu0 %vm402_vm0, %v342_v23  ;;  %7302 = vmatprep.mubr.msk.f32.mxu1 %vm402_vm0, %v980_v24  ;;  %v999_v62 = vld [vmem:[%s8029_s23 + $0x298] sm:$0xff]  ;;  %v1000_v0 = vld [vmem:[%s8029_s23 + $0x2a0] sm:$0xff]  ;;  %v1001_v2 = vld [vmem:[%s8029_s23 + $0x2a8] sm:$0xff] }
  0x28   : > { %v364_v3 = vld [vmem:[%s8029_s23 + $0xf0] sm:$0xff]  ;;  %v365_v5 = vld [vmem:[%s8029_s23 + $0xf8] sm:$0xff]  ;;  %v366_v7 = vld [vmem:[%s8029_s23 + $0x100] sm:$0xff] }
  0x29   : > { %v1004_v8 = vld [vmem:[%s8029_s23 + $0x2c0] sm:$0xff]  ;;  %v367_v9 = vld [vmem:[%s8029_s23 + $0x108] sm:$0xff]  ;;  %v368_v11 = vld [vmem:[%s8029_s23 + $0x110] sm:$0xff] }
  0x2a   : > { %7211 = vmatmul.mubr.msk.f32.gmra.mrb[8].mxu0 %vm402_vm0, %v343_v25  ;;  %7303 = vmatmul.mubr.msk.f32.vlgmr.msra.gmra.mrb[8].mxu1 %vm402_vm0, %v981_v26  ;;  %v1005_v10 = vld [vmem:[%s8029_s23 + $0x2c8] sm:$0xff]  ;;  %v1006_v12 = vld [vmem:[%s8029_s23 + $0x2d0] sm:$0xff]  ;;  %v369_v13 = vld [vmem:[%s8029_s23 + $0x118] sm:$0xff] }
  0x2b   : > { %7733 = vmatpush3.bf16.msra.mxu1 %v8010_v4  ;;  %7213 = vmatprep.mubr.msk.f32.mxu0 %vm402_vm0, %v344_v27  ;;  %v1002_v4 = vld [vmem:[%s8029_s23 + $0x2b0] sm:$0xff]  ;;  %v1007_v14 = vld [vmem:[%s8029_s23 + $0x2d8] sm:$0xff]  ;;  %v370_v15 = vld [vmem:[%s8029_s23 + $0x120] sm:$0xff] }
  0x2c   : > { %7305 = vmatprep.mubr.msk.f32.mxu1 %vm402_vm0, %v982_v28  ;;  %7735 = vmatprep.subr.bf16.mxu1 %v8015_v6  ;;  %v1008_v16 = vld [vmem:[%s8029_s23 + $0x2e0] sm:$0xff]  ;;  %v371_v17 = vld [vmem:[%s8029_s23 + $0x128] sm:$0xff]  ;;  %v372_v19 = vld [vmem:[%s8029_s23 + $0x130] sm:$0xff] }
  0x2d   : > { %v1009_v18 = vld [vmem:[%s8029_s23 + $0x2e8] sm:$0xff]  ;;  %v1010_v20 = vld [vmem:[%s8029_s23 + $0x2f0] sm:$0xff]  ;;  %v373_v21 = vld [vmem:[%s8029_s23 + $0x138] sm:$0xff] }
  0x2e   : > { %7214 = vmatmul.mubr.msk.f32.gmra.mrb[10].mxu0 %vm402_vm0, %v345_v29  ;;  %7306 = vmatmul.mubr.msk.f32.gmra.mrb[10].mxu1 %vm402_vm0, %v983_v30  ;;  %v1011_v22 = vld [vmem:[%s8029_s23 + $0x2f8] sm:$0xff]  ;;  %v374_v23 = vld [vmem:[%s8029_s23 + $0x140] sm:$0xff]  ;;  %v375_v25 = vld [vmem:[%s8029_s23 + $0x148] sm:$0xff] }
  0x2f   : > { %7216 = vmatprep.mubr.msk.f32.mxu0 %vm402_vm0, %v346_v31  ;;  %7308 = vmatprep.mubr.msk.f32.mxu1 %vm402_vm0, %v984_v32  ;;  %v1012_v24 = vld [vmem:[%s8029_s23 + $0x300] sm:$0xff]  ;;  %v1013_v26 = vld [vmem:[%s8029_s23 + $0x308] sm:$0xff]  ;;  %v376_v27 = vld [vmem:[%s8029_s23 + $0x150] sm:$0xff] }
  0x30   : > { %7737 = vmatpush3.bf16.msra.mxu1 %v8015_v6  ;;  %v1003_v6 = vld [vmem:[%s8029_s23 + $0x2b8] sm:$0xff]  ;;  %v1014_v28 = vld [vmem:[%s8029_s23 + $0x310] sm:$0xff]  ;;  %v378_v31 = vld [vmem:[%s8029_s23 + $0x160] sm:$0xff] }
  0x31   : > { %v377_v29 = vld [vmem:[%s8029_s23 + $0x158] sm:$0xff]  ;;  %v1016_v32 = vld [vmem:[%s8029_s23 + $0x320] sm:$0xff] }
  0x32   : > { %7217 = vmatmul.mubr.msk.f32.gmra.mrb[12].mxu0 %vm402_vm0, %v347_v33  ;;  %7309 = vmatmul.mubr.msk.f32.gmra.mrb[12].mxu1 %vm402_vm0, %v985_v34  ;;  %v1015_v30 = vld [vmem:[%s8029_s23 + $0x318] sm:$0xff]  ;;  %v379_v33 = vld [vmem:[%s8029_s23 + $0x168] sm:$0xff] }
  0x33   : > { %7219 = vmatprep.mubr.msk.f32.mxu0 %vm402_vm0, %v348_v35  ;;  %7311 = vmatprep.mubr.msk.f32.mxu1 %vm402_vm0, %v986_v36  ;;  %v1017_v34 = vld [vmem:[%s8029_s23 + $0x328] sm:$0xff]  ;;  %v380_v35 = vld [vmem:[%s8029_s23 + $0x170] sm:$0xff] }
  0x34   : > { %v1018_v36 = vld [vmem:[%s8029_s23 + $0x330] sm:$0xff] }
  0x36   : > { %7220 = vmatmul.mubr.msk.f32.gmra.mrb[14].mxu0 %vm402_vm0, %v349_v37  ;;  %7312 = vmatmul.mubr.msk.f32.gmra.mrb[14].mxu1 %vm402_vm0, %v987_v38  ;;  %v381_v37 = vld [vmem:[%s8029_s23 + $0x178] sm:$0xff] }
  0x37   : > { %7222 = vmatprep.mubr.msk.f32.mxu0 %vm402_vm0, %v350_v39  ;;  %7314 = vmatprep.mubr.msk.f32.mxu1 %vm402_vm0, %v988_v40  ;;  %v1019_v38 = vld [vmem:[%s8029_s23 + $0x338] sm:$0xff]  ;;  %v382_v39 = vld [vmem:[%s8029_s23 + $0x180] sm:$0xff] }
  0x38   : > { %v1020_v40 = vld [vmem:[%s8029_s23 + $0x340] sm:$0xff] }
  0x3a   : > { %7223 = vmatmul.mubr.msk.f32.gmra.mrb[16].mxu0 %vm402_vm0, %v351_v41  ;;  %7315 = vmatmul.mubr.msk.f32.gmra.mrb[16].mxu1 %vm402_vm0, %v989_v42  ;;  %v383_v41 = vld [vmem:[%s8029_s23 + $0x188] sm:$0xff] }
  0x3b   : > { %7225 = vmatprep.mubr.msk.f32.mxu0 %vm402_vm0, %v352_v43  ;;  %7317 = vmatprep.mubr.msk.f32.mxu1 %vm402_vm0, %v990_v44  ;;  %v1021_v42 = vld [vmem:[%s8029_s23 + $0x348] sm:$0xff]  ;;  %v384_v43 = vld [vmem:[%s8029_s23 + $0x190] sm:$0xff] }
  0x3c   : > { %v1022_v44 = vld [vmem:[%s8029_s23 + $0x350] sm:$0xff] }
  0x3e   : > { %7226 = vmatmul.mubr.msk.f32.gmra.mrb[18].mxu0 %vm402_vm0, %v353_v45  ;;  %7318 = vmatmul.mubr.msk.f32.gmra.mrb[18].mxu1 %vm402_vm0, %v991_v46  ;;  %v385_v45 = vld [vmem:[%s8029_s23 + $0x198] sm:$0xff] }
  0x3f   : > { %7228 = vmatprep.mubr.msk.f32.mxu0 %vm402_vm0, %v354_v47  ;;  %7320 = vmatprep.mubr.msk.f32.mxu1 %vm402_vm0, %v992_v48  ;;  %v1023_v46 = vld [vmem:[%s8029_s23 + $0x358] sm:$0xff]  ;;  %v386_v47 = vld [vmem:[%s8029_s23 + $0x1a0] sm:$0xff] }
  0x40   : > { %v1024_v48 = vld [vmem:[%s8029_s23 + $0x360] sm:$0xff] }
  0x42   : > { %7229 = vmatmul.mubr.msk.f32.gmra.mrb[20].mxu0 %vm402_vm0, %v355_v49  ;;  %7321 = vmatmul.mubr.msk.f32.gmra.mrb[20].mxu1 %vm402_vm0, %v993_v50  ;;  %v387_v49 = vld [vmem:[%s8029_s23 + $0x1a8] sm:$0xff] }
  0x43   : > { %7231 = vmatprep.mubr.msk.f32.mxu0 %vm402_vm0, %v356_v51  ;;  %7323 = vmatprep.mubr.msk.f32.mxu1 %vm402_vm0, %v994_v52  ;;  %v1025_v50 = vld [vmem:[%s8029_s23 + $0x368] sm:$0xff]  ;;  %v388_v51 = vld [vmem:[%s8029_s23 + $0x1b0] sm:$0xff] }
  0x44   : > { %v1026_v52 = vld [vmem:[%s8029_s23 + $0x370] sm:$0xff] }
  0x46   : > { %7232 = vmatmul.mubr.msk.f32.gmra.mrb[22].mxu0 %vm402_vm0, %v357_v53  ;;  %7324 = vmatmul.mubr.msk.f32.gmra.mrb[22].mxu1 %vm402_vm0, %v995_v54  ;;  %v389_v53 = vld [vmem:[%s8029_s23 + $0x1b8] sm:$0xff] }
  0x47   : > { %7234 = vmatprep.mubr.msk.f32.mxu0 %vm402_vm0, %v358_v55  ;;  %7326 = vmatprep.mubr.msk.f32.mxu1 %vm402_vm0, %v996_v56  ;;  %v1027_v54 = vld [vmem:[%s8029_s23 + $0x378] sm:$0xff]  ;;  %v1028_v55 = vld [vmem:[%s8029_s23 + $0x380] sm:$0xff] }
  0x48   : > { %v1685_v56 = vld [vmem:[%s8029_s23 + $0x400] sm:$0xff] }
  0x4a   : > { %7235 = vmatmul.mubr.msk.f32.gmra.mrb[24].mxu0 %vm402_vm0, %v359_v57  ;;  %7327 = vmatmul.mubr.msk.f32.gmra.mrb[24].mxu1 %vm402_vm0, %v997_v58  ;;  %v1029_v57 = vld [vmem:[%s8029_s23 + $0x388] sm:$0xff] }
  0x4b   : > { %7237 = vmatprep.mubr.msk.f32.mxu0 %vm402_vm0, %v360_v59  ;;  %7329 = vmatprep.mubr.msk.f32.mxu1 %vm402_vm0, %v998_v60  ;;  %v1686_v58 = vld [vmem:[%s8029_s23 + $0x408] sm:$0xff]  ;;  %v1030_v59 = vld [vmem:[%s8029_s23 + $0x390] sm:$0xff] }
  0x4c   : > { %v1687_v60 = vld [vmem:[%s8029_s23 + $0x410] sm:$0xff] }
  0x4e   : > { %7238 = vmatmul.mubr.msk.f32.gmra.mrb[26].mxu0 %vm402_vm0, %v361_v61  ;;  %7330 = vmatmul.mubr.msk.f32.gmra.mrb[26].mxu1 %vm402_vm0, %v999_v62  ;;  %v7755_v61 = vld [vmem:[%s10449_s3 + $0x4] ss:$36 sps:$4 sm:$0xff]  }
  0x4f   : > { %7240 = vmatprep.mubr.msk.f32.mxu0 %vm402_vm0, %v362_v63  ;;  %7332 = vmatprep.mubr.msk.f32.mxu1 %vm402_vm0, %v1000_v0  ;;  %v7753_v62 = vld [vmem:[%s10449_s3] ss:$36 sps:$4 sm:$0xff]   ;;  %v1031_v63 = vld [vmem:[%s8029_s23 + $0x398] sm:$0xff] }
  0x50   : > { %v1688_v0 = vld [vmem:[%s8029_s23 + $0x418] sm:$0xff]  ;;  %3710 = vmatprep.subr.bf16.mxu0 %v7755_v61 }
  0x51   : > { %v1716_v61 = vld [vmem:[%s8029_s23 + $0x4f8] sm:$0xff] }
  0x52   : > { %7241 = vmatmul.mubr.msk.f32.gmra.mrb[28].mxu0 %vm402_vm0, %v363_v1  ;;  %7333 = vmatmul.mubr.msk.f32.gmra.mrb[28].mxu1 %vm402_vm0, %v1001_v2  ;;  %v1032_v1 = vld [vmem:[%s8029_s23 + $0x3a0] sm:$0xff] }
  0x53   : > { %7243 = vmatprep.mubr.msk.f32.mxu0 %vm402_vm0, %v364_v3  ;;  %7335 = vmatprep.mubr.msk.f32.mxu1 %vm402_vm0, %v1002_v4  ;;  %v1689_v2 = vld [vmem:[%s8029_s23 + $0x420] sm:$0xff]  ;;  %v1033_v3 = vld [vmem:[%s8029_s23 + $0x3a8] sm:$0xff] }
  0x54   : > { %v1690_v4 = vld [vmem:[%s8029_s23 + $0x428] sm:$0xff] }
  0x56   : > { %7244 = vmatmul.mubr.msk.f32.gmra.mrb[30].mxu0 %vm402_vm0, %v365_v5  ;;  %7336 = vmatmul.mubr.msk.f32.gmra.mrb[30].mxu1 %vm402_vm0, %v1003_v6  ;;  %v1034_v5 = vld [vmem:[%s8029_s23 + $0x3b0] sm:$0xff] }
  0x57   : > { %7246 = vmatprep.mubr.msk.f32.mxu0 %vm402_vm0, %v366_v7  ;;  %7338 = vmatprep.mubr.msk.f32.mxu1 %vm402_vm0, %v1004_v8  ;;  %v1691_v6 = vld [vmem:[%s8029_s23 + $0x430] sm:$0xff]  ;;  %v1035_v7 = vld [vmem:[%s8029_s23 + $0x3b8] sm:$0xff] }
  0x58   : > { %v1692_v8 = vld [vmem:[%s8029_s23 + $0x438] sm:$0xff] }
  0x5a   : > { %7247 = vmatmul.mubr.msk.f32.gmra.mrb[32].mxu0 %vm402_vm0, %v367_v9  ;;  %7339 = vmatmul.mubr.msk.f32.gmra.mrb[32].mxu1 %vm402_vm0, %v1005_v10  ;;  %v1036_v9 = vld [vmem:[%s8029_s23 + $0x3c0] sm:$0xff] }
  0x5b   : > { %7249 = vmatprep.mubr.msk.f32.mxu0 %vm402_vm0, %v368_v11  ;;  %7341 = vmatprep.mubr.msk.f32.mxu1 %vm402_vm0, %v1006_v12  ;;  %v1693_v10 = vld [vmem:[%s8029_s23 + $0x440] sm:$0xff]  ;;  %v1037_v11 = vld [vmem:[%s8029_s23 + $0x3c8] sm:$0xff] }
  0x5c   : > { %v1694_v12 = vld [vmem:[%s8029_s23 + $0x448] sm:$0xff] }
  0x5e   : > { %7250 = vmatmul.mubr.msk.f32.gmra.mrb[34].mxu0 %vm402_vm0, %v369_v13  ;;  %7342 = vmatmul.mubr.msk.f32.gmra.mrb[34].mxu1 %vm402_vm0, %v1007_v14  ;;  %v1038_v13 = vld [vmem:[%s8029_s23 + $0x3d0] sm:$0xff] }
  0x5f   : > { %7252 = vmatprep.mubr.msk.f32.mxu0 %vm402_vm0, %v370_v15  ;;  %7344 = vmatprep.mubr.msk.f32.mxu1 %vm402_vm0, %v1008_v16  ;;  %v1695_v14 = vld [vmem:[%s8029_s23 + $0x450] sm:$0xff]  ;;  %v7756_v16 = vld [vmem:[%s10449_s3 + $0x48] ss:$36 sps:$4 sm:$0xff]  }
  0x60   : > { %v7758_v15 = vld [vmem:[%s10449_s3 + $0x4c] ss:$36 sps:$4 sm:$0xff]  }
  0x62   : > { %7253 = vmatmul.mubr.msk.f32.gmra.mrb[36].mxu0 %vm402_vm0, %v371_v17  ;;  %7345 = vmatmul.mubr.msk.f32.gmra.mrb[36].mxu1 %vm402_vm0, %v1009_v18  ;;  %v1039_v17 = vld [vmem:[%s8029_s23 + $0x3d8] sm:$0xff] }
  0x63   : > { %7255 = vmatprep.mubr.msk.f32.mxu0 %vm402_vm0, %v372_v19  ;;  %7347 = vmatprep.mubr.msk.f32.mxu1 %vm402_vm0, %v1010_v20  ;;  %v1696_v18 = vld [vmem:[%s8029_s23 + $0x458] sm:$0xff]  ;;  %v1040_v19 = vld [vmem:[%s8029_s23 + $0x3e0] sm:$0xff] }
  0x64   : > { %v1697_v20 = vld [vmem:[%s8029_s23 + $0x460] sm:$0xff] }
  0x66   : > { %7256 = vmatmul.mubr.msk.f32.gmra.mrb[38].mxu0 %vm402_vm0, %v373_v21  ;;  %7348 = vmatmul.mubr.msk.f32.gmra.mrb[38].mxu1 %vm402_vm0, %v1011_v22  ;;  %v1041_v21 = vld [vmem:[%s8029_s23 + $0x3e8] sm:$0xff] }
  0x67   : > { %7258 = vmatprep.mubr.msk.f32.mxu0 %vm402_vm0, %v374_v23  ;;  %7350 = vmatprep.mubr.msk.f32.mxu1 %vm402_vm0, %v1012_v24  ;;  %v1698_v22 = vld [vmem:[%s8029_s23 + $0x468] sm:$0xff]  ;;  %v1042_v23 = vld [vmem:[%s8029_s23 + $0x3f0] sm:$0xff] }
  0x68   : > { %v1699_v24 = vld [vmem:[%s8029_s23 + $0x470] sm:$0xff] }
  0x6a   : > { %7259 = vmatmul.mubr.msk.f32.gmra.mrb[40].mxu0 %vm402_vm0, %v375_v25  ;;  %7351 = vmatmul.mubr.msk.f32.gmra.mrb[40].mxu1 %vm402_vm0, %v1013_v26  ;;  %v1043_v25 = vld [vmem:[%s8029_s23 + $0x3f8] sm:$0xff] }
  0x6b   : > { %7261 = vmatprep.mubr.msk.f32.mxu0 %vm402_vm0, %v376_v27  ;;  %7353 = vmatprep.mubr.msk.f32.mxu1 %vm402_vm0, %v1014_v28  ;;  %v1700_v26 = vld [vmem:[%s8029_s23 + $0x478] sm:$0xff]  ;;  %v1701_v27 = vld [vmem:[%s8029_s23 + $0x480] sm:$0xff] }
  0x6c   : > { %v2390_v28 = vld [vmem:[%s8029_s23 + $0x600] sm:$0xff] }
  0x6e   : > { %7262 = vmatmul.mubr.msk.f32.gmra.mrb[42].mxu0 %vm402_vm0, %v377_v29  ;;  %7354 = vmatmul.mubr.msk.f32.gmra.mrb[42].mxu1 %vm402_vm0, %v1015_v30  ;;  %v1702_v29 = vld [vmem:[%s8029_s23 + $0x488] sm:$0xff] }
  0x6f   : > { %7264 = vmatprep.mubr.msk.f32.mxu0 %vm402_vm0, %v378_v31  ;;  %7356 = vmatprep.mubr.msk.f32.mxu1 %vm402_vm0, %v1016_v32  ;;  %v2391_v30 = vld [vmem:[%s8029_s23 + $0x608] sm:$0xff]  ;;  %v1703_v31 = vld [vmem:[%s8029_s23 + $0x490] sm:$0xff] }
  0x70   : > { %v2392_v32 = vld [vmem:[%s8029_s23 + $0x610] sm:$0xff] }
  0x72   : > { %7265 = vmatmul.mubr.msk.f32.gmra.mrb[44].mxu0 %vm402_vm0, %v379_v33  ;;  %7357 = vmatmul.mubr.msk.f32.gmra.mrb[44].mxu1 %vm402_vm0, %v1017_v34  ;;  %v7759_v33 = vld [vmem:[%s10449_s3 + $0x90] ss:$36 sps:$4 sm:$0xff]  }
  0x73   : > { %7267 = vmatprep.mubr.msk.f32.mxu0 %vm402_vm0, %v380_v35  ;;  %7359 = vmatprep.mubr.msk.f32.mxu1 %vm402_vm0, %v1018_v36  ;;  %v7761_v34 = vld [vmem:[%s10449_s3 + $0x94] ss:$36 sps:$4 sm:$0xff]  }
  0x74   : > { %v1704_v35 = vld [vmem:[%s8029_s23 + $0x498] sm:$0xff] }
  0x75   : > { %v2393_v36 = vld [vmem:[%s8029_s23 + $0x618] sm:$0xff] }
  0x76   : > { %7268 = vmatmul.mubr.msk.f32.gmra.mrb[46].mxu0 %vm402_vm0, %v381_v37  ;;  %7360 = vmatmul.mubr.msk.f32.gmra.mrb[46].mxu1 %vm402_vm0, %v1019_v38  ;;  %v1705_v37 = vld [vmem:[%s8029_s23 + $0x4a0] sm:$0xff] }
  0x77   : > { %7270 = vmatprep.mubr.msk.f32.mxu0 %vm402_vm0, %v382_v39  ;;  %7362 = vmatprep.mubr.msk.f32.mxu1 %vm402_vm0, %v1020_v40  ;;  %v2394_v38 = vld [vmem:[%s8029_s23 + $0x620] sm:$0xff]  ;;  %v1706_v39 = vld [vmem:[%s8029_s23 + $0x4a8] sm:$0xff] }
  0x78   : > { %v2395_v40 = vld [vmem:[%s8029_s23 + $0x628] sm:$0xff] }
  0x7a   : > { %7271 = vmatmul.mubr.msk.f32.gmra.mrb[48].mxu0 %vm402_vm0, %v383_v41  ;;  %7363 = vmatmul.mubr.msk.f32.gmra.mrb[48].mxu1 %vm402_vm0, %v1021_v42  ;;  %v1707_v41 = vld [vmem:[%s8029_s23 + $0x4b0] sm:$0xff] }
  0x7b   : > { %7273 = vmatprep.mubr.msk.f32.mxu0 %vm402_vm0, %v384_v43  ;;  %7365 = vmatprep.mubr.msk.f32.mxu1 %vm402_vm0, %v1022_v44  ;;  %v2396_v42 = vld [vmem:[%s8029_s23 + $0x630] sm:$0xff]  ;;  %v1708_v43 = vld [vmem:[%s8029_s23 + $0x4b8] sm:$0xff] }
  0x7c   : > { %v2397_v44 = vld [vmem:[%s8029_s23 + $0x638] sm:$0xff] }
  0x7e   : > { %7274 = vmatmul.mubr.msk.f32.gmra.mrb[50].mxu0 %vm402_vm0, %v385_v45  ;;  %7366 = vmatmul.mubr.msk.f32.gmra.mrb[50].mxu1 %vm402_vm0, %v1023_v46  ;;  %v1709_v45 = vld [vmem:[%s8029_s23 + $0x4c0] sm:$0xff] }
  0x7f   : > { %7276 = vmatprep.mubr.msk.f32.mxu0 %vm402_vm0, %v386_v47  ;;  %7368 = vmatprep.mubr.msk.f32.mxu1 %vm402_vm0, %v1024_v48  ;;  %v2398_v46 = vld [vmem:[%s8029_s23 + $0x640] sm:$0xff]  ;;  %v1710_v47 = vld [vmem:[%s8029_s23 + $0x4c8] sm:$0xff] }
  0x80   : > { %v2399_v48 = vld [vmem:[%s8029_s23 + $0x648] sm:$0xff] }
  0x82   : > { %7277 = vmatmul.mubr.msk.f32.gmra.mrb[52].mxu0 %vm402_vm0, %v387_v49  ;;  %7369 = vmatmul.mubr.msk.f32.gmra.mrb[52].mxu1 %vm402_vm0, %v1025_v50  ;;  %v7764_v49 = vld [vmem:[%s10449_s3 + $0xdc] ss:$36 sps:$4 sm:$0xff]   ;;  %v1711_v50 = vld [vmem:[%s8029_s23 + $0x4d0] sm:$0xff] }
  0x83   : > { %7279 = vmatprep.mubr.msk.f32.mxu0 %vm402_vm0, %v388_v51  ;;  %7371 = vmatprep.mubr.msk.f32.mxu1 %vm402_vm0, %v1026_v52  ;;  %v2400_v51 = vld [vmem:[%s8029_s23 + $0x650] sm:$0xff]  ;;  %v7762_v52 = vld [vmem:[%s10449_s3 + $0xd8] ss:$36 sps:$4 sm:$0xff]  }
  0x86   : > { %7280 = vmatmul.mubr.msk.f32.gmra.mrb[54].mxu0 %vm402_vm0, %v389_v53  ;;  %7372 = vmatmul.mubr.msk.f32.gmra.mrb[54].mxu1 %vm402_vm0, %v1027_v54  ;;  %v1712_v53 = vld [vmem:[%s8029_s23 + $0x4d8] sm:$0xff] }
  0x87   : > { %7374 = vmatprep.mubr.msk.f32.mxu1 %vm402_vm0, %v1028_v55  ;;  %7406 = vmatprep.mubr.msk.f32.mxu0 %vm402_vm0, %v1685_v56  ;;  %v2401_v54 = vld [vmem:[%s8029_s23 + $0x658] sm:$0xff]  ;;  %v1713_v55 = vld [vmem:[%s8029_s23 + $0x4e0] sm:$0xff] }
  0x88   : > { %v2402_v56 = vld [vmem:[%s8029_s23 + $0x660] sm:$0xff] }
  0x8a   : > { %7375 = vmatmul.mubr.msk.f32.gmra.mrb[56].mxu1 %vm402_vm0, %v1029_v57  ;;  %7407 = vmatmul.mubr.msk.f32.vlgmr.msra.gmra.mrb[56].mxu0 %vm402_vm0, %v1686_v58  ;;  %v1714_v57 = vld [vmem:[%s8029_s23 + $0x4e8] sm:$0xff] }
  0x8b   : > { %7377 = vmatprep.mubr.msk.f32.mxu1 %vm402_vm0, %v1030_v59  ;;  %7409 = vmatprep.mubr.msk.f32.mxu0 %vm402_vm0, %v1687_v60  ;;  %v2403_v58 = vld [vmem:[%s8029_s23 + $0x668] sm:$0xff]  ;;  %v1715_v59 = vld [vmem:[%s8029_s23 + $0x4f0] sm:$0xff] }
  0x8c   : > { %3711 = vmatpush1.bf16.msra.mxu0 %v7753_v62  ;;  %v2404_v60 = vld [vmem:[%s8029_s23 + $0x670] sm:$0xff]  ;;  %v2405_v62 = vld [vmem:[%s8029_s23 + $0x678] sm:$0xff] }
  0x8d   : > { %3712 = vmatprep.subr.bf16.mxu0 %v7758_v15  ;;  %v1724_v15 = vld [vmem:[%s8029_s23 + $0x538] sm:$0xff] }
  0x8e   : > { %7378 = vmatmul.mubr.msk.f32.gmra.mrb[58].mxu1 %vm402_vm0, %v1031_v63  ;;  %7410 = vmatmul.mubr.msk.f32.gmra.mrb[58].mxu0 %vm402_vm0, %v1688_v0  ;;  %v1717_v63 = vld [vmem:[%s8029_s23 + $0x500] sm:$0xff] }
  0x8f   : > { %7380 = vmatprep.mubr.msk.f32.mxu1 %vm402_vm0, %v1032_v1  ;;  %7412 = vmatprep.mubr.msk.f32.mxu0 %vm402_vm0, %v1689_v2  ;;  %v2406_v0 = vld [vmem:[%s8029_s23 + $0x680] sm:$0xff]  ;;  %v1718_v1 = vld [vmem:[%s8029_s23 + $0x508] sm:$0xff] }
  0x90   : > { %3713 = vmatpush1.bf16.msra.mxu0 %v7756_v16  ;;  %v2407_v2 = vld [vmem:[%s8029_s23 + $0x688] sm:$0xff]  ;;  %v2413_v16 = vld [vmem:[%s8029_s23 + $0x6b8] sm:$0xff] }
  0x91   : > { %3714 = vmatprep.subr.bf16.mxu0 %v7761_v34  ;;  %v2421_v34 = vld [vmem:[%s8029_s23 + $0x6f8] sm:$0xff] }
  0x92   : > { %7381 = vmatmul.mubr.msk.f32.gmra.mrb[60].mxu1 %vm402_vm0, %v1033_v3  ;;  %7413 = vmatmul.mubr.msk.f32.gmra.mrb[60].mxu0 %vm402_vm0, %v1690_v4  ;;  %v7767_v3 = vld [vmem:[%s10449_s3 + $0x124] ss:$36 sps:$4 sm:$0xff]   ;;  %v1719_v4 = vld [vmem:[%s8029_s23 + $0x510] sm:$0xff] }
  0x93   : > { %7383 = vmatprep.mubr.msk.f32.mxu1 %vm402_vm0, %v1034_v5  ;;  %7415 = vmatprep.mubr.msk.f32.mxu0 %vm402_vm0, %v1691_v6  ;;  %v2408_v5 = vld [vmem:[%s8029_s23 + $0x690] sm:$0xff]  ;;  %v7765_v6 = vld [vmem:[%s10449_s3 + $0x120] ss:$36 sps:$4 sm:$0xff]  }
  0x94   : > { %3715 = vmatpush1.bf16.msra.mxu0 %v7759_v33  ;;  %v1732_v33 = vld [vmem:[%s8029_s23 + $0x578] sm:$0xff] }
  0x95   : > { %3716 = vmatprep.subr.bf16.mxu0 %v7764_v49  ;;  %v1737_v49 = vld [vmem:[%s8029_s23 + $0x5a0] sm:$0xff] }
  0x96   : > { %7384 = vmatmul.mubr.msk.f32.gmra.mrb[62].mxu1 %vm402_vm0, %v1035_v7  ;;  %7416 = vmatmul.mubr.msk.f32.gmra.mrb[62].mxu0 %vm402_vm0, %v1692_v8  ;;  %v1720_v7 = vld [vmem:[%s8029_s23 + $0x518] sm:$0xff] }
  0x97   : > { %7386 = vmatprep.mubr.msk.f32.mxu1 %vm402_vm0, %v1036_v9  ;;  %7418 = vmatprep.mubr.msk.f32.mxu0 %vm402_vm0, %v1693_v10  ;;  %v2409_v8 = vld [vmem:[%s8029_s23 + $0x698] sm:$0xff]  ;;  %v1721_v9 = vld [vmem:[%s8029_s23 + $0x520] sm:$0xff] }
  0x98   : > { %3717 = vmatpush1.bf16.msra.mxu0 %v7762_v52  ;;  %v2410_v10 = vld [vmem:[%s8029_s23 + $0x6a0] sm:$0xff] }
  0x99   : > { %3718 = vmatprep.subr.bf16.mxu0 %v7767_v3  ;;  %v1740_v3 = vld [vmem:[%s8029_s23 + $0x5b8] sm:$0xff] }
  0x9a   : > { %7387 = vmatmul.mubr.msk.f32.gmra.mrb[64].mxu1 %vm402_vm0, %v1037_v11  ;;  %7419 = vmatmul.mubr.msk.f32.gmra.mrb[64].mxu0 %vm402_vm0, %v1694_v12  ;;  %v1722_v11 = vld [vmem:[%s8029_s23 + $0x528] sm:$0xff] }
  0x9b   : > { %7389 = vmatprep.mubr.msk.f32.mxu1 %vm402_vm0, %v1038_v13  ;;  %7421 = vmatprep.mubr.msk.f32.mxu0 %vm402_vm0, %v1695_v14  ;;  %v2411_v12 = vld [vmem:[%s8029_s23 + $0x6a8] sm:$0xff]  ;;  %v1723_v13 = vld [vmem:[%s8029_s23 + $0x530] sm:$0xff] }
  0x9c   : > { %3719 = vmatpush1.bf16.msra.mxu0 %v7765_v6  ;;  %v2412_v14 = vld [vmem:[%s8029_s23 + $0x6b0] sm:$0xff]  ;;  %v2430_v6 = vld [vmem:[%s8029_s23 + $0x740] sm:$0xff] }
  0x9e   : > { %7390 = vmatmul.mubr.msk.f32.gmra.mrb[66].mxu1 %vm402_vm0, %v1039_v17  ;;  %7422 = vmatmul.mubr.msk.f32.gmra.mrb[66].mxu0 %vm402_vm0, %v1696_v18  ;;  %v1725_v17 = vld [vmem:[%s8029_s23 + $0x540] sm:$0xff] }
  0x9f   : > { %7392 = vmatprep.mubr.msk.f32.mxu1 %vm402_vm0, %v1040_v19  ;;  %7424 = vmatprep.mubr.msk.f32.mxu0 %vm402_vm0, %v1697_v20  ;;  %v2414_v18 = vld [vmem:[%s8029_s23 + $0x6c0] sm:$0xff]  ;;  %v1726_v19 = vld [vmem:[%s8029_s23 + $0x548] sm:$0xff] }
  0xa0   : > { %v2415_v20 = vld [vmem:[%s8029_s23 + $0x6c8] sm:$0xff] }
  0xa2   : > { %7393 = vmatmul.mubr.msk.f32.gmra.mrb[68].mxu1 %vm402_vm0, %v1041_v21  ;;  %7425 = vmatmul.mubr.msk.f32.gmra.mrb[68].mxu0 %vm402_vm0, %v1698_v22  ;;  %v7770_v21 = vld [vmem:[%s10449_s3 + $0x16c] ss:$36 sps:$4 sm:$0xff]  }
  0xa3   : > { %7395 = vmatprep.mubr.msk.f32.mxu1 %vm402_vm0, %v1042_v23  ;;  %7427 = vmatprep.mubr.msk.f32.mxu0 %vm402_vm0, %v1699_v24  ;;  %v1727_v22 = vld [vmem:[%s8029_s23 + $0x550] sm:$0xff]  ;;  %v7768_v24 = vld [vmem:[%s10449_s3 + $0x168] ss:$36 sps:$4 sm:$0xff]  }
  0xa4   : > { %v2416_v23 = vld [vmem:[%s8029_s23 + $0x6d0] sm:$0xff]  ;;  %3720 = vmatprep.subr.bf16.mxu0 %v7770_v21 }
  0xa5   : > { %3721 = vmatpush1.bf16.msra.mxu0 %v7768_v24  ;;  %v7794_v21 = vld [vmem:[%s10449_s3 + $0x174] ss:$36 sps:$4 sm:$0xff]  }
  0xa6   : > { %7396 = vmatmul.mubr.msk.f32.gmra.mrb[70].mxu1 %vm402_vm0, %v1043_v25  ;;  %7428 = vmatmul.mubr.msk.f32.gmra.mrb[70].mxu0 %vm402_vm0, %v1700_v26  ;;  %v1728_v25 = vld [vmem:[%s8029_s23 + $0x558] sm:$0xff]  ;;  %v7792_v24 = vld [vmem:[%s10449_s3 + $0x170] ss:$36 sps:$4 sm:$0xff]  }
  0xa7   : > { %7430 = vmatprep.mubr.msk.f32.mxu0 %vm402_vm0, %v1701_v27  ;;  %7510 = vmatprep.mubr.msk.f32.mxu1 %vm402_vm0, %v2390_v28  ;;  %v2417_v26 = vld [vmem:[%s8029_s23 + $0x6d8] sm:$0xff]  ;;  %v1729_v27 = vld [vmem:[%s8029_s23 + $0x560] sm:$0xff] }
  0xa8   : > { %v2418_v28 = vld [vmem:[%s8029_s23 + $0x6e0] sm:$0xff] }
  0xaa   : > { %7431 = vmatmul.mubr.msk.f32.gmra.mrb[72].mxu0 %vm402_vm0, %v1702_v29  ;;  %7511 = vmatmul.mubr.msk.f32.vlgmr.msra.gmra.mrb[72].mxu1 %vm402_vm0, %v2391_v30  ;;  %v1730_v29 = vld [vmem:[%s8029_s23 + $0x568] sm:$0xff] }
  0xab   : > { %7433 = vmatprep.mubr.msk.f32.mxu0 %vm402_vm0, %v1703_v31  ;;  %7513 = vmatprep.mubr.msk.f32.mxu1 %vm402_vm0, %v2392_v32  ;;  %v2419_v30 = vld [vmem:[%s8029_s23 + $0x6e8] sm:$0xff]  ;;  %v1731_v31 = vld [vmem:[%s8029_s23 + $0x570] sm:$0xff] }
  0xac   : > { %v2420_v32 = vld [vmem:[%s8029_s23 + $0x6f0] sm:$0xff] }
  0xae   : > { %7434 = vmatmul.mubr.msk.f32.gmra.mrb[74].mxu0 %vm402_vm0, %v1704_v35  ;;  %7514 = vmatmul.mubr.msk.f32.gmra.mrb[74].mxu1 %vm402_vm0, %v2393_v36  ;;  %v1733_v35 = vld [vmem:[%s8029_s23 + $0x580] sm:$0xff] }
  0xaf   : > { %7436 = vmatprep.mubr.msk.f32.mxu0 %vm402_vm0, %v1705_v37  ;;  %7516 = vmatprep.mubr.msk.f32.mxu1 %vm402_vm0, %v2394_v38  ;;  %v2422_v36 = vld [vmem:[%s8029_s23 + $0x700] sm:$0xff]  ;;  %v7776_v37 = vld [vmem:[%s10449_s3 + $0xc] ss:$36 sps:$4 sm:$0xff]  }
  0xb0   : > { %v7774_v38 = vld [vmem:[%s10449_s3 + $0x8] ss:$36 sps:$4 sm:$0xff]   ;;  %4007 = vmatprep.subr.bf16.mxu1 %v7776_v37 }
  0xb1   : > { %4008 = vmatpush1.bf16.msra.mxu1 %v7774_v38  ;;  %v1746_v37 = vld [vmem:[%s8029_s23 + $0x5e8] sm:$0xff] }
  0xb2   : > { %7437 = vmatmul.mubr.msk.f32.gmra.mrb[76].mxu0 %vm402_vm0, %v1706_v39  ;;  %7517 = vmatmul.mubr.msk.f32.gmra.mrb[76].mxu1 %vm402_vm0, %v2395_v40  ;;  %v1734_v39 = vld [vmem:[%s8029_s23 + $0x588] sm:$0xff] }
  0xb3   : > { %7439 = vmatprep.mubr.msk.f32.mxu0 %vm402_vm0, %v1707_v41  ;;  %7519 = vmatprep.mubr.msk.f32.mxu1 %vm402_vm0, %v2396_v42  ;;  %v2423_v40 = vld [vmem:[%s8029_s23 + $0x708] sm:$0xff]  ;;  %v7773_v41 = vld [vmem:[%s10449_s3 + $0x1b4] ss:$36 sps:$4 sm:$0xff]  }
  0xb4   : > { %v1735_v42 = vld [vmem:[%s8029_s23 + $0x590] sm:$0xff]  ;;  %3722 = vmatprep.subr.bf16.mxu0 %v7773_v41  ;;  %v2435_v38 = vld [vmem:[%s8029_s23 + $0x768] sm:$0xff] }
  0xb6   : > { %7440 = vmatmul.mubr.msk.f32.gmra.mrb[78].mxu0 %vm402_vm0, %v1708_v43  ;;  %7520 = vmatmul.mubr.msk.f32.gmra.mrb[78].mxu1 %vm402_vm0, %v2397_v44  ;;  %v2424_v43 = vld [vmem:[%s8029_s23 + $0x710] sm:$0xff] }
  0xb7   : > { %7442 = vmatprep.mubr.msk.f32.mxu0 %vm402_vm0, %v1709_v45  ;;  %7522 = vmatprep.mubr.msk.f32.mxu1 %vm402_vm0, %v2398_v46  ;;  %v7771_v44 = vld [vmem:[%s10449_s3 + $0x1b0] ss:$36 sps:$4 sm:$0xff]  }
  0xb8   : > { %v7779_v45 = vld [vmem:[%s10449_s3 + $0x54] ss:$36 sps:$4 sm:$0xff]   ;;  %3723 = vmatpush1.bf16.msra.mxu0 %v7771_v44 }
  0xb9   : > { %v7777_v46 = vld [vmem:[%s10449_s3 + $0x50] ss:$36 sps:$4 sm:$0xff]   ;;  %4009 = vmatprep.subr.bf16.mxu1 %v7779_v45 }
  0xba   : > { %7443 = vmatmul.mubr.msk.f32.gmra.mrb[80].mxu0 %vm402_vm0, %v1710_v47  ;;  %7523 = vmatmul.mubr.msk.f32.gmra.mrb[80].mxu1 %vm402_vm0, %v2399_v48  ;;  %v1736_v47 = vld [vmem:[%s8029_s23 + $0x598] sm:$0xff] }
  0xbb   : > { %7445 = vmatprep.mubr.msk.f32.mxu0 %vm402_vm0, %v1711_v50  ;;  %7525 = vmatprep.mubr.msk.f32.mxu1 %vm402_vm0, %v2400_v51  ;;  %v2425_v48 = vld [vmem:[%s8029_s23 + $0x718] sm:$0xff]  ;;  %v2426_v50 = vld [vmem:[%s8029_s23 + $0x720] sm:$0xff] }
  0xbc   : > { %4010 = vmatpush1.bf16.msra.mxu1 %v7777_v46 }
  0xbe   : > { %7446 = vmatmul.mubr.msk.f32.gmra.mrb[82].mxu0 %vm402_vm0, %v1712_v53  ;;  %7526 = vmatmul.mubr.msk.f32.gmra.mrb[82].mxu1 %vm402_vm0, %v2401_v54  ;;  %v7782_v53 = vld [vmem:[%s10449_s3 + $0x9c] ss:$36 sps:$4 sm:$0xff]  }
  0xbf   : > { %7448 = vmatprep.mubr.msk.f32.mxu0 %vm402_vm0, %v1713_v55  ;;  %7528 = vmatprep.mubr.msk.f32.mxu1 %vm402_vm0, %v2402_v56  ;;  %v7780_v56 = vld [vmem:[%s10449_s3 + $0x98] ss:$36 sps:$4 sm:$0xff]  }
  0xc0   : > { %4011 = vmatprep.subr.bf16.mxu1 %v7782_v53  ;;  %v2438_v53 = vld [vmem:[%s8029_s23 + $0x780] sm:$0xff] }
  0xc1   : > { %4012 = vmatpush1.bf16.msra.mxu1 %v7780_v56 }
  0xc2   : > { %7449 = vmatmul.mubr.msk.f32.gmra.mrb[84].mxu0 %vm402_vm0, %v1714_v57  ;;  %7529 = vmatmul.mubr.msk.f32.gmra.mrb[84].mxu1 %vm402_vm0, %v2403_v58  ;;  %v1738_v57 = vld [vmem:[%s8029_s23 + $0x5a8] sm:$0xff] }
  0xc3   : > { %7451 = vmatprep.mubr.msk.f32.mxu0 %vm402_vm0, %v1715_v59  ;;  %7531 = vmatprep.mubr.msk.f32.mxu1 %vm402_vm0, %v2404_v60  ;;  %v2427_v58 = vld [vmem:[%s8029_s23 + $0x728] sm:$0xff]  ;;  %v1739_v59 = vld [vmem:[%s8029_s23 + $0x5b0] sm:$0xff] }
  0xc4   : > { %v2428_v60 = vld [vmem:[%s8029_s23 + $0x730] sm:$0xff] }
  0xc6   : > { %7452 = vmatmul.mubr.msk.f32.gmra.mrb[86].mxu0 %vm402_vm0, %v1716_v61  ;;  %7532 = vmatmul.mubr.msk.f32.gmra.mrb[86].mxu1 %vm402_vm0, %v2405_v62 }
  0xc7   : > { %7454 = vmatprep.mubr.msk.f32.mxu0 %vm402_vm0, %v1717_v63  ;;  %7534 = vmatprep.mubr.msk.f32.mxu1 %vm402_vm0, %v2406_v0  ;;  %v7785_v63 = vld [vmem:[%s10449_s3 + $0xe4] ss:$36 sps:$4 sm:$0xff]  }
  0xc8   : > { %4013 = vmatprep.subr.bf16.mxu1 %v7785_v63  ;;  %v2452_v63 = vld [vmem:[%s8029_s23 + $0x7f0] sm:$0xff] }
  0xca   : > { %7455 = vmatmul.mubr.msk.f32.gmra.mrb[88].mxu0 %vm402_vm0, %v1718_v1  ;;  %7535 = vmatmul.mubr.msk.f32.gmra.mrb[88].mxu1 %vm402_vm0, %v2407_v2  ;;  %v7783_v2 = vld [vmem:[%s10449_s3 + $0xe0] ss:$36 sps:$4 sm:$0xff]  }
  0xcb   : > { %7457 = vmatprep.mubr.msk.f32.mxu0 %vm402_vm0, %v1719_v4  ;;  %7537 = vmatprep.mubr.msk.f32.mxu1 %vm402_vm0, %v2408_v5  ;;  %v2429_v4 = vld [vmem:[%s8029_s23 + $0x738] sm:$0xff]  ;;  %v1741_v5 = vld [vmem:[%s8029_s23 + $0x5c0] sm:$0xff] }
  0xcc   : > { %4014 = vmatpush1.bf16.msra.mxu1 %v7783_v2  ;;  %v2439_v2 = vld [vmem:[%s8029_s23 + $0x788] sm:$0xff] }
  0xce   : > { %7458 = vmatmul.mubr.msk.f32.gmra.mrb[90].mxu0 %vm402_vm0, %v1720_v7  ;;  %7538 = vmatmul.mubr.msk.f32.gmra.mrb[90].mxu1 %vm402_vm0, %v2409_v8 }
  0xcf   : > { %7460 = vmatprep.mubr.msk.f32.mxu0 %vm402_vm0, %v1721_v9  ;;  %7540 = vmatprep.mubr.msk.f32.mxu1 %vm402_vm0, %v2410_v10  ;;  %v7791_v9 = vld [vmem:[%s10449_s3 + $0x12c] ss:$36 sps:$4 sm:$0xff]  }
  0xd0   : > { %4015 = vmatprep.subr.bf16.mxu1 %v7791_v9 }
  0xd2   : > { %7461 = vmatmul.mubr.msk.f32.gmra.mrb[92].mxu0 %vm402_vm0, %v1722_v11  ;;  %7541 = vmatmul.mubr.msk.f32.gmra.mrb[92].mxu1 %vm402_vm0, %v2411_v12  ;;  %v7789_v12 = vld [vmem:[%s10449_s3 + $0x128] ss:$36 sps:$4 sm:$0xff]  }
  0xd3   : > { %7463 = vmatprep.mubr.msk.f32.mxu0 %vm402_vm0, %v1723_v13  ;;  %7543 = vmatprep.mubr.msk.f32.mxu1 %vm402_vm0, %v2412_v14  ;;  %v1742_v13 = vld [vmem:[%s8029_s23 + $0x5c8] sm:$0xff] }
  0xd4   : > { %v2431_v14 = vld [vmem:[%s8029_s23 + $0x748] sm:$0xff]  ;;  %4016 = vmatpush1.bf16.msra.mxu1 %v7789_v12 }
  0xd5   : > { %4017 = vmatprep.subr.bf16.mxu1 %v7794_v21  ;;  %v7803_v21 = vld [vmem:[%s10449_s3 + $0x14] ss:$36 sps:$4 sm:$0xff]  }
  0xd6   : > { %7464 = vmatmul.mubr.msk.f32.gmra.mrb[94].mxu0 %vm402_vm0, %v1724_v15  ;;  %7544 = vmatmul.mubr.msk.f32.gmra.mrb[94].mxu1 %vm402_vm0, %v2413_v16  ;;  %v7788_v15 = vld [vmem:[%s10449_s3 + $0x1fc] ss:$36 sps:$4 sm:$0xff]   ;;  %v1743_v16 = vld [vmem:[%s8029_s23 + $0x5d0] sm:$0xff] }
  0xd7   : > { %7466 = vmatprep.mubr.msk.f32.mxu0 %vm402_vm0, %v1725_v17  ;;  %7546 = vmatprep.mubr.msk.f32.mxu1 %vm402_vm0, %v2414_v18  ;;  %v2432_v17 = vld [vmem:[%s8029_s23 + $0x750] sm:$0xff]  ;;  %v7786_v18 = vld [vmem:[%s10449_s3 + $0x1f8] ss:$36 sps:$4 sm:$0xff]  }
  0xd8   : > { %3724 = vmatprep.subr.bf16.mxu0 %v7788_v15  ;;  %4018 = vmatpush1.bf16.msra.mxu1 %v7792_v24  ;;  %v2441_v15 = vld [vmem:[%s8029_s23 + $0x798] sm:$0xff] }
  0xd9   : > { %3725 = vmatpush1.bf16.msra.mxu0 %v7786_v18 }
  0xda   : > { %7467 = vmatmul.mubr.msk.f32.gmra.mrb[96].mxu0 %vm402_vm0, %v1726_v19  ;;  %7547 = vmatmul.mubr.msk.f32.gmra.mrb[96].mxu1 %vm402_vm0, %v2415_v20 }
  0xdb   : > { %7469 = vmatprep.mubr.msk.f32.mxu0 %vm402_vm0, %v1727_v22  ;;  %7549 = vmatprep.mubr.msk.f32.mxu1 %vm402_vm0, %v2416_v23 }
  0xdc   : > { %4304 = vmatprep.subr.bf16.mxu0 %v7803_v21  ;;  %v2447_v21 = vld [vmem:[%s8029_s23 + $0x7c8] sm:$0xff] }
  0xde   : > { %7470 = vmatmul.mubr.msk.f32.gmra.mrb[98].mxu0 %vm402_vm0, %v1728_v25  ;;  %7550 = vmatmul.mubr.msk.f32.gmra.mrb[98].mxu1 %vm402_vm0, %v2417_v26  ;;  %v1744_v25 = vld [vmem:[%s8029_s23 + $0x5d8] sm:$0xff] }
  0xdf   : > { %7472 = vmatprep.mubr.msk.f32.mxu0 %vm402_vm0, %v1729_v27  ;;  %7552 = vmatprep.mubr.msk.f32.mxu1 %vm402_vm0, %v2418_v28  ;;  %v2433_v26 = vld [vmem:[%s8029_s23 + $0x758] sm:$0xff]  ;;  %v1745_v27 = vld [vmem:[%s8029_s23 + $0x5e0] sm:$0xff] }
  0xe0   : > { %v2434_v28 = vld [vmem:[%s8029_s23 + $0x760] sm:$0xff] }
  0xe2   : > { %7473 = vmatmul.mubr.msk.f32.gmra.mrb[100].mxu0 %vm402_vm0, %v1730_v29  ;;  %7553 = vmatmul.mubr.msk.f32.gmra.mrb[100].mxu1 %vm402_vm0, %v2419_v30 }
  0xe3   : > { %7475 = vmatprep.mubr.msk.f32.mxu0 %vm402_vm0, %v1731_v31  ;;  %7555 = vmatprep.mubr.msk.f32.mxu1 %vm402_vm0, %v2420_v32  ;;  %v7797_v31 = vld [vmem:[%s10449_s3 + $0x1bc] ss:$36 sps:$4 sm:$0xff]  }
  0xe4   : > { %4019 = vmatprep.subr.bf16.mxu1 %v7797_v31  ;;  %v2444_v31 = vld [vmem:[%s8029_s23 + $0x7b0] sm:$0xff] }
  0xe6   : > { %7476 = vmatmul.mubr.msk.f32.gmra.mrb[102].mxu0 %vm402_vm0, %v1732_v33  ;;  %7556 = vmatmul.mubr.msk.f32.gmra.mrb[102].mxu1 %vm402_vm0, %v2421_v34 }
  0xe7   : > { %7478 = vmatprep.mubr.msk.f32.mxu0 %vm402_vm0, %v1733_v35  ;;  %7558 = vmatprep.mubr.msk.f32.mxu1 %vm402_vm0, %v2422_v36  ;;  %v7795_v35 = vld [vmem:[%s10449_s3 + $0x1b8] ss:$36 sps:$4 sm:$0xff]  }
  0xe8   : > { %4020 = vmatpush1.bf16.msra.mxu1 %v7795_v35 }
  0xea   : > { %7479 = vmatmul.mubr.msk.f32.gmra.mrb[104].mxu0 %vm402_vm0, %v1734_v39  ;;  %7559 = vmatmul.mubr.msk.f32.gmra.mrb[104].mxu1 %vm402_vm0, %v2423_v40  ;;  %v1747_v39 = vld [vmem:[%s8029_s23 + $0x5f0] sm:$0xff] }
  0xeb   : > { %7481 = vmatprep.mubr.msk.f32.mxu0 %vm402_vm0, %v1735_v42  ;;  %7561 = vmatprep.mubr.msk.f32.mxu1 %vm402_vm0, %v2424_v43  ;;  %v2436_v40 = vld [vmem:[%s8029_s23 + $0x770] sm:$0xff]  ;;  %v7800_v43 = vld [vmem:[%s10449_s3 + $0x204] ss:$36 sps:$4 sm:$0xff]  }
  0xec   : > { %4021 = vmatprep.subr.bf16.mxu1 %v7800_v43 }
  0xed   : > { %v8531_v51 = vpop.f32.mrb[0].mxu1  ;;  %v8533_v52 = vpop.f32.mrb[0].mxu0 }
  0xee   : > { %v8538_v54 = vpop.f32.mrb[1].mxu1  ;;  %7482 = vmatmul.mubr.msk.f32.gmra.mrb[106].mxu0 %vm402_vm0, %v1736_v47  ;;  %7562 = vmatmul.mubr.msk.f32.gmra.mrb[106].mxu1 %vm402_vm0, %v2425_v48  ;;  %v8542_v55 = vpop.f32.mrb[1].mxu0  ;;  %v7798_v47 = vld [vmem:[%s10449_s3 + $0x200] ss:$36 sps:$4 sm:$0xff]  }
  0xef   : > { %7484 = vmatprep.mubr.msk.f32.mxu0 %vm402_vm0, %v1737_v49  ;;  %7564 = vmatprep.mubr.msk.f32.mxu1 %vm402_vm0, %v2426_v50  ;;  %v1748_v49 = vld [vmem:[%s8029_s23 + $0x5f8] sm:$0xff] }
  0xf0   : > { %v2437_v50 = vld [vmem:[%s8029_s23 + $0x778] sm:$0xff]  ;;  %4022 = vmatpush1.bf16.msra.mxu1 %v7798_v47 }
  0xf1   : > { %v8553_v61 = vpop.f32.mrb[2].mxu1  ;;  %v8555_v62 = vpop.f32.mrb[2].mxu0  ;;  %v2445_v47 = vld [vmem:[%s8029_s23 + $0x7b8] sm:$0xff] }
  0xf2   : > { %10544 = vst [vmem:[#allocation3_spill] sm:$0xff] %v8553_v61  ;;  %v8560_v0 = vpop.f32.mrb[3].mxu1  ;;  %7485 = vmatmul.mubr.msk.f32.gmra.mrb[108].mxu0 %vm402_vm0, %v1738_v57  ;;  %7565 = vmatmul.mubr.msk.f32.gmra.mrb[108].mxu1 %vm402_vm0, %v2427_v58  ;;  %v8564_v1 = vpop.f32.mrb[3].mxu0 }
  0xf3   : > { %10545 = vst [vmem:[#allocation4_spill] sm:$0xff] %v8560_v0  ;;  %7487 = vmatprep.mubr.msk.f32.mxu0 %vm402_vm0, %v1739_v59  ;;  %7567 = vmatprep.mubr.msk.f32.mxu1 %vm402_vm0, %v2428_v60 }
  0xf5   : > { %v8575_v7 = vpop.f32.mrb[4].mxu1  ;;  %v8577_v8 = vpop.f32.mrb[4].mxu0 }
  0xf6   : > { %10546 = vst [vmem:[#allocation5_spill] sm:$0xff] %v8575_v7  ;;  %v8582_v10 = vpop.f32.mrb[5].mxu1  ;;  %7488 = vmatmul.mubr.msk.f32.gmra.mrb[110].mxu0 %vm402_vm0, %v1740_v3  ;;  %7568 = vmatmul.mubr.msk.f32.gmra.mrb[110].mxu1 %vm402_vm0, %v2429_v4  ;;  %v8586_v11 = vpop.f32.mrb[5].mxu0  ;;  %v10456_v3 = vmov 0   ;;  %v2440_v4 = vld [vmem:[%s8029_s23 + $0x790] sm:$0xff] }
  0xf7   : > { %10547 = vst [vmem:[#allocation6_spill] sm:$0xff] %v8582_v10  ;;  %7490 = vmatprep.mubr.msk.f32.mxu0 %vm402_vm0, %v1741_v5  ;;  %7570 = vmatprep.mubr.msk.f32.mxu1 %vm402_vm0, %v2430_v6 }
  0xf9   : > { %v8603_v19 = vpop.f32.mrb[6].mxu1  ;;  %v8605_v20 = vpop.f32.mrb[6].mxu0 }
  0xfa   : > { %10548 = vst [vmem:[#allocation7_spill] sm:$0xff] %v8603_v19  ;;  %v8610_v22 = vpop.f32.mrb[7].mxu1  ;;  %7491 = vmatmul.mubr.msk.f32.gmra.mrb[112].mxu0 %vm402_vm0, %v1742_v13  ;;  %7571 = vmatmul.mubr.msk.f32.gmra.mrb[112].mxu1 %vm402_vm0, %v2431_v14  ;;  %v8614_v23 = vpop.f32.mrb[7].mxu0 }
  0xfb   : > { %10549 = vst [vmem:[#allocation8_spill] sm:$0xff] %v8610_v22  ;;  %7493 = vmatprep.mubr.msk.f32.mxu0 %vm402_vm0, %v1743_v16  ;;  %7573 = vmatprep.mubr.msk.f32.mxu1 %vm402_vm0, %v2432_v17  ;;  %v2442_v16 = vld [vmem:[%s8029_s23 + $0x7a0] sm:$0xff] }
  0xfd   : > { %v8625_v29 = vpop.f32.mrb[8].mxu1  ;;  %v8627_v30 = vpop.f32.mrb[8].mxu0 }
  0xfe   : > { %v8634_v33 = vpop.f32.mrb[9].mxu1  ;;  %7494 = vmatmul.mubr.msk.f32.gmra.mrb[114].mxu0 %vm402_vm0, %v1744_v25  ;;  %7574 = vmatmul.mubr.msk.f32.gmra.mrb[114].mxu1 %vm402_vm0, %v2433_v26  ;;  %v8638_v34 = vpop.f32.mrb[9].mxu0 }
  0xff   : > { %7496 = vmatprep.mubr.msk.f32.mxu0 %vm402_vm0, %v1745_v27  ;;  %7576 = vmatprep.mubr.msk.f32.mxu1 %vm402_vm0, %v2434_v28  ;;  %v2443_v28 = vld [vmem:[%s8029_s23 + $0x7a8] sm:$0xff]  ;;  %v2450_v27 = vld [vmem:[%s8029_s23 + $0x7e0] sm:$0xff] }
 0x101   : > { %v8651_v41 = vpop.f32.mrb[10].mxu1  ;;  %v8653_v42 = vpop.f32.mrb[10].mxu0 }
 0x102   : > { %v8660_v45 = vpop.f32.mrb[11].mxu1  ;;  %7497 = vmatmul.mubr.msk.f32.gmra.mrb[116].mxu0 %vm402_vm0, %v1746_v37  ;;  %7577 = vmatmul.mubr.msk.f32.gmra.mrb[116].mxu1 %vm402_vm0, %v2435_v38  ;;  %v8664_v46 = vpop.f32.mrb[11].mxu0 }
 0x103   : > { %7499 = vmatprep.mubr.msk.f32.mxu0 %vm402_vm0, %v1747_v39  ;;  %7579 = vmatprep.mubr.msk.f32.mxu1 %vm402_vm0, %v2436_v40 }
 0x105   : > { %v8676_v56 = vpop.f32.mrb[12].mxu1  ;;  %v8678_v57 = vpop.f32.mrb[12].mxu0 }
 0x106   : > { %v8682_v59 = vpop.f32.mrb[13].mxu1  ;;  %7500 = vmatmul.mubr.msk.f32.gmra.mrb[118].mxu0 %vm402_vm0, %v1748_v49  ;;  %7580 = vmatmul.mubr.msk.f32.gmra.mrb[118].mxu1 %vm402_vm0, %v2437_v50  ;;  %v8686_v60 = vpop.f32.mrb[13].mxu0  ;;  %v2446_v49 = vld [vmem:[%s8029_s23 + $0x7c0] sm:$0xff] }
 0x107   : > { %7582 = vmatprep.mubr.msk.f32.mxu1 %vm402_vm0, %v2438_v53  ;;  %3742 = vmatprep.mubr.bf16.mxu0 %v10456_v3 }
 0x109   : > { %v8694_v5 = vpop.f32.mrb[14].mxu1  ;;  %v8696_v6 = vpop.f32.mrb[14].mxu0 }
 0x10a   : > { %v8700_v12 = vpop.f32.mrb[15].mxu1  ;;  %7583 = vmatmul.mubr.msk.f32.gmra.mrb[120].mxu1 %vm402_vm0, %v2439_v2  ;;  %v8703_v13 = vpop.f32.mrb[15].mxu0 }
 0x10b   : > { %7585 = vmatprep.mubr.msk.f32.mxu1 %vm402_vm0, %v2440_v4 }
 0x10d   : > { %v8710_v17 = vpop.f32.mrb[16].mxu1  ;;  %v8712_v18 = vpop.f32.mrb[16].mxu0 }
 0x10e   : > { %v8719_v25 = vpop.f32.mrb[17].mxu1  ;;  %7586 = vmatmul.mubr.msk.f32.gmra.mrb[122].mxu1 %vm402_vm0, %v2441_v15  ;;  %v8722_v26 = vpop.f32.mrb[17].mxu0 }
 0x10f   : > { %7588 = vmatprep.mubr.msk.f32.mxu1 %vm402_vm0, %v2442_v16  ;;  %v2449_v16 = vld [vmem:[%s8029_s23 + $0x7d8] sm:$0xff] }
 0x111   : > { %v8729_v35 = vpop.f32.mrb[18].mxu1  ;;  %v8731_v37 = vpop.f32.mrb[18].mxu0 }
 0x112   : > { %10550 = vst [vmem:[#allocation9_spill] sm:$0xff] %v8731_v37  ;;  %v8735_v39 = vpop.f32.mrb[19].mxu1  ;;  %7589 = vmatmul.mubr.msk.f32.gmra.mrb[124].mxu1 %vm402_vm0, %v2443_v28  ;;  %v8738_v40 = vpop.f32.mrb[19].mxu0  ;;  %v2448_v28 = vld [vmem:[%s8029_s23 + $0x7d0] sm:$0xff] }
 0x113   : > { %10551 = vst [vmem:[#allocation10_spill] sm:$0xff] %v8738_v40  ;;  %7591 = vmatprep.mubr.msk.f32.mxu1 %vm402_vm0, %v2444_v31 }
 0x115   : > { %v8745_v50 = vpop.f32.mrb[20].mxu1  ;;  %v8747_v53 = vpop.f32.mrb[20].mxu0 }
 0x116   : > { %10552 = vst [vmem:[#allocation11_spill] sm:$0xff] %v8747_v53  ;;  %v8751_v4 = vpop.f32.mrb[21].mxu1  ;;  %7592 = vmatmul.mubr.msk.f32.gmra.mrb[126].mxu1 %vm402_vm0, %v2445_v47  ;;  %v8754_v15 = vpop.f32.mrb[21].mxu0 }
 0x117   : > { %10553 = vst [vmem:[#allocation12_spill] sm:$0xff] %v8754_v15  ;;  %7594 = vmatprep.mubr.msk.f32.mxu1 %vm402_vm0, %v2446_v49  ;;  %v10566_v49 = vmov 0  }
 0x119   : > { %v8761_v31 = vpop.f32.mrb[22].mxu1  ;;  %v8763_v43 = vpop.f32.mrb[22].mxu0 }
 0x11a   : > { %10554 = vst [vmem:[#allocation13_spill] sm:$0xff] %v8763_v43  ;;  %v8767_v38 = vpop.f32.mrb[23].mxu1  ;;  %7595 = vmatmul.mubr.msk.f32.gmra.mrb[128].mxu1 %vm402_vm0, %v2447_v21  ;;  %v8770_v47 = vpop.f32.mrb[23].mxu0 }
 0x11b   : > { %10555 = vst [vmem:[#allocation14_spill] sm:$0xff] %v8770_v47  ;;  %7597 = vmatprep.mubr.msk.f32.mxu1 %vm402_vm0, %v2448_v28  ;;  %v2451_v28 = vld [vmem:[%s8029_s23 + $0x7e8] sm:$0xff] }
 0x11d   : > { %v8777_v24 = vpop.f32.mrb[24].mxu1  ;;  %v8779_v14 = vpop.f32.mrb[24].mxu0 }
 0x11e   : > { %10556 = vst [vmem:[#allocation15_spill] sm:$0xff] %v8779_v14  ;;  %v8783_v9 = vpop.f32.mrb[25].mxu1  ;;  %7598 = vmatmul.mubr.msk.f32.gmra.mrb[130].mxu1 %vm402_vm0, %v2449_v16  ;;  %v8786_v21 = vpop.f32.mrb[25].mxu0 }
 0x11f   : > { %10557 = vst [vmem:[#allocation16_spill] sm:$0xff] %v8786_v21  ;;  %7600 = vmatprep.mubr.msk.f32.mxu1 %vm402_vm0, %v2450_v27  ;;  %v2453_v27 = vld [vmem:[%s8029_s23 + $0x7f8] sm:$0xff] }
 0x121   : > { %v8793_v58 = vpop.f32.mrb[26].mxu1  ;;  %v8795_v48 = vpop.f32.mrb[26].mxu0 }
 0x122   : > { %10558 = vst [vmem:[#allocation17_spill] sm:$0xff] %v8793_v58  ;;  %10559 = vst [vmem:[#allocation18_spill] sm:$0xff] %v8795_v48  ;;  %v8799_v44 = vpop.f32.mrb[27].mxu1  ;;  %7601 = vmatmul.mubr.msk.f32.gmra.mrb[132].mxu1 %vm402_vm0, %v2451_v28  ;;  %v8802_v16 = vpop.f32.mrb[27].mxu0  ;;  %v9125_v58 = vld [vmem:[%s10448_s2] ss:$0 sm:$0xff] }
 0x123   : > { %10560 = vst [vmem:[#allocation19_spill] sm:$0xff] %v8799_v44  ;;  %10561 = vst [vmem:[#allocation20_spill] sm:$0xff] %v8802_v16  ;;  %7603 = vmatprep.mubr.msk.f32.mxu1 %vm402_vm0, %v2452_v63 }
 0x125   : > { %v8808_v36 = vpop.f32.mrb[28].mxu1  ;;  %v8810_v32 = vpop.f32.mrb[28].mxu0 }
 0x126   : > { %10562 = vst [vmem:[#allocation21_spill] sm:$0xff] %v8808_v36  ;;  %10563 = vst [vmem:[#allocation22_spill] sm:$0xff] %v8810_v32  ;;  %v8814_v2 = vpop.f32.mrb[29].mxu1  ;;  %7604 = vmatmul.mubr.msk.f32.gmra.mrb[134].mxu1 %vm402_vm0, %v2453_v27  ;;  %v8817_v28 = vpop.f32.mrb[29].mxu0  ;;  %v10612_v27 = vmax.f32 %v8542_v55, %v8634_v33  ;;  %v10614_v55 = vmax.f32 %v8564_v1, %v8660_v45  ;;  %v10616_v1 = vmax.f32 %v8586_v11, %v8682_v59 }
 0x127   : > { %10564 = vst [vmem:[#allocation23_spill] sm:$0xff] %v8814_v2  ;;  %10565 = vst [vmem:[#allocation24_spill] sm:$0xff] %v8817_v28  ;;  %4039 = vmatprep.mubr.bf16.mxu1 %v10566_v49  ;;  %v10618_v11 = vmax.f32 %v8614_v23, %v8700_v12  ;;  %v10620_v23 = vmax.f32 %v8638_v34, %v8719_v25  ;;  %v10624_v34 = vmax.f32 %v8664_v46, %v8735_v39 }
 0x128   : > { %v10628_v46 = vmax.f32 %v8686_v60, %v8751_v4  ;;  %v10632_v60 = vmax.f32 %v8703_v13, %v8767_v38  ;;  %v10634_v13 = vmax.f32 %v8722_v26, %v8783_v9 }
 0x129   : > { %v8822_v63 = vpop.f32.mrb[30].mxu1  ;;  %v8824_v44 = vpop.f32.mrb[30].mxu0 }
 0x12a   : > { %10567 = vst [vmem:[#allocation25_spill] sm:$0xff] %v8822_v63  ;;  %10568 = vst [vmem:[#allocation26_spill] sm:$0xff] %v8824_v44  ;;  %v8828_v37 = vpop.f32.mrb[31].mxu1  ;;  %v8830_v3 = vpop.f32.mrb[31].mxu0 }
 0x12b   : > { %10569 = vst [vmem:[#allocation27_spill] sm:$0xff] %v8828_v37  ;;  %10570 = vst [vmem:[#allocation28_spill] sm:$0xff] %v8830_v3 }
 0x12d   : > { %v8834_v36 = vpop.f32.mrb[32].mxu1  ;;  %v8836_v53 = vpop.f32.mrb[32].mxu0 }
 0x12e   : > { %10571 = vst [vmem:[#allocation29_spill] sm:$0xff] %v8834_v36  ;;  %10572 = vst [vmem:[#allocation30_spill] sm:$0xff] %v8836_v53  ;;  %v8840_v49 = vpop.f32.mrb[33].mxu1  ;;  %v8842_v2 = vpop.f32.mrb[33].mxu0 }
 0x12f   : > { %10573 = vst [vmem:[#allocation31_spill] sm:$0xff] %v8840_v49  ;;  %10574 = vst [vmem:[#allocation32_spill] sm:$0xff] %v8842_v2 }
 0x131   : > { %v8846_v63 = vpop.f32.mrb[34].mxu1  ;;  %v8848_v43 = vpop.f32.mrb[34].mxu0 }
 0x132   : > { %10575 = vst [vmem:[#allocation33_spill] sm:$0xff] %v8846_v63  ;;  %10576 = vst [vmem:[#allocation34_spill] sm:$0xff] %v8848_v43  ;;  %v8852_v37 = vpop.f32.mrb[35].mxu1  ;;  %v8854_v47 = vpop.f32.mrb[35].mxu0 }
 0x133   : > { %10577 = vst [vmem:[#allocation35_spill] sm:$0xff] %v8852_v37  ;;  %10578 = vst [vmem:[#allocation36_spill] sm:$0xff] %v8854_v47 }
 0x135   : > { %v8858_v36 = vpop.f32.mrb[36].mxu1  ;;  %v8860_v14 = vpop.f32.mrb[36].mxu0 }
 0x136   : > { %10579 = vst [vmem:[#allocation37_spill] sm:$0xff] %v8858_v36  ;;  %10580 = vst [vmem:[#allocation38_spill] sm:$0xff] %v8860_v14  ;;  %v8864_v49 = vpop.f32.mrb[37].mxu1  ;;  %v8866_v21 = vpop.f32.mrb[37].mxu0 }
 0x137   : > { %10581 = vst [vmem:[#allocation39_spill] sm:$0xff] %v8864_v49  ;;  %10582 = vst [vmem:[#allocation40_spill] sm:$0xff] %v8866_v21 }
 0x139   : > { %v8870_v63 = vpop.f32.mrb[38].mxu1  ;;  %v8872_v48 = vpop.f32.mrb[38].mxu0 }
 0x13a   : > { %10583 = vst [vmem:[#allocation41_spill] sm:$0xff] %v8870_v63  ;;  %10584 = vst [vmem:[#allocation42_spill] sm:$0xff] %v8872_v48  ;;  %v8876_v37 = vpop.f32.mrb[39].mxu1  ;;  %v8878_v16 = vpop.f32.mrb[39].mxu0 }
 0x13b   : > { %10585 = vst [vmem:[#allocation43_spill] sm:$0xff] %v8876_v37  ;;  %10586 = vst [vmem:[#allocation44_spill] sm:$0xff] %v8878_v16 }
 0x13d   : > { %v8882_v36 = vpop.f32.mrb[40].mxu1  ;;  %v8884_v32 = vpop.f32.mrb[40].mxu0 }
 0x13e   : > { %10587 = vst [vmem:[#allocation45_spill] sm:$0xff] %v8882_v36  ;;  %10588 = vst [vmem:[#allocation46_spill] sm:$0xff] %v8884_v32  ;;  %v8888_v49 = vpop.f32.mrb[41].mxu1  ;;  %v8890_v28 = vpop.f32.mrb[41].mxu0 }
 0x13f   : > { %10589 = vst [vmem:[#allocation47_spill] sm:$0xff] %v8888_v49  ;;  %10590 = vst [vmem:[#allocation48_spill] sm:$0xff] %v8890_v28 }
 0x141   : > { %v8894_v63 = vpop.f32.mrb[42].mxu1  ;;  %v8896_v44 = vpop.f32.mrb[42].mxu0 }
 0x142   : > { %10591 = vst [vmem:[#allocation49_spill] sm:$0xff] %v8894_v63  ;;  %10592 = vst [vmem:[#allocation50_spill] sm:$0xff] %v8896_v44  ;;  %v8900_v37 = vpop.f32.mrb[43].mxu1  ;;  %v8902_v3 = vpop.f32.mrb[43].mxu0 }
 0x143   : > { %10593 = vst [vmem:[#allocation51_spill] sm:$0xff] %v8900_v37  ;;  %10594 = vst [vmem:[#allocation52_spill] sm:$0xff] %v8902_v3 }
 0x145   : > { %v8906_v36 = vpop.f32.mrb[44].mxu1  ;;  %v8908_v53 = vpop.f32.mrb[44].mxu0 }
 0x146   : > { %10595 = vst [vmem:[#allocation53_spill] sm:$0xff] %v8906_v36  ;;  %10596 = vst [vmem:[#allocation54_spill] sm:$0xff] %v8908_v53  ;;  %v8912_v49 = vpop.f32.mrb[45].mxu1  ;;  %v8914_v2 = vpop.f32.mrb[45].mxu0 }
 0x147   : > { %10597 = vst [vmem:[#allocation55_spill] sm:$0xff] %v8912_v49  ;;  %10598 = vst [vmem:[#allocation56_spill] sm:$0xff] %v8914_v2 }
 0x149   : > { %v8918_v63 = vpop.f32.mrb[46].mxu1  ;;  %v8920_v43 = vpop.f32.mrb[46].mxu0 }
 0x14a   : > { %10599 = vst [vmem:[#allocation57_spill] sm:$0xff] %v8918_v63  ;;  %10600 = vst [vmem:[#allocation58_spill] sm:$0xff] %v8920_v43  ;;  %v8924_v37 = vpop.f32.mrb[47].mxu1  ;;  %v8926_v47 = vpop.f32.mrb[47].mxu0 }
 0x14b   : > { %10601 = vst [vmem:[#allocation59_spill] sm:$0xff] %v8924_v37  ;;  %10602 = vst [vmem:[#allocation60_spill] sm:$0xff] %v8926_v47 }
 0x14d   : > { %v8930_v36 = vpop.f32.mrb[48].mxu1  ;;  %v8932_v14 = vpop.f32.mrb[48].mxu0 }
 0x14e   : > { %10603 = vst [vmem:[#allocation61_spill] sm:$0xff] %v8930_v36  ;;  %v8936_v49 = vpop.f32.mrb[49].mxu1  ;;  %v8938_v21 = vpop.f32.mrb[49].mxu0 }
 0x14f   : > { %10604 = vst [vmem:[#allocation62_spill] sm:$0xff] %v8936_v49 }
 0x151   : > { %v8942_v63 = vpop.f32.mrb[50].mxu1  ;;  %v8944_v48 = vpop.f32.mrb[50].mxu0 }
 0x152   : > { %10605 = vst [vmem:[#allocation63_spill] sm:$0xff] %v8942_v63  ;;  %v8948_v37 = vpop.f32.mrb[51].mxu1  ;;  %v8950_v16 = vpop.f32.mrb[51].mxu0 }
 0x153   : > { %10606 = vst [vmem:[#allocation64_spill] sm:$0xff] %v8948_v37 }
 0x155   : > { %v8954_v36 = vpop.f32.mrb[52].mxu1  ;;  %v8956_v32 = vpop.f32.mrb[52].mxu0 }
 0x156   : > { %10607 = vst [vmem:[#allocation65_spill] sm:$0xff] %v8954_v36  ;;  %v8960_v49 = vpop.f32.mrb[53].mxu1  ;;  %v8962_v28 = vpop.f32.mrb[53].mxu0 }
 0x157   : > { %10608 = vst [vmem:[#allocation66_spill] sm:$0xff] %v8960_v49  ;;  %v10611_v49 = vmax.f32 %v8533_v52, %v8625_v29  ;;  %v10613_v52 = vmax.f32 %v8555_v62, %v8651_v41  ;;  %v10615_v62 = vmax.f32 %v8577_v8, %v8676_v56  ;;  %v10617_v8 = vmax.f32 %v8605_v20, %v8694_v5 }
 0x158   : > { %v10619_v20 = vmax.f32 %v8627_v30, %v8710_v17  ;;  %v10622_v30 = vmax.f32 %v8653_v42, %v8729_v35  ;;  %v10626_v42 = vmax.f32 %v8678_v57, %v8745_v50  ;;  %v10630_v57 = vmax.f32 %v8696_v6, %v8761_v31 }
 0x159   : > { %v8966_v63 = vpop.f32.mrb[54].mxu1  ;;  %v8968_v44 = vpop.f32.mrb[54].mxu0  ;;  %v10633_v6 = vmax.f32 %v8712_v18, %v8777_v24  ;;  %v10635_v24 = vld [vmem:[#allocation9_spill] sm:$0xff] }
 0x15a   : > { %10609 = vst [vmem:[#allocation67_spill] sm:$0xff] %v8966_v63  ;;  %v8972_v37 = vpop.f32.mrb[55].mxu1  ;;  %v8974_v3 = vpop.f32.mrb[55].mxu0 }
 0x15b   : > { %10610 = vst [vmem:[#allocation68_spill] sm:$0xff] %v8972_v37 }
 0x15d   : > { %v8978_v36 = vpop.f32.mrb[56].mxu1  ;;  %v7408_v53 = vpop.f32.mrb[56].mxu0 }
 0x15e   : > { %v8985_v2 = vmax.f32 %v10611_v49, %v7408_v53  ;;  %v8987_v15 = vpop.f32.mrb[57].mxu1  ;;  %v2007_v40 = vpop.f32.mrb[57].mxu0 }
 0x15f   : > { %v8994_v37 = vmax.f32 %v10612_v27, %v2007_v40 }
 0x161   : > { %v8996_v47 = vpop.f32.mrb[58].mxu1  ;;  %v7411_v43 = vpop.f32.mrb[58].mxu0 }
 0x162   : > { %v9003_v29 = vmax.f32 %v10613_v52, %v7411_v43  ;;  %v9005_v53 = vpop.f32.mrb[59].mxu1  ;;  %v2017_v49 = vpop.f32.mrb[59].mxu0 }
 0x163   : > { %v9012_v33 = vmax.f32 %v10614_v55, %v2017_v49 }
 0x165   : > { %v9014_v40 = vpop.f32.mrb[60].mxu1  ;;  %v7414_v27 = vpop.f32.mrb[60].mxu0 }
 0x166   : > { %v9021_v41 = vmax.f32 %v10615_v62, %v7414_v27  ;;  %v9023_v43 = vpop.f32.mrb[61].mxu1  ;;  %v2027_v52 = vpop.f32.mrb[61].mxu0 }
 0x167   : > { %v9030_v45 = vmax.f32 %v10616_v1, %v2027_v52 }
 0x169   : > { %v9032_v49 = vpop.f32.mrb[62].mxu1  ;;  %v7417_v55 = vpop.f32.mrb[62].mxu0 }
 0x16a   : > { %v9039_v56 = vmax.f32 %v10617_v8, %v7417_v55  ;;  %v9041_v27 = vpop.f32.mrb[63].mxu1  ;;  %v2037_v62 = vpop.f32.mrb[63].mxu0 }
 0x16b   : > { %v9048_v59 = vmax.f32 %v10618_v11, %v2037_v62 }
 0x16d   : > { %v9050_v52 = vpop.f32.mrb[64].mxu1  ;;  %v7420_v1 = vpop.f32.mrb[64].mxu0 }
 0x16e   : > { %v9057_v5 = vmax.f32 %v10619_v20, %v7420_v1  ;;  %v9059_v55 = vpop.f32.mrb[65].mxu1  ;;  %v2047_v8 = vpop.f32.mrb[65].mxu0 }
 0x16f   : > { %v9066_v12 = vmax.f32 %v10620_v23, %v2047_v8 }
 0x171   : > { %v9068_v62 = vpop.f32.mrb[66].mxu1  ;;  %v7423_v11 = vpop.f32.mrb[66].mxu0 }
 0x172   : > { %10621 = vst [vmem:[#allocation69_spill] sm:$0xff] %v9068_v62  ;;  %v9075_v17 = vmax.f32 %v10622_v30, %v7423_v11  ;;  %v9077_v1 = vpop.f32.mrb[67].mxu1  ;;  %v2057_v20 = vpop.f32.mrb[67].mxu0 }
 0x173   : > { %10623 = vst [vmem:[#allocation70_spill] sm:$0xff] %v9077_v1  ;;  %v9084_v25 = vmax.f32 %v10624_v34, %v2057_v20 }
 0x175   : > { %v9086_v8 = vpop.f32.mrb[68].mxu1  ;;  %v7426_v23 = vpop.f32.mrb[68].mxu0 }
 0x176   : > { %10625 = vst [vmem:[#allocation71_spill] sm:$0xff] %v9086_v8  ;;  %v9093_v35 = vmax.f32 %v10626_v42, %v7426_v23  ;;  %v9095_v11 = vpop.f32.mrb[69].mxu1  ;;  %v2067_v30 = vpop.f32.mrb[69].mxu0 }
 0x177   : > { %10627 = vst [vmem:[#allocation72_spill] sm:$0xff] %v9095_v11  ;;  %v9102_v39 = vmax.f32 %v10628_v46, %v2067_v30 }
 0x179   : > { %v9104_v20 = vpop.f32.mrb[70].mxu1  ;;  %v7429_v34 = vpop.f32.mrb[70].mxu0 }
 0x17a   : > { %10629 = vst [vmem:[#allocation73_spill] sm:$0xff] %v9104_v20  ;;  %v9111_v50 = vmax.f32 %v10630_v57, %v7429_v34  ;;  %v9113_v23 = vpop.f32.mrb[71].mxu1  ;;  %v2077_v42 = vpop.f32.mrb[71].mxu0 }
 0x17b   : > { %10631 = vst [vmem:[#allocation74_spill] sm:$0xff] %v9113_v23  ;;  %v9120_v4 = vmax.f32 %v10632_v60, %v2077_v42 }
 0x17d   : > { %v7432_v30 = vpop.f32.mrb[72].mxu0  ;;  %v7512_v46 = vpop.f32.mrb[72].mxu1 }
 0x17e   : > { %v9130_v31 = vmax.f32 %v10633_v6, %v7432_v30  ;;  %v3032_v34 = vmax.f32 %v8985_v2, %v7512_v46  ;;  %v2087_v57 = vpop.f32.mrb[73].mxu0  ;;  %v2712_v63 = vpop.f32.mrb[73].mxu1  ;;  %v10636_v30 = vld [vmem:[#allocation17_spill] sm:$0xff] }
 0x17f   : > { %v9136_v38 = vmax.f32 %v10634_v13, %v2087_v57  ;;  %v3031_v42 = vmax.f32 %v8994_v37, %v2712_v63  ;;  %v10637_v6 = vmax.f32 %v10635_v24, %v10636_v30  ;;  %v10638_v57 = vld [vmem:[#allocation10_spill] sm:$0xff]  ;;  %v10639_v13 = vld [vmem:[#allocation19_spill] sm:$0xff] }
 0x180   : > { %v3103_v60 = vadd.f32 %v9125_v58, %v3032_v34  ;;  %v10640_v37 = vmax.f32 %v10638_v57, %v10639_v13  ;;  %v10642_v30 = vld [vmem:[#allocation11_spill] sm:$0xff] }
 0x181   : > { %v3102_v23 = vadd.f32 %v9125_v58, %v3031_v42  ;;  %v7435_v22 = vpop.f32.mrb[74].mxu0  ;;  %v7515_v20 = vpop.f32.mrb[74].mxu1 }
 0x182   : > { %v3167_v18 = vmax.f32 %v3103_v60, 0.0  ;;  %v9144_v2 = vmax.f32 %v10637_v6, %v7435_v22  ;;  %v3034_v46 = vmax.f32 %v9003_v29, %v7515_v20  ;;  %v2097_v19 = vpop.f32.mrb[75].mxu0  ;;  %v2722_v9 = vpop.f32.mrb[75].mxu1  ;;  %v7801_v60 = vld [vmem:[%s10449_s3 + $0x10] ss:$36 sps:$4 sm:$0xff]  }
 0x183   : > { %v3166_v26 = vmax.f32 %v3102_v23, 0.0  ;;  %v9150_v63 = vmax.f32 %v10640_v37, %v2097_v19  ;;  %v3033_v34 = vmax.f32 %v9012_v33, %v2722_v9  ;;  %v7806_v23 = vld [vmem:[%s10449_s3 + $0x5c] ss:$36 sps:$4 sm:$0xff]   ;;  %v10643_v6 = vld [vmem:[#allocation21_spill] sm:$0xff] }
 0x184   : > { %v3105_v42 = vadd.f32 %v9125_v58, %v3034_v46  ;;  %v10644_v33 = vmax.f32 %v10642_v30, %v10643_v6  ;;  %v10646_v37 = vld [vmem:[#allocation23_spill] sm:$0xff] }
 0x185   : > { %v9157_v22 = vpack.c.bf16 %v3167_v18, %v3166_v26  ;;  %v3104_v29 = vadd.f32 %v9125_v58, %v3033_v34  ;;  %v7438_v20 = vpop.f32.mrb[76].mxu0  ;;  %v7518_v24 = vpop.f32.mrb[76].mxu1  ;;  %v10645_v26 = vld [vmem:[#allocation12_spill] sm:$0xff] }
 0x186   : > { %v3169_v19 = vmax.f32 %v3105_v42, 0.0  ;;  %v9166_v9 = vmax.f32 %v10644_v33, %v7438_v20  ;;  %v3036_v46 = vmax.f32 %v9021_v41, %v7518_v24  ;;  %v2107_v57 = vpop.f32.mrb[77].mxu0  ;;  %v2732_v13 = vpop.f32.mrb[77].mxu1  ;;  %v10647_v34 = vmax.f32 %v10645_v26, %v10646_v37  ;;  %v7804_v41 = vld [vmem:[%s10449_s3 + $0x58] ss:$36 sps:$4 sm:$0xff]  }
 0x187   : > { %10641 = vst [vmem:[#allocation9_spill] sm:$0xff] %v9157_v22  ;;  %v3168_v18 = vmax.f32 %v3104_v29, 0.0  ;;  %v3035_v10 = vmax.f32 %v9030_v45, %v2732_v13  ;;  %3743 = vmatmul.mubr.bf16.vlgmr.msra.gmra.mrb[120].mxu0 %v9157_v22  ;;  %4040 = vmatmul.mubr.bf16.vlgmr.msra.gmra.mrb[136].mxu1 %v9157_v22  ;;  %v10648_v20 = vmov 0   ;;  %v7809_v45 = vld [vmem:[%s10449_s3 + $0xa4] ss:$36 sps:$4 sm:$0xff]   ;;  %v10650_v33 = vld [vmem:[#allocation13_spill] sm:$0xff] }
 0x188   : > { %v9172_v11 = vmax.f32 %v10647_v34, %v2107_v57  ;;  %v3107_v42 = vadd.f32 %v9125_v58, %v3036_v46  ;;  %4305 = vmatpush1.bf16.msra.mxu0 %v7801_v60  ;;  %3751 = vmatprep.mubr.bf16.mxu0 %v10648_v20  ;;  %v10651_v46 = vld [vmem:[#allocation25_spill] sm:$0xff]  ;;  %v10653_v37 = vld [vmem:[#allocation14_spill] sm:$0xff]  ;;  %v10654_v34 = vld [vmem:[#allocation27_spill] sm:$0xff] }
 0x189   : > { %v9182_v29 = vpack.c.bf16 %v3169_v19, %v3168_v18  ;;  %v3106_v24 = vadd.f32 %v9125_v58, %v3035_v10  ;;  %v7441_v30 = vpop.f32.mrb[78].mxu0  ;;  %v7521_v6 = vpop.f32.mrb[78].mxu1  ;;  %4045 = vmatprep.mubr.bf16.mxu1 %v10648_v20  ;;  %4306 = vmatprep.subr.bf16.mxu0 %v7806_v23  ;;  %v10652_v57 = vmax.f32 %v10650_v33, %v10651_v46 }
 0x18a   : > { %v3171_v60 = vmax.f32 %v3107_v42, 0.0  ;;  %v3038_v19 = vmax.f32 %v9039_v56, %v7521_v6  ;;  %v2117_v18 = vpop.f32.mrb[79].mxu0  ;;  %v2742_v26 = vpop.f32.mrb[79].mxu1  ;;  %v10655_v22 = vmax.f32 %v10653_v37, %v10654_v34  ;;  %v7807_v56 = vld [vmem:[%s10449_s3 + $0xa0] ss:$36 sps:$4 sm:$0xff]  }
 0x18b   : > { %10649 = vst [vmem:[#allocation17_spill] sm:$0xff] %v9182_v29  ;;  %v9192_v13 = vmax.f32 %v10652_v57, %v7441_v30  ;;  %v3170_v10 = vmax.f32 %v3106_v24, 0.0  ;;  %v3037_v23 = vmax.f32 %v9048_v59, %v2742_v26  ;;  %v10657_v6 = vld [vmem:[#allocation15_spill] sm:$0xff] }
 0x18c   : > { %v9198_v8 = vmax.f32 %v10655_v22, %v2117_v18  ;;  %v3109_v7 = vadd.f32 %v9125_v58, %v3038_v19  ;;  %4307 = vmatpush1.bf16.msra.mxu0 %v7804_v41  ;;  %v10658_v22 = vld [vmem:[#allocation29_spill] sm:$0xff]  ;;  %v10661_v37 = vld [vmem:[#allocation31_spill] sm:$0xff] }
 0x18d   : > { %v9202_v42 = vpack.c.bf16 %v3171_v60, %v3170_v10  ;;  %v3108_v30 = vadd.f32 %v9125_v58, %v3037_v23  ;;  %v7444_v33 = vpop.f32.mrb[80].mxu0  ;;  %v7524_v46 = vpop.f32.mrb[80].mxu1  ;;  %4308 = vmatprep.subr.bf16.mxu0 %v7809_v45  ;;  %v10659_v57 = vmax.f32 %v10657_v6, %v10658_v22  ;;  %v7812_v19 = vld [vmem:[%s10449_s3 + $0xec] ss:$36 sps:$4 sm:$0xff]   ;;  %v10664_v22 = vld [vmem:[#allocation18_spill] sm:$0xff] }
 0x18e   : > { %v3173_v24 = vmax.f32 %v3109_v7, 0.0  ;;  %v3040_v59 = vmax.f32 %v9057_v5, %v7524_v46  ;;  %v2127_v41 = vpop.f32.mrb[81].mxu0  ;;  %v2752_v60 = vpop.f32.mrb[81].mxu1  ;;  %v10660_v10 = vld [vmem:[#allocation16_spill] sm:$0xff] }
 0x18f   : > { %10656 = vst [vmem:[#allocation10_spill] sm:$0xff] %v9202_v42  ;;  %v9211_v18 = vmax.f32 %v10659_v57, %v7444_v33  ;;  %v3172_v26 = vmax.f32 %v3108_v30, 0.0  ;;  %v10662_v34 = vmax.f32 %v10660_v10, %v10661_v37  ;;  %v3039_v7 = vmax.f32 %v9066_v12, %v2752_v60  ;;  %3752 = vmatmul.mubr.bf16.gmra.mrb[124].mxu0 %v9182_v29  ;;  %v7810_v12 = vld [vmem:[%s10449_s3 + $0xe8] ss:$36 sps:$4 sm:$0xff]   ;;  %v10665_v57 = vld [vmem:[#allocation33_spill] sm:$0xff] }
 0x190   : > { %4046 = vmatmul.mubr.bf16.gmra.mrb[140].mxu1 %v9182_v29  ;;  %v3111_v5 = vadd.f32 %v9125_v58, %v3040_v59  ;;  %3761 = vmatprep.mubr.bf16.mxu0 %v10648_v20  ;;  %v10667_v37 = vld [vmem:[#allocation20_spill] sm:$0xff] }
 0x191   : > { %v9220_v23 = vmax.f32 %v10662_v34, %v2127_v41  ;;  %4053 = vmatprep.mubr.bf16.mxu1 %v10648_v20  ;;  %v9228_v45 = vpack.c.bf16 %v3173_v24, %v3172_v26  ;;  %v3110_v30 = vadd.f32 %v9125_v58, %v3039_v7  ;;  %v7447_v33 = vpop.f32.mrb[82].mxu0  ;;  %v7527_v46 = vpop.f32.mrb[82].mxu1  ;;  %4309 = vmatpush1.bf16.msra.mxu0 %v7807_v56  ;;  %v7815_v26 = vld [vmem:[%s10449_s3 + $0x134] ss:$36 sps:$4 sm:$0xff]   ;;  %v10668_v34 = vld [vmem:[#allocation35_spill] sm:$0xff] }
 0x192   : > { %v3175_v6 = vmax.f32 %v3111_v5, 0.0  ;;  %v10666_v41 = vmax.f32 %v10664_v22, %v10665_v57  ;;  %v3042_v60 = vmax.f32 %v9075_v17, %v7527_v46  ;;  %v2137_v10 = vpop.f32.mrb[83].mxu0  ;;  %v2762_v24 = vpop.f32.mrb[83].mxu1  ;;  %4310 = vmatprep.subr.bf16.mxu0 %v7812_v19  ;;  %v10669_v7 = vmax.f32 %v10667_v37, %v10668_v34  ;;  %v10672_v37 = vld [vmem:[#allocation37_spill] sm:$0xff] }
 0x193   : > { %10663 = vst [vmem:[#allocation19_spill] sm:$0xff] %v9228_v45  ;;  %v3174_v56 = vmax.f32 %v3110_v30, 0.0  ;;  %v3041_v5 = vmax.f32 %v9084_v25, %v2762_v24  ;;  %v7813_v30 = vld [vmem:[%s10449_s3 + $0x130] ss:$36 sps:$4 sm:$0xff]  }
 0x194   : > { %v9237_v59 = vmax.f32 %v10666_v41, %v7447_v33  ;;  %v9246_v29 = vmax.f32 %v10669_v7, %v2137_v10  ;;  %v3113_v33 = vadd.f32 %v9125_v58, %v3042_v60  ;;  %v10671_v41 = vld [vmem:[#allocation22_spill] sm:$0xff]  ;;  %v10675_v7 = vld [vmem:[#allocation39_spill] sm:$0xff] }
 0x195   : > { %v9250_v22 = vpack.c.bf16 %v3175_v6, %v3174_v56  ;;  %v3112_v17 = vadd.f32 %v9125_v58, %v3041_v5  ;;  %v7450_v46 = vpop.f32.mrb[84].mxu0  ;;  %v7530_v19 = vpop.f32.mrb[84].mxu1  ;;  %4311 = vmatpush1.bf16.msra.mxu0 %v7810_v12  ;;  %v10673_v10 = vmax.f32 %v10671_v41, %v10672_v37  ;;  %v10674_v56 = vld [vmem:[#allocation24_spill] sm:$0xff]  ;;  %v10678_v41 = vld [vmem:[#allocation26_spill] sm:$0xff] }
 0x196   : > { %v3177_v57 = vmax.f32 %v3113_v33, 0.0  ;;  %v3044_v25 = vmax.f32 %v9093_v35, %v7530_v19  ;;  %v2147_v60 = vpop.f32.mrb[85].mxu0  ;;  %v2772_v6 = vpop.f32.mrb[85].mxu1  ;;  %4312 = vmatprep.subr.bf16.mxu0 %v7815_v26  ;;  %v10676_v5 = vmax.f32 %v10674_v56, %v10675_v7  ;;  %v10681_v7 = vld [vmem:[#allocation28_spill] sm:$0xff] }
 0x197   : > { %10670 = vst [vmem:[#allocation11_spill] sm:$0xff] %v9250_v22  ;;  %v9259_v34 = vmax.f32 %v10673_v10, %v7450_v46  ;;  %v3176_v24 = vmax.f32 %v3112_v17, 0.0  ;;  %v3043_v1 = vmax.f32 %v9102_v39, %v2772_v6  ;;  %3762 = vmatmul.mubr.bf16.gmra.mrb[128].mxu0 %v9202_v42  ;;  %v10679_v39 = vld [vmem:[#allocation41_spill] sm:$0xff] }
 0x198   : > { %v9265_v12 = vmax.f32 %v10676_v5, %v2147_v60  ;;  %4054 = vmatmul.mubr.bf16.gmra.mrb[144].mxu1 %v9202_v42  ;;  %v3115_v33 = vadd.f32 %v9125_v58, %v3044_v25  ;;  %3771 = vmatprep.mubr.bf16.mxu0 %v10648_v20  ;;  %v10680_v37 = vmax.f32 %v10678_v41, %v10679_v39  ;;  %v10682_v5 = vld [vmem:[#allocation43_spill] sm:$0xff] }
 0x199   : > { %4061 = vmatprep.mubr.bf16.mxu1 %v10648_v20  ;;  %v9273_v35 = vpack.c.bf16 %v3177_v57, %v3176_v24  ;;  %v3114_v26 = vadd.f32 %v9125_v58, %v3043_v1  ;;  %v7453_v17 = vpop.f32.mrb[86].mxu0  ;;  %v7533_v46 = vpop.f32.mrb[86].mxu1  ;;  %4313 = vmatpush1.bf16.msra.mxu0 %v7813_v30  ;;  %v10683_v57 = vmax.f32 %v10681_v7, %v10682_v5 }
 0x19a   : > { %v3179_v19 = vmax.f32 %v3115_v33, 0.0  ;;  %v9279_v10 = vmax.f32 %v10680_v37, %v7453_v17  ;;  %v3046_v60 = vmax.f32 %v9111_v50, %v7533_v46  ;;  %v2157_v25 = vpop.f32.mrb[87].mxu0  ;;  %v2782_v6 = vpop.f32.mrb[87].mxu1  ;;  %v10685_v50 = vld [vmem:[#allocation30_spill] sm:$0xff]  ;;  %v10686_v46 = vld [vmem:[#allocation45_spill] sm:$0xff] }
 0x19b   : > { %10677 = vst [vmem:[#allocation21_spill] sm:$0xff] %v9273_v35  ;;  %v3178_v56 = vmax.f32 %v3114_v26, 0.0  ;;  %v9285_v24 = vmax.f32 %v10683_v57, %v2157_v25  ;;  %v3045_v1 = vmax.f32 %v9120_v4, %v2782_v6  ;;  %v10687_v42 = vmax.f32 %v10685_v50, %v10686_v46  ;;  %v10688_v4 = vld [vmem:[#allocation32_spill] sm:$0xff]  ;;  %v10689_v6 = vld [vmem:[#allocation47_spill] sm:$0xff]  ;;  %v10692_v50 = vld [vmem:[#allocation49_spill] sm:$0xff] }
 0x19c   : > { %v3117_v30 = vadd.f32 %v9125_v58, %v3046_v60  ;;  %v10690_v60 = vmax.f32 %v10688_v4, %v10689_v6  ;;  %v10694_v6 = vld [vmem:[#allocation36_spill] sm:$0xff] }
 0x19d   : > { %v9289_v33 = vpack.c.bf16 %v3179_v19, %v3178_v56  ;;  %v3116_v41 = vadd.f32 %v9125_v58, %v3045_v1  ;;  %v7456_v17 = vpop.f32.mrb[88].mxu0  ;;  %v7536_v39 = vpop.f32.mrb[88].mxu1 }
 0x19e   : > { %v3181_v37 = vmax.f32 %v3117_v30, 0.0  ;;  %v9295_v26 = vmax.f32 %v10687_v42, %v7456_v17  ;;  %v3048_v7 = vmax.f32 %v9130_v31, %v7536_v39  ;;  %v2167_v25 = vpop.f32.mrb[89].mxu0  ;;  %v2792_v5 = vpop.f32.mrb[89].mxu1  ;;  %v10691_v39 = vld [vmem:[#allocation34_spill] sm:$0xff] }
 0x19f   : > { %10684 = vst [vmem:[#allocation12_spill] sm:$0xff] %v9289_v33  ;;  %v3180_v57 = vmax.f32 %v3116_v41, 0.0  ;;  %v9301_v19 = vmax.f32 %v10690_v60, %v2167_v25  ;;  %v3047_v56 = vmax.f32 %v9136_v38, %v2792_v5  ;;  %3772 = vmatmul.mubr.bf16.gmra.mrb[132].mxu0 %v9228_v45  ;;  %v10693_v38 = vmax.f32 %v10691_v39, %v10692_v50  ;;  %v10695_v60 = vld [vmem:[#allocation51_spill] sm:$0xff] }
 0x1a0   : > { %4062 = vmatmul.mubr.bf16.gmra.mrb[148].mxu1 %v9228_v45  ;;  %v3119_v1 = vadd.f32 %v9125_v58, %v3048_v7  ;;  %3778 = vmatprep.mubr.bf16.mxu0 %v10648_v20  ;;  %v10696_v45 = vmax.f32 %v10694_v6, %v10695_v60 }
 0x1a1   : > { %4069 = vmatprep.mubr.bf16.mxu1 %v10648_v20  ;;  %v9309_v31 = vpack.c.bf16 %v3181_v37, %v3180_v57  ;;  %v3118_v42 = vadd.f32 %v9125_v58, %v3047_v56  ;;  %v7459_v30 = vpop.f32.mrb[90].mxu0  ;;  %v7539_v41 = vpop.f32.mrb[90].mxu1 }
 0x1a2   : > { %v3183_v17 = vmax.f32 %v3119_v1, 0.0  ;;  %v9315_v46 = vmax.f32 %v10693_v38, %v7459_v30  ;;  %v3050_v25 = vmax.f32 %v9144_v2, %v7539_v41  ;;  %v2177_v5 = vpop.f32.mrb[91].mxu0  ;;  %v2802_v7 = vpop.f32.mrb[91].mxu1  ;;  %v10697_v2 = vld [vmem:[#allocation38_spill] sm:$0xff]  ;;  %v10698_v41 = vld [vmem:[#allocation53_spill] sm:$0xff] }
 0x1a3   : > { %v3182_v4 = vmax.f32 %v3118_v42, 0.0  ;;  %v9321_v37 = vmax.f32 %v10696_v45, %v2177_v5  ;;  %v3049_v57 = vmax.f32 %v9150_v63, %v2802_v7  ;;  %v10699_v0 = vmax.f32 %v10697_v2, %v10698_v41  ;;  %v10700_v63 = vld [vmem:[#allocation40_spill] sm:$0xff]  ;;  %v10701_v7 = vld [vmem:[#allocation55_spill] sm:$0xff] }
 0x1a4   : > { %v3121_v56 = vadd.f32 %v9125_v58, %v3050_v25  ;;  %v10702_v25 = vmax.f32 %v10700_v63, %v10701_v7 }
 0x1a5   : > { %v9325_v1 = vpack.c.bf16 %v3183_v17, %v3182_v4  ;;  %v3120_v39 = vadd.f32 %v9125_v58, %v3049_v57  ;;  %v7462_v30 = vpop.f32.mrb[92].mxu0  ;;  %v7542_v50 = vpop.f32.mrb[92].mxu1 }
 0x1a6   : > { %v3185_v38 = vmax.f32 %v3121_v56, 0.0  ;;  %v9331_v42 = vmax.f32 %v10699_v0, %v7462_v30  ;;  %v3052_v6 = vmax.f32 %v9166_v9, %v7542_v50  ;;  %v2187_v45 = vpop.f32.mrb[93].mxu0  ;;  %v2812_v5 = vpop.f32.mrb[93].mxu1  ;;  %v7816_v0 = vld [vmem:[%s10449_s3 + $0x178] ss:$36 sps:$4 sm:$0xff]  }
 0x1a7   : > { %v3184_v60 = vmax.f32 %v3120_v39, 0.0  ;;  %v9337_v17 = vmax.f32 %v10702_v25, %v2187_v45  ;;  %v3051_v4 = vmax.f32 %v9172_v11, %v2812_v5  ;;  %3779 = vmatmul.mubr.bf16.gmra.mrb[136].mxu0 %v9250_v22  ;;  %v7818_v9 = vld [vmem:[%s10449_s3 + $0x17c] ss:$36 sps:$4 sm:$0xff]   ;;  %v10704_v45 = vld [vmem:[#allocation57_spill] sm:$0xff] }
 0x1a8   : > { %4070 = vmatmul.mubr.bf16.gmra.mrb[152].mxu1 %v9250_v22  ;;  %v3123_v57 = vadd.f32 %v9125_v58, %v3052_v6  ;;  %3787 = vmatprep.mubr.bf16.mxu0 %v10648_v20  ;;  %v7819_v11 = vld [vmem:[%s10449_s3 + $0x18] ss:$36 sps:$4 sm:$0xff]  }
 0x1a9   : > { %4077 = vmatprep.mubr.bf16.mxu1 %v10648_v20  ;;  %v7821_v56 = vld [vmem:[%s10449_s3 + $0x1c] ss:$36 sps:$4 sm:$0xff]   ;;  %v9357_v39 = vpack.c.bf16 %v3185_v38, %v3184_v60  ;;  %v3122_v30 = vadd.f32 %v9125_v58, %v3051_v4  ;;  %v7465_v50 = vpop.f32.mrb[94].mxu0  ;;  %v7545_v2 = vpop.f32.mrb[94].mxu1  ;;  %4314 = vmatprep.subr.bf16.mxu0 %v7818_v9  ;;  %v10706_v38 = vld [vmem:[#allocation44_spill] sm:$0xff] }
 0x1aa   : > { %v3187_v41 = vmax.f32 %v3123_v57, 0.0  ;;  %v10703_v6 = vld [vmem:[#allocation42_spill] sm:$0xff]  ;;  %v3054_v7 = vmax.f32 %v9192_v13, %v7545_v2  ;;  %v2197_v25 = vpop.f32.mrb[95].mxu0  ;;  %v2822_v22 = vpop.f32.mrb[95].mxu1  ;;  %4315 = vmatpush1.bf16.msra.mxu0 %v7816_v0  ;;  %4601 = vmatprep.subr.bf16.mxu1 %v7821_v56  ;;  %v10707_v60 = vld [vmem:[#allocation59_spill] sm:$0xff]  ;;  %v10710_v56 = vld [vmem:[#allocation61_spill] sm:$0xff] }
 0x1ab   : > { %v10705_v5 = vmax.f32 %v10703_v6, %v10704_v45  ;;  %v3186_v62 = vmax.f32 %v3122_v30, 0.0  ;;  %v10708_v61 = vmax.f32 %v10706_v38, %v10707_v60  ;;  %v3053_v9 = vmax.f32 %v9198_v8, %v2822_v22  ;;  %4602 = vmatpush1.bf16.msra.mxu1 %v7819_v11  ;;  %v10709_v0 = vld [vmem:[#allocation46_spill] sm:$0xff]  ;;  %v10712_v22 = vld [vmem:[#allocation48_spill] sm:$0xff] }
 0x1ac   : > { %v3125_v57 = vadd.f32 %v9125_v58, %v3054_v7  ;;  %v10711_v30 = vmax.f32 %v10709_v0, %v10710_v56  ;;  %v10713_v11 = vld [vmem:[#allocation62_spill] sm:$0xff]  ;;  %v10716_v0 = vld [vmem:[#allocation63_spill] sm:$0xff] }
 0x1ad   : > { %v9363_v63 = vmax.f32 %v10705_v5, %v7465_v50  ;;  %v9369_v4 = vmax.f32 %v10708_v61, %v2197_v25  ;;  %v9373_v6 = vpack.c.bf16 %v3187_v41, %v3186_v62  ;;  %v3124_v50 = vadd.f32 %v9125_v58, %v3053_v9  ;;  %v7468_v13 = vpop.f32.mrb[96].mxu0  ;;  %v7548_v2 = vpop.f32.mrb[96].mxu1 }
 0x1ae   : > { %v3189_v45 = vmax.f32 %v3125_v57, 0.0  ;;  %v9379_v5 = vmax.f32 %v10711_v30, %v7468_v13  ;;  %v3056_v61 = vmax.f32 %v9211_v18, %v7548_v2  ;;  %v2207_v25 = vpop.f32.mrb[97].mxu0  ;;  %v2832_v38 = vpop.f32.mrb[97].mxu1  ;;  %v10714_v7 = vmax.f32 %v10712_v22, %v10713_v11  ;;  %v10715_v2 = vld [vmem:[#allocation50_spill] sm:$0xff]  ;;  %v10718_v22 = vld [vmem:[#allocation52_spill] sm:$0xff] }
 0x1af   : > { %v3188_v8 = vmax.f32 %v3124_v50, 0.0  ;;  %v3055_v41 = vmax.f32 %v9220_v23, %v2832_v38  ;;  %3788 = vmatmul.mubr.bf16.gmra.mrb[140].mxu0 %v9273_v35  ;;  %v10717_v23 = vmax.f32 %v10715_v2, %v10716_v0  ;;  %v10719_v11 = vld [vmem:[#allocation64_spill] sm:$0xff] }
 0x1b0   : > { %v9385_v62 = vmax.f32 %v10714_v7, %v2207_v25  ;;  %4078 = vmatmul.mubr.bf16.gmra.mrb[156].mxu1 %v9273_v35  ;;  %v3127_v60 = vadd.f32 %v9125_v58, %v3056_v61  ;;  %3797 = vmatprep.mubr.bf16.mxu0 %v10648_v20  ;;  %v10720_v7 = vmax.f32 %v10718_v22, %v10719_v11 }
 0x1b1   : > { %4087 = vmatprep.mubr.bf16.mxu1 %v10648_v20  ;;  %v9393_v18 = vpack.c.bf16 %v3189_v45, %v3188_v8  ;;  %v3126_v9 = vadd.f32 %v9125_v58, %v3055_v41  ;;  %v7471_v57 = vpop.f32.mrb[98].mxu0  ;;  %v7551_v50 = vpop.f32.mrb[98].mxu1 }
 0x1b2   : > { %v3191_v13 = vmax.f32 %v3127_v60, 0.0  ;;  %v9399_v56 = vmax.f32 %v10717_v23, %v7471_v57  ;;  %v3058_v30 = vmax.f32 %v9237_v59, %v7551_v50  ;;  %v2217_v25 = vpop.f32.mrb[99].mxu0  ;;  %v2842_v61 = vpop.f32.mrb[99].mxu1  ;;  %v10721_v59 = vld [vmem:[#allocation54_spill] sm:$0xff]  ;;  %v10722_v50 = vld [vmem:[#allocation65_spill] sm:$0xff] }
 0x1b3   : > { %v3190_v38 = vmax.f32 %v3126_v9, 0.0  ;;  %v9405_v45 = vmax.f32 %v10720_v7, %v2217_v25  ;;  %v3057_v8 = vmax.f32 %v9246_v29, %v2842_v61  ;;  %v10723_v35 = vmax.f32 %v10721_v59, %v10722_v50  ;;  %v10724_v29 = vld [vmem:[#allocation56_spill] sm:$0xff]  ;;  %v10725_v61 = vld [vmem:[#allocation66_spill] sm:$0xff]  ;;  %v10728_v59 = vld [vmem:[#allocation67_spill] sm:$0xff] }
 0x1b4   : > { %v3129_v41 = vadd.f32 %v9125_v58, %v3058_v30  ;;  %v10726_v30 = vmax.f32 %v10724_v29, %v10725_v61  ;;  %v10730_v61 = vld [vmem:[#allocation60_spill] sm:$0xff] }
 0x1b5   : > { %v9409_v60 = vpack.c.bf16 %v3191_v13, %v3190_v38  ;;  %v3128_v2 = vadd.f32 %v9125_v58, %v3057_v8  ;;  %v7474_v57 = vpop.f32.mrb[100].mxu0  ;;  %v7554_v0 = vpop.f32.mrb[100].mxu1 }
 0x1b6   : > { %v3193_v23 = vmax.f32 %v3129_v41, 0.0  ;;  %v9415_v9 = vmax.f32 %v10723_v35, %v7474_v57  ;;  %v3060_v22 = vmax.f32 %v9259_v34, %v7554_v0  ;;  %v2227_v25 = vpop.f32.mrb[101].mxu0  ;;  %v2852_v11 = vpop.f32.mrb[101].mxu1  ;;  %v10727_v0 = vld [vmem:[#allocation58_spill] sm:$0xff] }
 0x1b7   : > { %v3192_v7 = vmax.f32 %v3128_v2, 0.0  ;;  %v9421_v13 = vmax.f32 %v10726_v30, %v2227_v25  ;;  %v3059_v38 = vmax.f32 %v9265_v12, %v2852_v11  ;;  %3798 = vmatmul.mubr.bf16.gmra.mrb[144].mxu0 %v9289_v33  ;;  %v10729_v12 = vmax.f32 %v10727_v0, %v10728_v59  ;;  %v10731_v30 = vld [vmem:[#allocation68_spill] sm:$0xff] }
 0x1b8   : > { %4088 = vmatmul.mubr.bf16.gmra.mrb[160].mxu1 %v9289_v33  ;;  %v3131_v8 = vadd.f32 %v9125_v58, %v3060_v22  ;;  %3807 = vmatprep.mubr.bf16.mxu0 %v10648_v20  ;;  %v10732_v33 = vmax.f32 %v10730_v61, %v10731_v30 }
 0x1b9   : > { %4097 = vmatprep.mubr.bf16.mxu1 %v10648_v20  ;;  %v9429_v34 = vpack.c.bf16 %v3193_v23, %v3192_v7  ;;  %v3130_v35 = vadd.f32 %v9125_v58, %v3059_v38  ;;  %v7477_v41 = vpop.f32.mrb[102].mxu0  ;;  %v7557_v2 = vpop.f32.mrb[102].mxu1 }
 0x1ba   : > { %v3195_v57 = vmax.f32 %v3131_v8, 0.0  ;;  %v9435_v50 = vmax.f32 %v10729_v12, %v7477_v41  ;;  %v3062_v25 = vmax.f32 %v9279_v10, %v7557_v2  ;;  %v2237_v11 = vpop.f32.mrb[103].mxu0  ;;  %v2862_v22 = vpop.f32.mrb[103].mxu1  ;;  %v10733_v10 = vmax.f32 %v8932_v14, %v8978_v36 }
 0x1bb   : > { %v3194_v29 = vmax.f32 %v3130_v35, 0.0  ;;  %v9441_v23 = vmax.f32 %v10732_v33, %v2237_v11  ;;  %v3061_v7 = vmax.f32 %v9285_v24, %v2862_v22  ;;  %v10734_v24 = vmax.f32 %v8938_v21, %v8987_v15 }
 0x1bc   : > { %v3133_v38 = vadd.f32 %v9125_v58, %v3062_v25 }
 0x1bd   : > { %v9445_v8 = vpack.c.bf16 %v3195_v57, %v3194_v29  ;;  %v3132_v0 = vadd.f32 %v9125_v58, %v3061_v7  ;;  %v7480_v41 = vpop.f32.mrb[104].mxu0  ;;  %v7560_v59 = vpop.f32.mrb[104].mxu1 }
 0x1be   : > { %v3197_v12 = vmax.f32 %v3133_v38, 0.0  ;;  %v9451_v35 = vmax.f32 %v10733_v10, %v7480_v41  ;;  %v3064_v2 = vmax.f32 %v9295_v26, %v7560_v59  ;;  %v2247_v33 = vpop.f32.mrb[105].mxu0  ;;  %v2872_v11 = vpop.f32.mrb[105].mxu1  ;;  %v10736_v41 = vmax.f32 %v8950_v16, %v9005_v53 }
 0x1bf   : > { %v3196_v61 = vmax.f32 %v3132_v0, 0.0  ;;  %v9457_v57 = vmax.f32 %v10734_v24, %v2247_v33  ;;  %v3063_v25 = vmax.f32 %v9301_v19, %v2872_v11  ;;  %3808 = vmatmul.mubr.bf16.gmra.mrb[148].mxu0 %v9309_v31  ;;  %v10735_v19 = vmax.f32 %v8944_v48, %v8996_v47 }
 0x1c0   : > { %4098 = vmatmul.mubr.bf16.gmra.mrb[164].mxu1 %v9309_v31  ;;  %v3135_v36 = vadd.f32 %v9125_v58, %v3064_v2  ;;  %3814 = vmatprep.mubr.bf16.mxu0 %v10648_v20 }
 0x1c1   : > { %4105 = vmatprep.mubr.bf16.mxu1 %v10648_v20  ;;  %v9465_v14 = vpack.c.bf16 %v3197_v12, %v3196_v61  ;;  %v3134_v26 = vadd.f32 %v9125_v58, %v3063_v25  ;;  %v7483_v22 = vpop.f32.mrb[106].mxu0  ;;  %v7563_v15 = vpop.f32.mrb[106].mxu1 }
 0x1c2   : > { %v3199_v21 = vmax.f32 %v3135_v36, 0.0  ;;  %v9471_v29 = vmax.f32 %v10735_v19, %v7483_v22  ;;  %v3066_v30 = vmax.f32 %v9315_v46, %v7563_v15  ;;  %v2257_v7 = vpop.f32.mrb[107].mxu0  ;;  %v2882_v38 = vpop.f32.mrb[107].mxu1  ;;  %v10737_v46 = vmax.f32 %v8956_v32, %v9014_v40  ;;  %v7822_v32 = vld [vmem:[%s10449_s3 + $0x1c0] ss:$36 sps:$4 sm:$0xff]  }
 0x1c3   : > { %v3198_v0 = vmax.f32 %v3134_v26, 0.0  ;;  %v9477_v59 = vmax.f32 %v10736_v41, %v2257_v7  ;;  %v3065_v12 = vmax.f32 %v9321_v37, %v2882_v38  ;;  %v10738_v37 = vmax.f32 %v8962_v28, %v9023_v43  ;;  %v7824_v40 = vld [vmem:[%s10449_s3 + $0x1c4] ss:$36 sps:$4 sm:$0xff]  }
 0x1c4   : > { %v3137_v10 = vadd.f32 %v9125_v58, %v3066_v30  ;;  %v7825_v28 = vld [vmem:[%s10449_s3 + $0x60] ss:$36 sps:$4 sm:$0xff]   ;;  %4316 = vmatprep.subr.bf16.mxu0 %v7824_v40  ;;  %v10739_v30 = vmax.f32 %v8968_v44, %v9032_v49 }
 0x1c5   : > { %v9481_v2 = vpack.c.bf16 %v3199_v21, %v3198_v0  ;;  %v3136_v48 = vadd.f32 %v9125_v58, %v3065_v12  ;;  %v7486_v47 = vpop.f32.mrb[108].mxu0  ;;  %v7566_v33 = vpop.f32.mrb[108].mxu1  ;;  %v7827_v43 = vld [vmem:[%s10449_s3 + $0x64] ss:$36 sps:$4 sm:$0xff]   ;;  %4317 = vmatpush1.bf16.msra.mxu0 %v7822_v32 }
 0x1c6   : > { %v3201_v11 = vmax.f32 %v3137_v10, 0.0  ;;  %v9487_v61 = vmax.f32 %v10737_v46, %v7486_v47  ;;  %v3068_v16 = vmax.f32 %v9331_v42, %v7566_v33  ;;  %v2267_v53 = vpop.f32.mrb[109].mxu0  ;;  %v2892_v24 = vpop.f32.mrb[109].mxu1  ;;  %4603 = vmatprep.subr.bf16.mxu1 %v7827_v43  ;;  %v10740_v10 = vmax.f32 %v8974_v3, %v9041_v27  ;;  %v10743_v40 = vld [vmem:[#allocation3_spill] sm:$0xff] }
 0x1c7   : > { %v3200_v25 = vmax.f32 %v3136_v48, 0.0  ;;  %v9493_v36 = vmax.f32 %v10738_v37, %v2267_v53  ;;  %v3067_v26 = vmax.f32 %v9337_v17, %v2892_v24  ;;  %3815 = vmatmul.mubr.bf16.gmra.mrb[152].mxu0 %v9325_v1  ;;  %4604 = vmatpush1.bf16.msra.mxu1 %v7825_v28 }
 0x1c8   : > { %4106 = vmatmul.mubr.bf16.gmra.mrb[168].mxu1 %v9325_v1  ;;  %v3139_v42 = vadd.f32 %v9125_v58, %v3068_v16  ;;  %3823 = vmatprep.mubr.bf16.mxu0 %v10648_v20  ;;  %v10741_v16 = vmax.f32 %v8531_v51, %v9050_v52 }
 0x1c9   : > { %4113 = vmatprep.mubr.bf16.mxu1 %v10648_v20  ;;  %v9513_v17 = vpack.c.bf16 %v3201_v11, %v3200_v25  ;;  %v3138_v22 = vadd.f32 %v9125_v58, %v3067_v26  ;;  %v7489_v15 = vpop.f32.mrb[110].mxu0  ;;  %v7569_v21 = vpop.f32.mrb[110].mxu1  ;;  %v10742_v25 = vmax.f32 %v8538_v54, %v9059_v55 }
 0x1ca   : > { %v3203_v19 = vmax.f32 %v3139_v42, 0.0  ;;  %v9519_v7 = vmax.f32 %v10739_v30, %v7489_v15  ;;  %v3070_v38 = vmax.f32 %v9363_v63, %v7569_v21  ;;  %v2277_v0 = vpop.f32.mrb[111].mxu0  ;;  %v2902_v41 = vpop.f32.mrb[111].mxu1  ;;  %v10744_v42 = vld [vmem:[#allocation69_spill] sm:$0xff]  ;;  %v10747_v30 = vld [vmem:[#allocation70_spill] sm:$0xff] }
 0x1cb   : > { %v3202_v12 = vmax.f32 %v3138_v22, 0.0  ;;  %v9525_v48 = vmax.f32 %v10740_v10, %v2277_v0  ;;  %v3069_v47 = vmax.f32 %v9369_v4, %v2902_v41 }
 0x1cc   : > { %v3141_v33 = vadd.f32 %v9125_v58, %v3070_v38 }
 0x1cd   : > { %v9529_v44 = vpack.c.bf16 %v3203_v19, %v3202_v12  ;;  %v3140_v49 = vadd.f32 %v9125_v58, %v3069_v47  ;;  %v7492_v63 = vpop.f32.mrb[112].mxu0  ;;  %v7572_v11 = vpop.f32.mrb[112].mxu1  ;;  %v10746_v19 = vld [vmem:[#allocation4_spill] sm:$0xff] }
 0x1ce   : > { %v3205_v46 = vmax.f32 %v3141_v33, 0.0  ;;  %v9535_v53 = vmax.f32 %v10741_v16, %v7492_v63  ;;  %v3072_v3 = vmax.f32 %v9379_v5, %v7572_v11  ;;  %v2287_v27 = vpop.f32.mrb[113].mxu0  ;;  %v2912_v24 = vpop.f32.mrb[113].mxu1  ;;  %v10748_v38 = vmax.f32 %v10746_v19, %v10747_v30  ;;  %v10750_v11 = vld [vmem:[#allocation71_spill] sm:$0xff] }
 0x1cf   : > { %v3204_v4 = vmax.f32 %v3140_v49, 0.0  ;;  %v9541_v37 = vmax.f32 %v10742_v25, %v2287_v27  ;;  %v3071_v26 = vmax.f32 %v9385_v62, %v2912_v24  ;;  %3824 = vmatmul.mubr.bf16.gmra.mrb[156].mxu0 %v9357_v39  ;;  %v10745_v62 = vmax.f32 %v10743_v40, %v10744_v42  ;;  %v10753_v25 = vld [vmem:[#allocation72_spill] sm:$0xff] }
 0x1d0   : > { %4114 = vmatmul.mubr.bf16.gmra.mrb[172].mxu1 %v9357_v39  ;;  %v3143_v51 = vadd.f32 %v9125_v58, %v3072_v3  ;;  %3833 = vmatprep.mubr.bf16.mxu0 %v10648_v20 }
 0x1d1   : > { %4123 = vmatprep.mubr.bf16.mxu1 %v10648_v20  ;;  %v9549_v52 = vpack.c.bf16 %v3205_v46, %v3204_v4  ;;  %v3142_v5 = vadd.f32 %v9125_v58, %v3071_v26  ;;  %v7495_v32 = vpop.f32.mrb[114].mxu0  ;;  %v7575_v54 = vpop.f32.mrb[114].mxu1 }
 0x1d2   : > { %v3207_v55 = vmax.f32 %v3143_v51, 0.0  ;;  %v9555_v28 = vmax.f32 %v10745_v62, %v7495_v32  ;;  %v3074_v43 = vmax.f32 %v9399_v56, %v7575_v54  ;;  %v2297_v22 = vpop.f32.mrb[115].mxu0  ;;  %v2922_v15 = vpop.f32.mrb[115].mxu1  ;;  %v10749_v56 = vld [vmem:[#allocation5_spill] sm:$0xff]  ;;  %v10755_v62 = vld [vmem:[#allocation7_spill] sm:$0xff] }
 0x1d3   : > { %v3206_v21 = vmax.f32 %v3142_v5, 0.0  ;;  %v9561_v0 = vmax.f32 %v10748_v38, %v2297_v22  ;;  %v3073_v41 = vmax.f32 %v9405_v45, %v2922_v15  ;;  %v10751_v46 = vmax.f32 %v10749_v56, %v10750_v11  ;;  %v10752_v45 = vld [vmem:[#allocation6_spill] sm:$0xff]  ;;  %v10758_v38 = vld [vmem:[#allocation8_spill] sm:$0xff] }
 0x1d4   : > { %v3145_v12 = vadd.f32 %v9125_v58, %v3074_v43  ;;  %v10754_v26 = vmax.f32 %v10752_v45, %v10753_v25  ;;  %v10756_v43 = vld [vmem:[#allocation73_spill] sm:$0xff] }
 0x1d5   : > { %v9565_v10 = vpack.c.bf16 %v3207_v55, %v3206_v21  ;;  %v3144_v47 = vadd.f32 %v9125_v58, %v3073_v41  ;;  %v7498_v33 = vpop.f32.mrb[116].mxu0  ;;  %v7578_v49 = vpop.f32.mrb[116].mxu1  ;;  %v10759_v41 = vld [vmem:[#allocation74_spill] sm:$0xff] }
 0x1d6   : > { %v3209_v63 = vmax.f32 %v3145_v12, 0.0  ;;  %v9571_v16 = vmax.f32 %v10751_v46, %v7498_v33  ;;  %v3076_v3 = vmax.f32 %v9415_v9, %v7578_v49  ;;  %v2307_v27 = vpop.f32.mrb[117].mxu0  ;;  %v2932_v24 = vpop.f32.mrb[117].mxu1  ;;  %v10760_v12 = vmax.f32 %v10758_v38, %v10759_v41 }
 0x1d7   : > { %v3208_v4 = vmax.f32 %v3144_v47, 0.0  ;;  %v9577_v51 = vmax.f32 %v10754_v26, %v2307_v27  ;;  %v3075_v5 = vmax.f32 %v9421_v13, %v2932_v24  ;;  %3834 = vmatmul.mubr.bf16.gmra.mrb[160].mxu0 %v9373_v6  ;;  %v10757_v13 = vmax.f32 %v10755_v62, %v10756_v43 }
 0x1d8   : > { %4124 = vmatmul.mubr.bf16.gmra.mrb[176].mxu1 %v9373_v6  ;;  %v3147_v32 = vadd.f32 %v9125_v58, %v3076_v3  ;;  %3843 = vmatprep.mubr.bf16.mxu0 %v10648_v20 }
 0x1d9   : > { %4133 = vmatprep.mubr.bf16.mxu1 %v10648_v20  ;;  %v9585_v9 = vpack.c.bf16 %v3209_v63, %v3208_v4  ;;  %v3146_v54 = vadd.f32 %v9125_v58, %v3075_v5  ;;  %v7501_v55 = vpop.f32.mrb[118].mxu0  ;;  %v7581_v40 = vpop.f32.mrb[118].mxu1 }
 0x1da   : > { %v3211_v42 = vmax.f32 %v3147_v32, 0.0  ;;  %v9591_v22 = vmax.f32 %v10757_v13, %v7501_v55  ;;  %v3078_v15 = vmax.f32 %v9435_v50, %v7581_v40  ;;  %v2317_v21 = vpop.f32.mrb[119].mxu0  ;;  %v2942_v19 = vpop.f32.mrb[119].mxu1 }
 0x1db   : > { %v3210_v30 = vmax.f32 %v3146_v54, 0.0  ;;  %v9597_v47 = vmax.f32 %v10760_v12, %v2317_v21  ;;  %v3077_v33 = vmax.f32 %v9441_v23, %v2942_v19 }
 0x1dc   : > { %v3149_v49 = vadd.f32 %v9125_v58, %v3078_v15 }
 0x1dd   : > { %v9601_v63 = vpack.c.bf16 %v3211_v42, %v3210_v30  ;;  %v3148_v56 = vadd.f32 %v9125_v58, %v3077_v33  ;;  %v7584_v11 = vpop.f32.mrb[120].mxu1 }
 0x1de   : > { %v3213_v46 = vmax.f32 %v3149_v49, 0.0  ;;  %v3080_v50 = vmax.f32 %v9451_v35, %v7584_v11  ;;  %v2952_v3 = vpop.f32.mrb[121].mxu1  ;;  %v7833_v11 = vld [vmem:[%s10449_s3 + $0xac] ss:$36 sps:$4 sm:$0xff]  }
 0x1df   : > { %v3212_v27 = vmax.f32 %v3148_v56, 0.0  ;;  %v3079_v24 = vmax.f32 %v9457_v57, %v2952_v3  ;;  %3844 = vmatmul.mubr.bf16.gmra.mrb[164].mxu0 %v9393_v18  ;;  %4605 = vmatprep.subr.bf16.mxu1 %v7833_v11 }
 0x1e0   : > { %4134 = vmatmul.mubr.bf16.gmra.mrb[180].mxu1 %v9393_v18  ;;  %v3151_v23 = vadd.f32 %v9125_v58, %v3080_v50  ;;  %3850 = vmatprep.mubr.bf16.mxu0 %v10648_v20 }
 0x1e1   : > { %4141 = vmatprep.mubr.bf16.mxu1 %v10648_v20  ;;  %v9611_v4 = vpack.c.bf16 %v3213_v46, %v3212_v27  ;;  %v3150_v45 = vadd.f32 %v9125_v58, %v3079_v24  ;;  %v7587_v25 = vpop.f32.mrb[122].mxu1 }
 0x1e2   : > { %v3215_v35 = vmax.f32 %v3151_v23, 0.0  ;;  %v3082_v26 = vmax.f32 %v9471_v29, %v7587_v25  ;;  %v2962_v5 = vpop.f32.mrb[123].mxu1  ;;  %v7828_v29 = vld [vmem:[%s10449_s3 + $0x208] ss:$36 sps:$4 sm:$0xff]  }
 0x1e3   : > { %v3214_v57 = vmax.f32 %v3150_v45, 0.0  ;;  %v3081_v32 = vmax.f32 %v9477_v59, %v2962_v5  ;;  %v7830_v59 = vld [vmem:[%s10449_s3 + $0x20c] ss:$36 sps:$4 sm:$0xff]  }
 0x1e4   : > { %v3153_v54 = vadd.f32 %v9125_v58, %v3082_v26  ;;  %4318 = vmatprep.subr.bf16.mxu0 %v7830_v59 }
 0x1e5   : > { %v9617_v55 = vpack.c.bf16 %v3215_v35, %v3214_v57  ;;  %v3152_v40 = vadd.f32 %v9125_v58, %v3081_v32  ;;  %v7590_v42 = vpop.f32.mrb[124].mxu1  ;;  %4319 = vmatpush1.bf16.msra.mxu0 %v7828_v29 }
 0x1e6   : > { %v3217_v62 = vmax.f32 %v3153_v54, 0.0  ;;  %v3084_v43 = vmax.f32 %v9487_v61, %v7590_v42  ;;  %v2972_v13 = vpop.f32.mrb[125].mxu1  ;;  %v7834_v54 = vld [vmem:[%s10449_s3 + $0xf0] ss:$36 sps:$4 sm:$0xff]  }
 0x1e7   : > { %v3216_v15 = vmax.f32 %v3152_v40, 0.0  ;;  %v3083_v21 = vmax.f32 %v9493_v36, %v2972_v13  ;;  %3851 = vmatmul.mubr.bf16.gmra.mrb[168].mxu0 %v9409_v60 }
 0x1e8   : > { %4142 = vmatmul.mubr.bf16.gmra.mrb[184].mxu1 %v9409_v60  ;;  %v3155_v19 = vadd.f32 %v9125_v58, %v3084_v43  ;;  %3859 = vmatprep.mubr.bf16.mxu0 %v10648_v20 }
 0x1e9   : > { %4149 = vmatprep.mubr.bf16.mxu1 %v10648_v20  ;;  %v9633_v61 = vpack.c.bf16 %v3217_v62, %v3216_v15  ;;  %v3154_v36 = vadd.f32 %v9125_v58, %v3083_v21  ;;  %v7593_v30 = vpop.f32.mrb[126].mxu1 }
 0x1ea   : > { %v3219_v38 = vmax.f32 %v3155_v19, 0.0  ;;  %v3086_v41 = vmax.f32 %v9519_v7, %v7593_v30  ;;  %v2982_v12 = vpop.f32.mrb[127].mxu1  ;;  %v7831_v7 = vld [vmem:[%s10449_s3 + $0xa8] ss:$36 sps:$4 sm:$0xff]  }
 0x1eb   : > { %v3218_v33 = vmax.f32 %v3154_v36, 0.0  ;;  %v3085_v49 = vmax.f32 %v9525_v48, %v2982_v12  ;;  %4606 = vmatpush1.bf16.msra.mxu1 %v7831_v7 }
 0x1ec   : > { %v3157_v56 = vadd.f32 %v9125_v58, %v3086_v41 }
 0x1ed   : > { %v9642_v46 = vpack.c.bf16 %v3219_v38, %v3218_v33  ;;  %v3156_v50 = vadd.f32 %v9125_v58, %v3085_v49  ;;  %v7596_v3 = vpop.f32.mrb[128].mxu1 }
 0x1ee   : > { %v3221_v27 = vmax.f32 %v3157_v56, 0.0  ;;  %v3088_v24 = vmax.f32 %v9535_v53, %v7596_v3  ;;  %v2992_v23 = vpop.f32.mrb[129].mxu1  ;;  %v7840_v56 = vld [vmem:[%s10449_s3 + $0x180] ss:$36 sps:$4 sm:$0xff]  }
 0x1ef   : > { %v3220_v48 = vmax.f32 %v3156_v50, 0.0  ;;  %v3087_v45 = vmax.f32 %v9541_v37, %v2992_v23  ;;  %3860 = vmatmul.mubr.bf16.gmra.mrb[172].mxu0 %v9429_v34  ;;  %v7836_v37 = vld [vmem:[%s10449_s3 + $0xf4] ss:$36 sps:$4 sm:$0xff]   ;;  %v7843_v23 = vld [vmem:[%s10449_s3 + $0x1c8] ss:$36 sps:$4 sm:$0xff]  }
 0x1f0   : > { %4150 = vmatmul.mubr.bf16.gmra.mrb[188].mxu1 %v9429_v34  ;;  %v3159_v25 = vadd.f32 %v9125_v58, %v3088_v24  ;;  %3869 = vmatprep.mubr.bf16.mxu0 %v10648_v20 }
 0x1f1   : > { %4159 = vmatprep.mubr.bf16.mxu1 %v10648_v20  ;;  %v9655_v35 = vpack.c.bf16 %v3221_v27, %v3220_v48  ;;  %v3158_v26 = vadd.f32 %v9125_v58, %v3087_v45  ;;  %v7599_v53 = vpop.f32.mrb[130].mxu1  ;;  %4607 = vmatprep.subr.bf16.mxu1 %v7836_v37  ;;  %v7846_v45 = vld [vmem:[%s10449_s3 + $0x210] ss:$36 sps:$4 sm:$0xff]  }
 0x1f2   : > { %v3223_v5 = vmax.f32 %v3159_v25, 0.0  ;;  %v3090_v57 = vmax.f32 %v9555_v28, %v7599_v53  ;;  %v3002_v32 = vpop.f32.mrb[131].mxu1  ;;  %4608 = vmatpush1.bf16.msra.mxu1 %v7834_v54  ;;  %v7839_v28 = vld [vmem:[%s10449_s3 + $0x13c] ss:$36 sps:$4 sm:$0xff]  }
 0x1f3   : > { %v3222_v40 = vmax.f32 %v3158_v26, 0.0  ;;  %v3089_v42 = vmax.f32 %v9561_v0, %v3002_v32  ;;  %v7837_v0 = vld [vmem:[%s10449_s3 + $0x138] ss:$36 sps:$4 sm:$0xff]   ;;  %4609 = vmatprep.subr.bf16.mxu1 %v7839_v28  ;;  %v9721_v25 = vld [vmem:[%s10449_s3 + $0x20] ss:$36 sps:$4 sm:$0xff]  }
 0x1f4   : > { %v3161_v62 = vadd.f32 %v9125_v58, %v3090_v57  ;;  %7606 = vmatprep.subr.bf16.mxu0 %v9721_v25 }
 0x1f5   : > { %v9667_v43 = vpack.c.bf16 %v3223_v5, %v3222_v40  ;;  %v3160_v13 = vadd.f32 %v9125_v58, %v3089_v42  ;;  %v7602_v15 = vpop.f32.mrb[132].mxu1 }
 0x1f6   : > { %v3225_v21 = vmax.f32 %v3161_v62, 0.0  ;;  %v3092_v29 = vmax.f32 %v9571_v16, %v7602_v15  ;;  %v3012_v59 = vpop.f32.mrb[133].mxu1  ;;  %4610 = vmatpush1.bf16.msra.mxu1 %v7837_v0 }
 0x1f7   : > { %v3224_v19 = vmax.f32 %v3160_v13, 0.0  ;;  %v3091_v36 = vmax.f32 %v9577_v51, %v3012_v59  ;;  %3870 = vmatmul.mubr.bf16.gmra.mrb[176].mxu0 %v9445_v8  ;;  %v7842_v51 = vld [vmem:[%s10449_s3 + $0x184] ss:$36 sps:$4 sm:$0xff]  }
 0x1f8   : > { %4160 = vmatmul.mubr.bf16.gmra.mrb[192].mxu1 %v9445_v8  ;;  %v3163_v30 = vadd.f32 %v9125_v58, %v3092_v29  ;;  %3879 = vmatprep.mubr.bf16.mxu0 %v10648_v20 }
 0x1f9   : > { %4169 = vmatprep.mubr.bf16.mxu1 %v10648_v20  ;;  %v9683_v38 = vpack.c.bf16 %v3225_v21, %v3224_v19  ;;  %v3162_v16 = vadd.f32 %v9125_v58, %v3091_v36  ;;  %v7605_v41 = vpop.f32.mrb[134].mxu1  ;;  %4611 = vmatprep.subr.bf16.mxu1 %v7842_v51 }
 0x1fa   : > { %v3227_v12 = vmax.f32 %v3163_v30, 0.0  ;;  %v3094_v33 = vmax.f32 %v9591_v22, %v7605_v41  ;;  %v3022_v49 = vpop.f32.mrb[135].mxu1  ;;  %v7845_v22 = vld [vmem:[%s10449_s3 + $0x1cc] ss:$36 sps:$4 sm:$0xff]   ;;  %4612 = vmatpush1.bf16.msra.mxu1 %v7840_v56 }
 0x1fb   : > { %v3226_v11 = vmax.f32 %v3162_v16, 0.0  ;;  %v3093_v50 = vmax.f32 %v9597_v47, %v3022_v49  ;;  %4613 = vmatprep.subr.bf16.mxu1 %v7845_v22  ;;  %v7848_v47 = vld [vmem:[%s10449_s3 + $0x214] ss:$36 sps:$4 sm:$0xff]  }
 0x1fc   : > { %v3165_v3 = vadd.f32 %v9125_v58, %v3094_v33 }
 0x1fd   : > { %v9695_v7 = vpack.c.bf16 %v3227_v12, %v3226_v11  ;;  %v3164_v27 = vadd.f32 %v9125_v58, %v3093_v50 }
 0x1fe   : > { %v3229_v24 = vmax.f32 %v3165_v3, 0.0  ;;  %4614 = vmatpush1.bf16.msra.mxu1 %v7843_v23 }
 0x1ff   : > { %v3228_v48 = vmax.f32 %v3164_v27, 0.0  ;;  %3880 = vmatmul.mubr.bf16.gmra.mrb[180].mxu0 %v9465_v14  ;;  %4615 = vmatprep.subr.bf16.mxu1 %v7848_v47 }
 0x200   : > { %4170 = vmatmul.mubr.bf16.gmra.mrb[196].mxu1 %v9465_v14  ;;  %3886 = vmatprep.mubr.bf16.mxu0 %v10648_v20 }
 0x201   : > { %4177 = vmatprep.mubr.bf16.mxu1 %v10648_v20  ;;  %v9708_v58 = vpack.c.bf16 %v3229_v24, %v3228_v48 }
 0x202   : > { %4616 = vmatpush1.bf16.msra.mxu1 %v7846_v45 }
 0x207   : > { %3887 = vmatmul.mubr.bf16.gmra.mrb[184].mxu0 %v9481_v2 }
 0x208   : > { %4178 = vmatmul.mubr.bf16.gmra.mrb[200].mxu1 %v9481_v2  ;;  %3895 = vmatprep.mubr.bf16.mxu0 %v10648_v20 }
 0x209   : > { %4185 = vmatprep.mubr.bf16.mxu1 %v10648_v20 }
 0x20f   : > { %3896 = vmatmul.mubr.bf16.gmra.mrb[188].mxu0 %v9513_v17 }
 0x210   : > { %4186 = vmatmul.mubr.bf16.gmra.mrb[204].mxu1 %v9513_v17  ;;  %3905 = vmatprep.mubr.bf16.mxu0 %v10648_v20 }
 0x211   : > { %4195 = vmatprep.mubr.bf16.mxu1 %v10648_v20 }
 0x217   : > { %3906 = vmatmul.mubr.bf16.gmra.mrb[192].mxu0 %v9529_v44 }
 0x218   : > { %4196 = vmatmul.mubr.bf16.gmra.mrb[208].mxu1 %v9529_v44  ;;  %3915 = vmatprep.mubr.bf16.mxu0 %v10648_v20 }
 0x219   : > { %4205 = vmatprep.mubr.bf16.mxu1 %v10648_v20 }
 0x21f   : > { %3916 = vmatmul.mubr.bf16.gmra.mrb[196].mxu0 %v9549_v52 }
 0x220   : > { %4206 = vmatmul.mubr.bf16.gmra.mrb[212].mxu1 %v9549_v52  ;;  %3922 = vmatprep.mubr.bf16.mxu0 %v10648_v20 }
 0x221   : > { %4213 = vmatprep.mubr.bf16.mxu1 %v10648_v20 }
 0x227   : > { %3923 = vmatmul.mubr.bf16.gmra.mrb[200].mxu0 %v9565_v10 }
 0x228   : > { %4214 = vmatmul.mubr.bf16.gmra.mrb[216].mxu1 %v9565_v10  ;;  %3931 = vmatprep.mubr.bf16.mxu0 %v10648_v20 }
 0x229   : > { %4221 = vmatprep.mubr.bf16.mxu1 %v10648_v20 }
 0x22f   : > { %3932 = vmatmul.mubr.bf16.gmra.mrb[204].mxu0 %v9585_v9 }
 0x230   : > { %4222 = vmatmul.mubr.bf16.gmra.mrb[220].mxu1 %v9585_v9  ;;  %3941 = vmatprep.mubr.bf16.mxu0 %v10648_v20 }
 0x231   : > { %4231 = vmatprep.mubr.bf16.mxu1 %v10648_v20 }
 0x237   : > { %3942 = vmatmul.mubr.bf16.gmra.mrb[208].mxu0 %v9601_v63 }
 0x238   : > { %4232 = vmatmul.mubr.bf16.gmra.mrb[224].mxu1 %v9601_v63  ;;  %3951 = vmatprep.mubr.bf16.mxu0 %v10648_v20 }
 0x239   : > { %4241 = vmatprep.mubr.bf16.mxu1 %v10648_v20 }
 0x23f   : > { %3952 = vmatmul.mubr.bf16.gmra.mrb[212].mxu0 %v9611_v4 }
 0x240   : > { %4242 = vmatmul.mubr.bf16.gmra.mrb[228].mxu1 %v9611_v4  ;;  %3958 = vmatprep.mubr.bf16.mxu0 %v10648_v20 }
 0x241   : > { %4249 = vmatprep.mubr.bf16.mxu1 %v10648_v20 }
 0x247   : > { %3959 = vmatmul.mubr.bf16.gmra.mrb[216].mxu0 %v9617_v55 }
 0x248   : > { %4250 = vmatmul.mubr.bf16.gmra.mrb[232].mxu1 %v9617_v55  ;;  %3964 = vmatprep.mubr.bf16.mxu0 %v10648_v20 }
 0x249   : > { %4257 = vmatprep.mubr.bf16.mxu1 %v10648_v20 }
 0x24f   : > { %3965 = vmatmul.mubr.bf16.gmra.mrb[220].mxu0 %v9633_v61 }
 0x250   : > { %4258 = vmatmul.mubr.bf16.gmra.mrb[236].mxu1 %v9633_v61  ;;  %3970 = vmatprep.mubr.bf16.mxu0 %v10648_v20 }
 0x251   : > { %4265 = vmatprep.mubr.bf16.mxu1 %v10648_v20 }
 0x257   : > { %3971 = vmatmul.mubr.bf16.gmra.mrb[224].mxu0 %v9642_v46 }
 0x258   : > { %4266 = vmatmul.mubr.bf16.gmra.mrb[240].mxu1 %v9642_v46  ;;  %3976 = vmatprep.mubr.bf16.mxu0 %v10648_v20 }
 0x259   : > { %4273 = vmatprep.mubr.bf16.mxu1 %v10648_v20 }
 0x25a   : > { %v3744_v26 = vpop.f32.mrb[120].mxu0  ;;  %v4041_v53 = vpop.f32.mrb[136].mxu1 }
 0x25b   : > { %v3746_v37 = vpop.f32.mrb[121].mxu0  ;;  %v4042_v5 = vpop.f32.mrb[137].mxu1 }
 0x25c   : > { %v3747_v57 = vpop.f32.mrb[122].mxu0  ;;  %v4043_v32 = vpop.f32.mrb[138].mxu1 }
 0x25d   : > { %v3749_v54 = vpop.f32.mrb[123].mxu0  ;;  %v4044_v40 = vpop.f32.mrb[139].mxu1 }
 0x25e   : > { %v5160_v42 = vadd.f32 %v3749_v54, %v3744_v26 }
 0x25f   : > { %3977 = vmatmul.mubr.bf16.gmra.mrb[228].mxu0 %v9655_v35 }
 0x260   : > { %4274 = vmatmul.mubr.bf16.gmra.mrb[244].mxu1 %v9655_v35  ;;  %3982 = vmatprep.mubr.bf16.mxu0 %v10648_v20 }
 0x261   : > { %4279 = vmatprep.mubr.bf16.mxu1 %v10648_v20 }
 0x262   : > { %v3753_v62 = vpop.f32.mrb[124].mxu0 }
 0x263   : > { %v4047_v13 = vpop.f32.mrb[140].mxu1  ;;  %v3755_v15 = vpop.f32.mrb[125].mxu0 }
 0x264   : > { %v4049_v28 = vpop.f32.mrb[141].mxu1  ;;  %v5166_v21 = vadd.f32 %v5160_v42, %v4047_v13  ;;  %v5161_v29 = vadd.f32 %v3755_v15, %v3747_v57  ;;  %v3757_v59 = vpop.f32.mrb[126].mxu0 }
 0x265   : > { %v4050_v0 = vpop.f32.mrb[142].mxu1  ;;  %v3759_v19 = vpop.f32.mrb[127].mxu0 }
 0x266   : > { %v4052_v36 = vpop.f32.mrb[143].mxu1  ;;  %v5162_v30 = vadd.f32 %v3759_v19, %v3753_v62  ;;  %v5167_v16 = vadd.f32 %v5161_v29, %v4050_v0 }
 0x267   : > { %3983 = vmatmul.mubr.bf16.gmra.mrb[232].mxu0 %v9667_v43 }
 0x268   : > { %4280 = vmatmul.mubr.bf16.gmra.mrb[248].mxu1 %v9667_v43  ;;  %3988 = vmatprep.mubr.bf16.mxu0 %v10648_v20 }
 0x269   : > { %4285 = vmatprep.mubr.bf16.mxu1 %v10648_v20 }
 0x26a   : > { %v3763_v41 = vpop.f32.mrb[128].mxu0 }
 0x26b   : > { %v4055_v51 = vpop.f32.mrb[144].mxu1  ;;  %v3765_v12 = vpop.f32.mrb[129].mxu0 }
 0x26c   : > { %v4057_v33 = vpop.f32.mrb[145].mxu1  ;;  %v5168_v49 = vadd.f32 %v5162_v30, %v4055_v51  ;;  %v5163_v56 = vadd.f32 %v3765_v12, %v3757_v59  ;;  %v3767_v11 = vpop.f32.mrb[130].mxu0 }
 0x26d   : > { %v4058_v50 = vpop.f32.mrb[146].mxu1  ;;  %v3769_v3 = vpop.f32.mrb[131].mxu0 }
 0x26e   : > { %v4060_v27 = vpop.f32.mrb[147].mxu1  ;;  %v5164_v22 = vadd.f32 %v3769_v3, %v3763_v41  ;;  %v5169_v24 = vadd.f32 %v5163_v56, %v4058_v50 }
 0x26f   : > { %3989 = vmatmul.mubr.bf16.gmra.mrb[236].mxu0 %v9683_v38  ;;  %v7850_v27 = vld [vmem:[%s10449_s3 + $0x68] ss:$36 sps:$4 sm:$0xff]  }
 0x270   : > { %4286 = vmatmul.mubr.bf16.gmra.mrb[252].mxu1 %v9683_v38  ;;  %3994 = vmatprep.mubr.bf16.mxu0 %v10648_v20 }
 0x271   : > { %4291 = vmatprep.mubr.bf16.mxu1 %v10648_v20 }
 0x272   : > { %v3773_v23 = vpop.f32.mrb[132].mxu0 }
 0x273   : > { %v4063_v48 = vpop.f32.mrb[148].mxu1  ;;  %v3774_v47 = vpop.f32.mrb[133].mxu0 }
 0x274   : > { %v4065_v45 = vpop.f32.mrb[149].mxu1  ;;  %v5170_v26 = vadd.f32 %v5164_v22, %v4063_v48  ;;  %v5165_v53 = vadd.f32 %v3774_v47, %v3767_v11  ;;  %v3776_v37 = vpop.f32.mrb[134].mxu0  ;;  %v10761_v47 = vld [vmem:[#allocation9_spill] sm:$0xff] }
 0x275   : > { %v4066_v5 = vpop.f32.mrb[150].mxu1  ;;  %v3777_v57 = vpop.f32.mrb[135].mxu0 }
 0x276   : > { %v4068_v32 = vpop.f32.mrb[151].mxu1  ;;  %v5171_v54 = vadd.f32 %v5165_v53, %v4066_v5 }
 0x277   : > { %3995 = vmatmul.mubr.bf16.gmra.mrb[240].mxu0 %v9695_v7 }
 0x278   : > { %4292 = vmatmul.mubr.bf16.gmra.mrb[0].mxu1 %v9695_v7  ;;  %4000 = vmatprep.mubr.bf16.mxu0 %v10648_v20 }
 0x279   : > { %4297 = vmatprep.mubr.bf16.mxu1 %v10648_v20 }
 0x27a   : > { %v3780_v40 = vpop.f32.mrb[136].mxu0 }
 0x27b   : > { %v4071_v42 = vpop.f32.mrb[152].mxu1  ;;  %v3782_v62 = vpop.f32.mrb[137].mxu0 }
 0x27c   : > { %v4072_v13 = vpop.f32.mrb[153].mxu1  ;;  %v3783_v28 = vpop.f32.mrb[138].mxu0 }
 0x27d   : > { %v9782_v15 = vadd.f32 %v5166_v21, %v4072_v13  ;;  %v4074_v29 = vpop.f32.mrb[154].mxu1  ;;  %v3785_v59 = vpop.f32.mrb[139].mxu0 }
 0x27e   : > { %v4075_v0 = vpop.f32.mrb[155].mxu1  ;;  %v5208_v36 = vadd.f32 %v3785_v59, %v3780_v40  ;;  %v7852_v59 = vld [vmem:[%s10449_s3 + $0xf8] ss:$36 sps:$4 sm:$0xff]  }
 0x27f   : > { %v9784_v19 = vadd.f32 %v5167_v16, %v4075_v0  ;;  %4001 = vmatmul.mubr.bf16.gmra.mrb[244].mxu0 %v9708_v58  ;;  %v10762_v0 = vld [vmem:[#allocation17_spill] sm:$0xff] }
 0x280   : > { %4298 = vmatmul.mubr.bf16.gmra.mrb[4].mxu1 %v9708_v58  ;;  %4336 = vmatprep.mubr.bf16.mxu0 %v10648_v20 }
 0x281   : > { %4633 = vmatprep.mubr.bf16.mxu1 %v10648_v20 }
 0x282   : > { %v3789_v30 = vpop.f32.mrb[140].mxu0 }
 0x283   : > { %v4079_v41 = vpop.f32.mrb[156].mxu1  ;;  %v3791_v21 = vpop.f32.mrb[141].mxu0 }
 0x284   : > { %v9790_v51 = vadd.f32 %v5208_v36, %v4079_v41  ;;  %v4081_v12 = vpop.f32.mrb[157].mxu1  ;;  %v3793_v56 = vpop.f32.mrb[142].mxu0  ;;  %v5209_v11 = vadd.f32 %v3791_v21, %v3783_v28 }
 0x285   : > { %v9792_v33 = vadd.f32 %v5168_v49, %v4081_v12  ;;  %v4083_v16 = vpop.f32.mrb[158].mxu1  ;;  %v3795_v50 = vpop.f32.mrb[143].mxu0  ;;  %v7851_v49 = vld [vmem:[%s10449_s3 + $0xb0] ss:$36 sps:$4 sm:$0xff]  }
 0x286   : > { %v4085_v3 = vpop.f32.mrb[159].mxu1  ;;  %v5215_v22 = vadd.f32 %v5209_v11, %v4083_v16  ;;  %v5210_v48 = vadd.f32 %v3795_v50, %v3789_v30 }
 0x287   : > { %v9797_v23 = vadd.f32 %v5169_v24, %v4085_v3  ;;  %4337 = vmatmul.mubr.bf16.vlgmr.msra.gmra.mrb[248].mxu0 %v10761_v47 }
 0x288   : > { %4634 = vmatmul.mubr.bf16.vlgmr.msra.gmra.mrb[8].mxu1 %v10761_v47  ;;  %7607 = vmatpush3.bf16.msra.mxu0 %v9721_v25 }
 0x289   : > { %4342 = vmatprep.mubr.bf16.mxu0 %v10648_v20  ;;  %4639 = vmatprep.mubr.bf16.mxu1 %v10648_v20 }
 0x28a   : > { %7608 = vmatprep.subr.bf16.mxu0 %v7850_v27  ;;  %v3799_v45 = vpop.f32.mrb[144].mxu0 }
 0x28b   : > { %v4089_v53 = vpop.f32.mrb[160].mxu1  ;;  %v3801_v37 = vpop.f32.mrb[145].mxu0 }
 0x28c   : > { %v5216_v24 = vadd.f32 %v5210_v48, %v4089_v53  ;;  %v4091_v5 = vpop.f32.mrb[161].mxu1  ;;  %v3803_v32 = vpop.f32.mrb[146].mxu0  ;;  %v5211_v42 = vadd.f32 %v3801_v37, %v3793_v56  ;;  %7609 = vmatpush3.bf16.msra.mxu0 %v7850_v27  ;;  %v10763_v27 = vld [vmem:[#allocation10_spill] sm:$0xff] }
 0x28d   : > { %v9807_v57 = vadd.f32 %v5170_v26, %v4091_v5  ;;  %v4093_v40 = vpop.f32.mrb[162].mxu1  ;;  %v3805_v25 = vpop.f32.mrb[147].mxu0  ;;  %7610 = vmatprep.subr.bf16.mxu0 %v7851_v49 }
 0x28e   : > { %v4095_v62 = vpop.f32.mrb[163].mxu1  ;;  %v5217_v13 = vadd.f32 %v5211_v42, %v4093_v40  ;;  %v5212_v29 = vadd.f32 %v3805_v25, %v3799_v45 }
 0x28f   : > { %v9809_v28 = vadd.f32 %v5171_v54, %v4095_v62  ;;  %4343 = vmatmul.mubr.bf16.gmra.mrb[252].mxu0 %v10762_v0  ;;  %v7853_v54 = vld [vmem:[%s10449_s3 + $0x140] ss:$36 sps:$4 sm:$0xff]  }
 0x290   : > { %4640 = vmatmul.mubr.bf16.gmra.mrb[12].mxu1 %v10762_v0  ;;  %4348 = vmatprep.mubr.bf16.mxu0 %v10648_v20 }
 0x291   : > { %4645 = vmatprep.mubr.bf16.mxu1 %v10648_v20  ;;  %7611 = vmatpush3.bf16.msra.mxu0 %v7851_v49 }
 0x292   : > { %v3809_v26 = vpop.f32.mrb[148].mxu0  ;;  %7612 = vmatprep.subr.bf16.mxu0 %v7852_v59 }
 0x293   : > { %v4099_v36 = vpop.f32.mrb[164].mxu1  ;;  %v3810_v41 = vpop.f32.mrb[149].mxu0 }
 0x294   : > { %v5218_v30 = vadd.f32 %v5212_v29, %v4099_v36  ;;  %v4101_v21 = vpop.f32.mrb[165].mxu1  ;;  %v3812_v12 = vpop.f32.mrb[150].mxu0  ;;  %v5213_v16 = vadd.f32 %v3810_v41, %v3803_v32  ;;  %v10764_v29 = vld [vmem:[#allocation19_spill] sm:$0xff] }
 0x295   : > { %v4102_v56 = vpop.f32.mrb[166].mxu1  ;;  %v3813_v11 = vpop.f32.mrb[151].mxu0  ;;  %7613 = vmatpush3.bf16.msra.mxu0 %v7852_v59 }
 0x296   : > { %v4104_v50 = vpop.f32.mrb[167].mxu1  ;;  %v5219_v3 = vadd.f32 %v5213_v16, %v4102_v56  ;;  %7614 = vmatprep.subr.bf16.mxu0 %v7853_v54 }
 0x297   : > { %4349 = vmatmul.mubr.bf16.gmra.mrb[0].mxu0 %v10763_v27 }
 0x298   : > { %4646 = vmatmul.mubr.bf16.gmra.mrb[16].mxu1 %v10763_v27  ;;  %4354 = vmatprep.mubr.bf16.mxu0 %v10648_v20 }
 0x299   : > { %4651 = vmatprep.mubr.bf16.mxu1 %v10648_v20  ;;  %7615 = vmatpush3.bf16.msra.mxu0 %v7853_v54 }
 0x29a   : > { %v3816_v48 = vpop.f32.mrb[152].mxu0 }
 0x29b   : > { %v4107_v49 = vpop.f32.mrb[168].mxu1  ;;  %v3818_v45 = vpop.f32.mrb[153].mxu0 }
 0x29c   : > { %v4108_v53 = vpop.f32.mrb[169].mxu1  ;;  %v3819_v5 = vpop.f32.mrb[154].mxu0  ;;  %v10765_v49 = vld [vmem:[#allocation11_spill] sm:$0xff] }
 0x29d   : > { %v9826_v37 = vadd.f32 %v9790_v51, %v4108_v53  ;;  %v4110_v32 = vpop.f32.mrb[170].mxu1  ;;  %v3821_v40 = vpop.f32.mrb[155].mxu0  ;;  %v7854_v45 = vld [vmem:[%s10449_s3 + $0x188] ss:$36 sps:$4 sm:$0xff]  }
 0x29e   : > { %v4111_v42 = vpop.f32.mrb[171].mxu1  ;;  %v5277_v62 = vadd.f32 %v3821_v40, %v3816_v48  ;;  %7616 = vmatprep.subr.bf16.mxu0 %v7854_v45 }
 0x29f   : > { %v9828_v25 = vadd.f32 %v5215_v22, %v4111_v42  ;;  %4355 = vmatmul.mubr.bf16.gmra.mrb[4].mxu0 %v10764_v29 }
 0x2a0   : > { %4652 = vmatmul.mubr.bf16.gmra.mrb[20].mxu1 %v10764_v29  ;;  %4360 = vmatprep.mubr.bf16.mxu0 %v10648_v20 }
 0x2a1   : > { %4657 = vmatprep.mubr.bf16.mxu1 %v10648_v20  ;;  %7617 = vmatpush3.bf16.msra.mxu0 %v7854_v45 }
 0x2a2   : > { %v3825_v59 = vpop.f32.mrb[156].mxu0 }
 0x2a3   : > { %v4115_v26 = vpop.f32.mrb[172].mxu1  ;;  %v3827_v51 = vpop.f32.mrb[157].mxu0 }
 0x2a4   : > { %v5283_v36 = vadd.f32 %v5277_v62, %v4115_v26  ;;  %v4117_v54 = vpop.f32.mrb[173].mxu1  ;;  %v3829_v21 = vpop.f32.mrb[158].mxu0  ;;  %v5278_v22 = vadd.f32 %v3827_v51, %v3819_v5 }
 0x2a5   : > { %v9834_v41 = vadd.f32 %v5216_v24, %v4117_v54  ;;  %v4119_v12 = vpop.f32.mrb[174].mxu1  ;;  %v3831_v56 = vpop.f32.mrb[159].mxu0 }
 0x2a6   : > { %v4121_v16 = vpop.f32.mrb[175].mxu1  ;;  %v5284_v11 = vadd.f32 %v5278_v22, %v4119_v12  ;;  %v5279_v48 = vadd.f32 %v3831_v56, %v3825_v59  ;;  %v10768_v56 = vld [vmem:[#allocation21_spill] sm:$0xff] }
 0x2a7   : > { %v9836_v50 = vadd.f32 %v5217_v13, %v4121_v16  ;;  %4361 = vmatmul.mubr.bf16.gmra.mrb[8].mxu0 %v10765_v49 }
 0x2a8   : > { %4658 = vmatmul.mubr.bf16.gmra.mrb[24].mxu1 %v10765_v49  ;;  %4367 = vmatprep.mubr.bf16.mxu0 %v10648_v20 }
 0x2a9   : > { %4663 = vmatprep.mubr.bf16.mxu1 %v10648_v20 }
 0x2aa   : > { %v3835_v24 = vpop.f32.mrb[160].mxu0 }
 0x2ab   : > { %v4125_v53 = vpop.f32.mrb[176].mxu1  ;;  %v3837_v13 = vpop.f32.mrb[161].mxu0 }
 0x2ac   : > { %v5285_v5 = vadd.f32 %v5279_v48, %v4125_v53  ;;  %v4127_v32 = vpop.f32.mrb[177].mxu1  ;;  %v3839_v42 = vpop.f32.mrb[162].mxu0  ;;  %v5280_v59 = vadd.f32 %v3837_v13, %v3829_v21 }
 0x2ad   : > { %v9845_v40 = vadd.f32 %v5218_v30, %v4127_v32  ;;  %v4129_v62 = vpop.f32.mrb[178].mxu1  ;;  %v3841_v26 = vpop.f32.mrb[163].mxu0 }
 0x2ae   : > { %v4131_v51 = vpop.f32.mrb[179].mxu1  ;;  %v5286_v54 = vadd.f32 %v5280_v59, %v4129_v62  ;;  %v5281_v22 = vadd.f32 %v3841_v26, %v3835_v24  ;;  %v10769_v24 = vld [vmem:[#allocation12_spill] sm:$0xff] }
 0x2af   : > { %10766 = vst [vmem:[#allocation23_spill] sm:$0xff] %v9845_v40  ;;  %v9847_v12 = vadd.f32 %v5219_v3, %v4131_v51  ;;  %4368 = vmatmul.mubr.bf16.gmra.mrb[12].mxu0 %v10768_v56 }
 0x2b0   : > { %4664 = vmatmul.mubr.bf16.gmra.mrb[28].mxu1 %v10768_v56  ;;  %4377 = vmatprep.mubr.bf16.mxu0 %v10648_v20 }
 0x2b1   : > { %10767 = vst [vmem:[#allocation13_spill] sm:$0xff] %v9847_v12  ;;  %4669 = vmatprep.mubr.bf16.mxu1 %v10648_v20 }
 0x2b2   : > { %v3845_v16 = vpop.f32.mrb[164].mxu0 }
 0x2b3   : > { %v4135_v30 = vpop.f32.mrb[180].mxu1  ;;  %v3846_v45 = vpop.f32.mrb[165].mxu0 }
 0x2b4   : > { %v5287_v48 = vadd.f32 %v5281_v22, %v4135_v30  ;;  %v4137_v53 = vpop.f32.mrb[181].mxu1  ;;  %v3848_v21 = vpop.f32.mrb[166].mxu0  ;;  %v5282_v32 = vadd.f32 %v3846_v45, %v3839_v42 }
 0x2b5   : > { %v4138_v13 = vpop.f32.mrb[182].mxu1  ;;  %v3849_v62 = vpop.f32.mrb[167].mxu0 }
 0x2b6   : > { %v4140_v3 = vpop.f32.mrb[183].mxu1  ;;  %v5288_v59 = vadd.f32 %v5282_v32, %v4138_v13 }
 0x2b7   : > { %4378 = vmatmul.mubr.bf16.gmra.mrb[16].mxu0 %v10769_v24 }
 0x2b8   : > { %4670 = vmatmul.mubr.bf16.gmra.mrb[32].mxu1 %v10769_v24  ;;  %4387 = vmatprep.mubr.bf16.mxu0 %v10648_v20 }
 0x2b9   : > { %4675 = vmatprep.mubr.bf16.mxu1 %v10648_v20 }
 0x2ba   : > { %v3852_v26 = vpop.f32.mrb[168].mxu0 }
 0x2bb   : > { %v4143_v51 = vpop.f32.mrb[184].mxu1  ;;  %v3854_v16 = vpop.f32.mrb[169].mxu0 }
 0x2bc   : > { %v4144_v22 = vpop.f32.mrb[185].mxu1  ;;  %v3855_v53 = vpop.f32.mrb[170].mxu0 }
 0x2bd   : > { %v9857_v30 = vadd.f32 %v5283_v36, %v4144_v22  ;;  %v4146_v21 = vpop.f32.mrb[186].mxu1  ;;  %v3857_v42 = vpop.f32.mrb[171].mxu0 }
 0x2be   : > { %v4147_v45 = vpop.f32.mrb[187].mxu1  ;;  %v5325_v13 = vadd.f32 %v3857_v42, %v3852_v26 }
 0x2bf   : > { %10770 = vst [vmem:[#allocation25_spill] sm:$0xff] %v9857_v30  ;;  %v9859_v62 = vadd.f32 %v5284_v11, %v4147_v45  ;;  %4388 = vmatmul.mubr.bf16.gmra.mrb[20].mxu0 %v9309_v31 }
 0x2c0   : > { %4676 = vmatmul.mubr.bf16.gmra.mrb[36].mxu1 %v9309_v31  ;;  %4396 = vmatprep.mubr.bf16.mxu0 %v10648_v20 }
 0x2c1   : > { %10771 = vst [vmem:[#allocation14_spill] sm:$0xff] %v9859_v62  ;;  %4681 = vmatprep.mubr.bf16.mxu1 %v10648_v20 }
 0x2c2   : > { %v3861_v32 = vpop.f32.mrb[172].mxu0 }
 0x2c3   : > { %v4151_v3 = vpop.f32.mrb[188].mxu1  ;;  %v3863_v36 = vpop.f32.mrb[173].mxu0 }
 0x2c4   : > { %v5331_v51 = vadd.f32 %v5325_v13, %v4151_v3  ;;  %v4153_v16 = vpop.f32.mrb[189].mxu1  ;;  %v3865_v21 = vpop.f32.mrb[174].mxu0  ;;  %v5326_v11 = vadd.f32 %v3863_v36, %v3855_v53  ;;  %v7855_v13 = vld [vmem:[%s10449_s3 + $0x1d0] ss:$36 sps:$4 sm:$0xff]  }
 0x2c5   : > { %v9865_v22 = vadd.f32 %v5285_v5, %v4153_v16  ;;  %v4155_v30 = vpop.f32.mrb[190].mxu1  ;;  %v3867_v45 = vpop.f32.mrb[175].mxu0  ;;  %7618 = vmatprep.subr.bf16.mxu0 %v7855_v13 }
 0x2c6   : > { %v4157_v26 = vpop.f32.mrb[191].mxu1  ;;  %v5332_v42 = vadd.f32 %v5326_v11, %v4155_v30  ;;  %v5327_v12 = vadd.f32 %v3867_v45, %v3861_v32  ;;  %7619 = vmatpush3.bf16.msra.mxu0 %v7855_v13 }
 0x2c7   : > { %10772 = vst [vmem:[#allocation27_spill] sm:$0xff] %v9865_v22  ;;  %v9867_v62 = vadd.f32 %v5286_v54, %v4157_v26  ;;  %4397 = vmatmul.mubr.bf16.gmra.mrb[24].mxu0 %v9325_v1 }
 0x2c8   : > { %4682 = vmatmul.mubr.bf16.gmra.mrb[40].mxu1 %v9325_v1  ;;  %4403 = vmatprep.mubr.bf16.mxu0 %v10648_v20 }
 0x2c9   : > { %10773 = vst [vmem:[#allocation15_spill] sm:$0xff] %v9867_v62  ;;  %4690 = vmatprep.mubr.bf16.mxu1 %v10648_v20 }
 0x2ca   : > { %v3871_v5 = vpop.f32.mrb[176].mxu0 }
 0x2cb   : > { %v4161_v53 = vpop.f32.mrb[192].mxu1  ;;  %v3873_v54 = vpop.f32.mrb[177].mxu0 }
 0x2cc   : > { %v5333_v30 = vadd.f32 %v5327_v12, %v4161_v53  ;;  %v4163_v3 = vpop.f32.mrb[193].mxu1  ;;  %v3875_v36 = vpop.f32.mrb[178].mxu0  ;;  %v5328_v11 = vadd.f32 %v3873_v54, %v3865_v21 }
 0x2cd   : > { %v9876_v32 = vadd.f32 %v5287_v48, %v4163_v3  ;;  %v4165_v16 = vpop.f32.mrb[194].mxu1  ;;  %v3877_v45 = vpop.f32.mrb[179].mxu0 }
 0x2ce   : > { %v4167_v26 = vpop.f32.mrb[195].mxu1  ;;  %v5334_v62 = vadd.f32 %v5328_v11, %v4165_v16  ;;  %v5329_v40 = vadd.f32 %v3877_v45, %v3871_v5 }
 0x2cf   : > { %10774 = vst [vmem:[#allocation29_spill] sm:$0xff] %v9876_v32  ;;  %v9878_v22 = vadd.f32 %v5288_v59, %v4167_v26  ;;  %4404 = vmatmul.mubr.bf16.gmra.mrb[28].mxu0 %v9357_v39 }
 0x2d0   : > { %4691 = vmatmul.mubr.bf16.gmra.mrb[44].mxu1 %v9357_v39  ;;  %4413 = vmatprep.mubr.bf16.mxu0 %v10648_v20 }
 0x2d1   : > { %10775 = vst [vmem:[#allocation16_spill] sm:$0xff] %v9878_v22  ;;  %4700 = vmatprep.mubr.bf16.mxu1 %v10648_v20 }
 0x2d2   : > { %v3881_v12 = vpop.f32.mrb[180].mxu0 }
 0x2d3   : > { %v4171_v48 = vpop.f32.mrb[196].mxu1  ;;  %v3882_v53 = vpop.f32.mrb[181].mxu0 }
 0x2d4   : > { %v5335_v13 = vadd.f32 %v5329_v40, %v4171_v48  ;;  %v4173_v3 = vpop.f32.mrb[197].mxu1  ;;  %v3884_v21 = vpop.f32.mrb[182].mxu0  ;;  %v5330_v32 = vadd.f32 %v3882_v53, %v3875_v36 }
 0x2d5   : > { %v4174_v54 = vpop.f32.mrb[198].mxu1  ;;  %v3885_v16 = vpop.f32.mrb[183].mxu0 }
 0x2d6   : > { %v4176_v59 = vpop.f32.mrb[199].mxu1  ;;  %v5336_v11 = vadd.f32 %v5330_v32, %v4174_v54 }
 0x2d7   : > { %4414 = vmatmul.mubr.bf16.gmra.mrb[32].mxu0 %v9373_v6 }
 0x2d8   : > { %4701 = vmatmul.mubr.bf16.gmra.mrb[48].mxu1 %v9373_v6  ;;  %4423 = vmatprep.mubr.bf16.mxu0 %v10648_v20 }
 0x2d9   : > { %4710 = vmatprep.mubr.bf16.mxu1 %v10648_v20 }
 0x2da   : > { %v3888_v5 = vpop.f32.mrb[184].mxu0 }
 0x2db   : > { %v4179_v45 = vpop.f32.mrb[200].mxu1  ;;  %v3890_v26 = vpop.f32.mrb[185].mxu0 }
 0x2dc   : > { %v4180_v40 = vpop.f32.mrb[201].mxu1  ;;  %v3891_v48 = vpop.f32.mrb[186].mxu0 }
 0x2dd   : > { %v9888_v12 = vadd.f32 %v5331_v51, %v4180_v40  ;;  %v4182_v3 = vpop.f32.mrb[202].mxu1  ;;  %v3893_v36 = vpop.f32.mrb[187].mxu0 }
 0x2de   : > { %v4183_v53 = vpop.f32.mrb[203].mxu1  ;;  %v5388_v32 = vadd.f32 %v3893_v36, %v3888_v5 }
 0x2df   : > { %10776 = vst [vmem:[#allocation31_spill] sm:$0xff] %v9888_v12  ;;  %v9890_v21 = vadd.f32 %v5332_v42, %v4183_v53  ;;  %4424 = vmatmul.mubr.bf16.gmra.mrb[36].mxu0 %v9393_v18 }
 0x2e0   : > { %4711 = vmatmul.mubr.bf16.gmra.mrb[52].mxu1 %v9393_v18  ;;  %4432 = vmatprep.mubr.bf16.mxu0 %v10648_v20 }
 0x2e1   : > { %10777 = vst [vmem:[#allocation18_spill] sm:$0xff] %v9890_v21  ;;  %4717 = vmatprep.mubr.bf16.mxu1 %v10648_v20 }
 0x2e2   : > { %v3897_v54 = vpop.f32.mrb[188].mxu0 }
 0x2e3   : > { %v4187_v16 = vpop.f32.mrb[204].mxu1  ;;  %v3899_v51 = vpop.f32.mrb[189].mxu0 }
 0x2e4   : > { %v5394_v59 = vadd.f32 %v5388_v32, %v4187_v16  ;;  %v4189_v45 = vpop.f32.mrb[205].mxu1  ;;  %v5389_v26 = vadd.f32 %v3899_v51, %v3891_v48  ;;  %v3901_v3 = vpop.f32.mrb[190].mxu0  ;;  %v7856_v32 = vld [vmem:[%s10449_s3 + $0x218] ss:$36 sps:$4 sm:$0xff]  }
 0x2e5   : > { %v9896_v40 = vadd.f32 %v5333_v30, %v4189_v45  ;;  %v4191_v42 = vpop.f32.mrb[206].mxu1  ;;  %v3903_v53 = vpop.f32.mrb[191].mxu0  ;;  %7620 = vmatprep.subr.bf16.mxu0 %v7856_v32 }
 0x2e6   : > { %v4193_v5 = vpop.f32.mrb[207].mxu1  ;;  %v5395_v36 = vadd.f32 %v5389_v26, %v4191_v42  ;;  %v5390_v21 = vadd.f32 %v3903_v53, %v3897_v54  ;;  %7621 = vmatpush3.bf16.msra.mxu0 %v7856_v32 }
 0x2e7   : > { %10778 = vst [vmem:[#allocation33_spill] sm:$0xff] %v9896_v40  ;;  %v9898_v12 = vadd.f32 %v5334_v62, %v4193_v5  ;;  %4433 = vmatmul.mubr.bf16.gmra.mrb[40].mxu0 %v9409_v60 }
 0x2e8   : > { %4718 = vmatmul.mubr.bf16.gmra.mrb[56].mxu1 %v9409_v60  ;;  %4439 = vmatprep.mubr.bf16.mxu0 %v10648_v20 }
 0x2e9   : > { %10779 = vst [vmem:[#allocation20_spill] sm:$0xff] %v9898_v12  ;;  %4726 = vmatprep.mubr.bf16.mxu1 %v10648_v20 }
 0x2ea   : > { %v3907_v30 = vpop.f32.mrb[192].mxu0 }
 0x2eb   : > { %v4197_v48 = vpop.f32.mrb[208].mxu1  ;;  %v3909_v54 = vpop.f32.mrb[193].mxu0 }
 0x2ec   : > { %v5396_v16 = vadd.f32 %v5390_v21, %v4197_v48  ;;  %v4199_v62 = vpop.f32.mrb[209].mxu1  ;;  %v5391_v51 = vadd.f32 %v3909_v54, %v3901_v3  ;;  %v3911_v26 = vpop.f32.mrb[194].mxu0 }
 0x2ed   : > { %v9907_v45 = vadd.f32 %v5335_v13, %v4199_v62  ;;  %v4201_v42 = vpop.f32.mrb[210].mxu1  ;;  %v3913_v53 = vpop.f32.mrb[195].mxu0 }
 0x2ee   : > { %v4203_v5 = vpop.f32.mrb[211].mxu1  ;;  %v5397_v12 = vadd.f32 %v5391_v51, %v4201_v42  ;;  %v5392_v40 = vadd.f32 %v3913_v53, %v3907_v30 }
 0x2ef   : > { %10780 = vst [vmem:[#allocation35_spill] sm:$0xff] %v9907_v45  ;;  %v9909_v22 = vadd.f32 %v5336_v11, %v4203_v5  ;;  %4440 = vmatmul.mubr.bf16.gmra.mrb[44].mxu0 %v9429_v34 }
 0x2f0   : > { %4727 = vmatmul.mubr.bf16.gmra.mrb[60].mxu1 %v9429_v34  ;;  %4449 = vmatprep.mubr.bf16.mxu0 %v10648_v20 }
 0x2f1   : > { %10781 = vst [vmem:[#allocation22_spill] sm:$0xff] %v9909_v22  ;;  %4736 = vmatprep.mubr.bf16.mxu1 %v10648_v20 }
 0x2f2   : > { %v3917_v21 = vpop.f32.mrb[196].mxu0 }
 0x2f3   : > { %v4207_v3 = vpop.f32.mrb[212].mxu1  ;;  %v3918_v32 = vpop.f32.mrb[197].mxu0 }
 0x2f4   : > { %v5398_v13 = vadd.f32 %v5392_v40, %v4207_v3  ;;  %v4209_v48 = vpop.f32.mrb[213].mxu1  ;;  %v5393_v54 = vadd.f32 %v3918_v32, %v3911_v26  ;;  %v3920_v62 = vpop.f32.mrb[198].mxu0 }
 0x2f5   : > { %v4210_v45 = vpop.f32.mrb[214].mxu1  ;;  %v3921_v51 = vpop.f32.mrb[199].mxu0 }
 0x2f6   : > { %v4212_v30 = vpop.f32.mrb[215].mxu1  ;;  %v5399_v11 = vadd.f32 %v5393_v54, %v4210_v45 }
 0x2f7   : > { %4450 = vmatmul.mubr.bf16.gmra.mrb[48].mxu0 %v9445_v8 }
 0x2f8   : > { %4737 = vmatmul.mubr.bf16.gmra.mrb[64].mxu1 %v9445_v8  ;;  %4459 = vmatprep.mubr.bf16.mxu0 %v10648_v20 }
 0x2f9   : > { %4746 = vmatprep.mubr.bf16.mxu1 %v10648_v20 }
 0x2fa   : > { %v3924_v42 = vpop.f32.mrb[200].mxu0 }
 0x2fb   : > { %v4215_v53 = vpop.f32.mrb[216].mxu1  ;;  %v3926_v5 = vpop.f32.mrb[201].mxu0 }
 0x2fc   : > { %v4216_v40 = vpop.f32.mrb[217].mxu1  ;;  %v3927_v26 = vpop.f32.mrb[202].mxu0 }
 0x2fd   : > { %v9919_v21 = vadd.f32 %v5394_v59, %v4216_v40  ;;  %v4218_v3 = vpop.f32.mrb[218].mxu1  ;;  %v3929_v32 = vpop.f32.mrb[203].mxu0 }
 0x2fe   : > { %v4219_v48 = vpop.f32.mrb[219].mxu1  ;;  %v5436_v62 = vadd.f32 %v3929_v32, %v3924_v42 }
 0x2ff   : > { %10782 = vst [vmem:[#allocation37_spill] sm:$0xff] %v9919_v21  ;;  %v9921_v45 = vadd.f32 %v5395_v36, %v4219_v48  ;;  %4460 = vmatmul.mubr.bf16.gmra.mrb[52].mxu0 %v9465_v14 }
 0x300   : > { %4747 = vmatmul.mubr.bf16.gmra.mrb[68].mxu1 %v9465_v14  ;;  %4468 = vmatprep.mubr.bf16.mxu0 %v10648_v20 }
 0x301   : > { %10783 = vst [vmem:[#allocation24_spill] sm:$0xff] %v9921_v45  ;;  %4753 = vmatprep.mubr.bf16.mxu1 %v10648_v20 }
 0x302   : > { %v3933_v54 = vpop.f32.mrb[204].mxu0 }
 0x303   : > { %v4223_v51 = vpop.f32.mrb[220].mxu1  ;;  %v3935_v59 = vpop.f32.mrb[205].mxu0 }
 0x304   : > { %v5442_v30 = vadd.f32 %v5436_v62, %v4223_v51  ;;  %v4225_v53 = vpop.f32.mrb[221].mxu1  ;;  %v5437_v5 = vadd.f32 %v3935_v59, %v3927_v26  ;;  %v3937_v3 = vpop.f32.mrb[206].mxu0 }
 0x305   : > { %v9927_v40 = vadd.f32 %v5396_v16, %v4225_v53  ;;  %v4227_v42 = vpop.f32.mrb[222].mxu1  ;;  %v3939_v36 = vpop.f32.mrb[207].mxu0 }
 0x306   : > { %v4229_v32 = vpop.f32.mrb[223].mxu1  ;;  %v5443_v48 = vadd.f32 %v5437_v5, %v4227_v42  ;;  %v5438_v45 = vadd.f32 %v3939_v36, %v3933_v54 }
 0x307   : > { %10784 = vst [vmem:[#allocation39_spill] sm:$0xff] %v9927_v40  ;;  %v9929_v21 = vadd.f32 %v5397_v12, %v4229_v32  ;;  %4469 = vmatmul.mubr.bf16.gmra.mrb[56].mxu0 %v9481_v2 }
 0x308   : > { %4754 = vmatmul.mubr.bf16.gmra.mrb[72].mxu1 %v9481_v2  ;;  %4475 = vmatprep.mubr.bf16.mxu0 %v10648_v20 }
 0x309   : > { %10785 = vst [vmem:[#allocation26_spill] sm:$0xff] %v9929_v21  ;;  %4762 = vmatprep.mubr.bf16.mxu1 %v10648_v20 }
 0x30a   : > { %v3943_v62 = vpop.f32.mrb[208].mxu0 }
 0x30b   : > { %v4233_v26 = vpop.f32.mrb[224].mxu1  ;;  %v3945_v51 = vpop.f32.mrb[209].mxu0 }
 0x30c   : > { %v5444_v16 = vadd.f32 %v5438_v45, %v4233_v26  ;;  %v4235_v59 = vpop.f32.mrb[225].mxu1  ;;  %v5439_v53 = vadd.f32 %v3945_v51, %v3937_v3  ;;  %v3947_v5 = vpop.f32.mrb[210].mxu0 }
 0x30d   : > { %v9935_v40 = vadd.f32 %v5398_v13, %v4235_v59  ;;  %v4237_v54 = vpop.f32.mrb[226].mxu1  ;;  %v3949_v12 = vpop.f32.mrb[211].mxu0 }
 0x30e   : > { %v4239_v42 = vpop.f32.mrb[227].mxu1  ;;  %v5445_v36 = vadd.f32 %v5439_v53, %v4237_v54  ;;  %v5440_v32 = vadd.f32 %v3949_v12, %v3943_v62 }
 0x30f   : > { %10786 = vst [vmem:[#allocation41_spill] sm:$0xff] %v9935_v40  ;;  %v9937_v21 = vadd.f32 %v5399_v11, %v4239_v42  ;;  %4476 = vmatmul.mubr.bf16.gmra.mrb[60].mxu0 %v9513_v17 }
 0x310   : > { %4763 = vmatmul.mubr.bf16.gmra.mrb[76].mxu1 %v9513_v17  ;;  %4485 = vmatprep.mubr.bf16.mxu0 %v10648_v20 }
 0x311   : > { %4772 = vmatprep.mubr.bf16.mxu1 %v10648_v20 }
 0x312   : > { %v3953_v45 = vpop.f32.mrb[212].mxu0 }
 0x313   : > { %v4243_v3 = vpop.f32.mrb[228].mxu1  ;;  %v3954_v26 = vpop.f32.mrb[213].mxu0 }
 0x314   : > { %v5446_v13 = vadd.f32 %v5440_v32, %v4243_v3  ;;  %v4245_v51 = vpop.f32.mrb[229].mxu1  ;;  %v5441_v59 = vadd.f32 %v3954_v26, %v3947_v5  ;;  %v3956_v40 = vpop.f32.mrb[214].mxu0 }
 0x315   : > { %v4246_v22 = vpop.f32.mrb[230].mxu1  ;;  %v3957_v53 = vpop.f32.mrb[215].mxu0 }
 0x316   : > { %v4248_v62 = vpop.f32.mrb[231].mxu1  ;;  %v5447_v11 = vadd.f32 %v5441_v59, %v4246_v22 }
 0x317   : > { %4486 = vmatmul.mubr.bf16.gmra.mrb[64].mxu0 %v9529_v44 }
 0x318   : > { %4773 = vmatmul.mubr.bf16.gmra.mrb[80].mxu1 %v9529_v44  ;;  %4495 = vmatprep.mubr.bf16.mxu0 %v10648_v20 }
 0x319   : > { %4782 = vmatprep.mubr.bf16.mxu1 %v10648_v20 }
 0x31a   : > { %v3960_v54 = vpop.f32.mrb[216].mxu0 }
 0x31b   : > { %v4251_v12 = vpop.f32.mrb[232].mxu1  ;;  %v3961_v42 = vpop.f32.mrb[217].mxu0 }
 0x31c   : > { %v4252_v32 = vpop.f32.mrb[233].mxu1  ;;  %v3962_v5 = vpop.f32.mrb[218].mxu0 }
 0x31d   : > { %v9947_v45 = vadd.f32 %v5442_v30, %v4252_v32  ;;  %v4254_v40 = vpop.f32.mrb[234].mxu1  ;;  %v3963_v3 = vpop.f32.mrb[219].mxu0  ;;  %v7858_v5 = vld [vmem:[%s10451_s5] sm:$0xff]  }
 0x31e   : > { %v4255_v26 = vpop.f32.mrb[235].mxu1 }
 0x31f   : > { %v9949_v51 = vadd.f32 %v5443_v48, %v4255_v26  ;;  %4496 = vmatmul.mubr.bf16.gmra.mrb[68].mxu0 %v9549_v52  ;;  %v7857_v48 = vld [vmem:[%s10451_s5 + $0x40] sm:$0xff]  }
 0x320   : > { %4783 = vmatmul.mubr.bf16.gmra.mrb[84].mxu1 %v9549_v52  ;;  %4504 = vmatprep.mubr.bf16.mxu0 %v10648_v20 }
 0x321   : > { %4789 = vmatprep.mubr.bf16.mxu1 %v10648_v20  ;;  %7093 = vmatprep.subr.bf16.mxu1 %v7857_v48 }
 0x322   : > { %v3966_v22 = vpop.f32.mrb[220].mxu0  ;;  %7094 = vmatpush3.bf16.msra.mxu1 %v7858_v5 }
 0x323   : > { %v4259_v59 = vpop.f32.mrb[236].mxu1  ;;  %v3967_v53 = vpop.f32.mrb[221].mxu0 }
 0x324   : > { %v4260_v62 = vpop.f32.mrb[237].mxu1  ;;  %v3968_v54 = vpop.f32.mrb[222].mxu0 }
 0x325   : > { %v9955_v30 = vadd.f32 %v5444_v16, %v4260_v62  ;;  %v4262_v12 = vpop.f32.mrb[238].mxu1  ;;  %v3969_v42 = vpop.f32.mrb[223].mxu0 }
 0x326   : > { %v4263_v32 = vpop.f32.mrb[239].mxu1 }
 0x327   : > { %v9963_v40 = vadd.f32 %v5445_v36, %v4263_v32  ;;  %4505 = vmatmul.mubr.bf16.gmra.mrb[72].mxu0 %v9565_v10 }
 0x328   : > { %4790 = vmatmul.mubr.bf16.gmra.mrb[88].mxu1 %v9565_v10  ;;  %4511 = vmatprep.mubr.bf16.mxu0 %v10648_v20 }
 0x329   : > { %4798 = vmatprep.mubr.bf16.mxu1 %v10648_v20 }
 0x32a   : > { %v3972_v16 = vpop.f32.mrb[224].mxu0 }
 0x32b   : > { %v4267_v3 = vpop.f32.mrb[240].mxu1  ;;  %v3973_v26 = vpop.f32.mrb[225].mxu0 }
 0x32c   : > { %v4268_v22 = vpop.f32.mrb[241].mxu1  ;;  %v3974_v53 = vpop.f32.mrb[226].mxu0 }
 0x32d   : > { %v9969_v59 = vadd.f32 %v5446_v13, %v4268_v22  ;;  %v4270_v62 = vpop.f32.mrb[242].mxu1  ;;  %v3975_v36 = vpop.f32.mrb[227].mxu0 }
 0x32e   : > { %v4271_v54 = vpop.f32.mrb[243].mxu1 }
 0x32f   : > { %v9971_v12 = vadd.f32 %v5447_v11, %v4271_v54  ;;  %4512 = vmatmul.mubr.bf16.gmra.mrb[76].mxu0 %v9585_v9 }
 0x330   : > { %4799 = vmatmul.mubr.bf16.gmra.mrb[92].mxu1 %v9585_v9  ;;  %4521 = vmatprep.mubr.bf16.mxu0 %v10648_v20 }
 0x331   : > { %4808 = vmatprep.mubr.bf16.mxu1 %v10648_v20 }
 0x332   : > { %v3978_v48 = vpop.f32.mrb[228].mxu0 }
 0x333   : > { %v4275_v42 = vpop.f32.mrb[244].mxu1  ;;  %v3979_v32 = vpop.f32.mrb[229].mxu0 }
 0x334   : > { %v4276_v5 = vpop.f32.mrb[245].mxu1  ;;  %v3980_v13 = vpop.f32.mrb[230].mxu0 }
 0x335   : > { %v4277_v16 = vpop.f32.mrb[246].mxu1  ;;  %v3981_v3 = vpop.f32.mrb[231].mxu0 }
 0x336   : > { %v4278_v26 = vpop.f32.mrb[247].mxu1 }
 0x337   : > { %4522 = vmatmul.mubr.bf16.gmra.mrb[80].mxu0 %v9601_v63 }
 0x338   : > { %4809 = vmatmul.mubr.bf16.gmra.mrb[96].mxu1 %v9601_v63  ;;  %4531 = vmatprep.mubr.bf16.mxu0 %v10648_v20 }
 0x339   : > { %4818 = vmatprep.mubr.bf16.mxu1 %v10648_v20 }
 0x33a   : > { %v3984_v11 = vpop.f32.mrb[232].mxu0 }
 0x33b   : > { %v4281_v22 = vpop.f32.mrb[248].mxu1  ;;  %v3985_v53 = vpop.f32.mrb[233].mxu0  ;;  %v7859_v11 = vld [vmem:[%s10451_s5 + $0x48] sm:$0xff]  }
 0x33c   : > { %v4282_v62 = vpop.f32.mrb[249].mxu1  ;;  %v3986_v36 = vpop.f32.mrb[234].mxu0  ;;  %7095 = vmatprep.subr.bf16.mxu1 %v7859_v11 }
 0x33d   : > { %v4283_v54 = vpop.f32.mrb[250].mxu1  ;;  %v3987_v48 = vpop.f32.mrb[235].mxu0  ;;  %v7860_v62 = vld [vmem:[%s10451_s5 + $0x8] sm:$0xff]  }
 0x33e   : > { %v4284_v42 = vpop.f32.mrb[251].mxu1  ;;  %7096 = vmatpush3.bf16.msra.mxu1 %v7860_v62 }
 0x33f   : > { %4532 = vmatmul.mubr.bf16.gmra.mrb[84].mxu0 %v9611_v4 }
 0x340   : > { %4819 = vmatmul.mubr.bf16.gmra.mrb[100].mxu1 %v9611_v4  ;;  %4540 = vmatprep.mubr.bf16.mxu0 %v10648_v20 }
 0x341   : > { %4825 = vmatprep.mubr.bf16.mxu1 %v10648_v20 }
 0x342   : > { %v3990_v32 = vpop.f32.mrb[236].mxu0 }
 0x343   : > { %v4287_v5 = vpop.f32.mrb[252].mxu1  ;;  %v3991_v13 = vpop.f32.mrb[237].mxu0 }
 0x344   : > { %v4288_v16 = vpop.f32.mrb[253].mxu1  ;;  %v3992_v3 = vpop.f32.mrb[238].mxu0 }
 0x345   : > { %v4289_v26 = vpop.f32.mrb[254].mxu1  ;;  %v3993_v22 = vpop.f32.mrb[239].mxu0 }
 0x346   : > { %v4290_v53 = vpop.f32.mrb[255].mxu1 }
 0x347   : > { %4541 = vmatmul.mubr.bf16.gmra.mrb[88].mxu0 %v9617_v55 }
 0x348   : > { %4826 = vmatmul.mubr.bf16.gmra.mrb[104].mxu1 %v9617_v55  ;;  %4547 = vmatprep.mubr.bf16.mxu0 %v10648_v20 }
 0x349   : > { %4834 = vmatprep.mubr.bf16.mxu1 %v10648_v20 }
 0x34a   : > { %v3996_v36 = vpop.f32.mrb[240].mxu0 }
 0x34b   : > { %v4293_v54 = vpop.f32.mrb[0].mxu1  ;;  %v3997_v48 = vpop.f32.mrb[241].mxu0 }
 0x34c   : > { %v4294_v42 = vpop.f32.mrb[1].mxu1  ;;  %v3998_v32 = vpop.f32.mrb[242].mxu0 }
 0x34d   : > { %v4295_v5 = vpop.f32.mrb[2].mxu1  ;;  %v3999_v13 = vpop.f32.mrb[243].mxu0 }
 0x34e   : > { %v4296_v16 = vpop.f32.mrb[3].mxu1 }
 0x34f   : > { %4548 = vmatmul.mubr.bf16.gmra.mrb[92].mxu0 %v9633_v61 }
 0x350   : > { %4835 = vmatmul.mubr.bf16.gmra.mrb[108].mxu1 %v9633_v61  ;;  %4557 = vmatprep.mubr.bf16.mxu0 %v10648_v20 }
 0x351   : > { %4844 = vmatprep.mubr.bf16.mxu1 %v10648_v20 }
 0x352   : > { %v4002_v3 = vpop.f32.mrb[244].mxu0 }
 0x353   : > { %v4299_v26 = vpop.f32.mrb[4].mxu1  ;;  %v4003_v11 = vpop.f32.mrb[245].mxu0 }
 0x354   : > { %v4300_v22 = vpop.f32.mrb[5].mxu1  ;;  %v4004_v53 = vpop.f32.mrb[246].mxu0 }
 0x355   : > { %v4301_v62 = vpop.f32.mrb[6].mxu1  ;;  %v4005_v36 = vpop.f32.mrb[247].mxu0 }
 0x356   : > { %v4302_v54 = vpop.f32.mrb[7].mxu1 }
 0x357   : > { %4558 = vmatmul.mubr.bf16.gmra.mrb[96].mxu0 %v9642_v46 }
 0x358   : > { %4845 = vmatmul.mubr.bf16.gmra.mrb[112].mxu1 %v9642_v46  ;;  %4567 = vmatprep.mubr.bf16.mxu0 %v10648_v20 }
 0x359   : > { %4854 = vmatprep.mubr.bf16.mxu1 %v10648_v20 }
 0x35a   : > { %v4338_v48 = vpop.f32.mrb[248].mxu0 }
 0x35b   : > { %v4635_v42 = vpop.f32.mrb[8].mxu1  ;;  %v4339_v32 = vpop.f32.mrb[249].mxu0  ;;  %v7861_v48 = vld [vmem:[%s10451_s5 + $0x50] sm:$0xff]  }
 0x35c   : > { %v4636_v5 = vpop.f32.mrb[9].mxu1  ;;  %v4340_v13 = vpop.f32.mrb[250].mxu0  ;;  %7097 = vmatprep.subr.bf16.mxu1 %v7861_v48 }
 0x35d   : > { %v4637_v16 = vpop.f32.mrb[10].mxu1  ;;  %v4341_v3 = vpop.f32.mrb[251].mxu0  ;;  %v7862_v5 = vld [vmem:[%s10451_s5 + $0x10] sm:$0xff]  }
 0x35e   : > { %v4638_v26 = vpop.f32.mrb[11].mxu1  ;;  %7098 = vmatpush3.bf16.msra.mxu1 %v7862_v5 }
 0x35f   : > { %4568 = vmatmul.mubr.bf16.gmra.mrb[100].mxu0 %v9655_v35 }
 0x360   : > { %4855 = vmatmul.mubr.bf16.gmra.mrb[116].mxu1 %v9655_v35  ;;  %4576 = vmatprep.mubr.bf16.mxu0 %v10648_v20 }
 0x361   : > { %4861 = vmatprep.mubr.bf16.mxu1 %v10648_v20 }
 0x362   : > { %v4344_v11 = vpop.f32.mrb[252].mxu0 }
 0x363   : > { %v4641_v22 = vpop.f32.mrb[12].mxu1  ;;  %v4345_v53 = vpop.f32.mrb[253].mxu0 }
 0x364   : > { %v4642_v62 = vpop.f32.mrb[13].mxu1  ;;  %v4346_v36 = vpop.f32.mrb[254].mxu0 }
 0x365   : > { %v4643_v54 = vpop.f32.mrb[14].mxu1  ;;  %v4347_v42 = vpop.f32.mrb[255].mxu0 }
 0x366   : > { %v4644_v32 = vpop.f32.mrb[15].mxu1 }
 0x367   : > { %4577 = vmatmul.mubr.bf16.gmra.mrb[104].mxu0 %v9667_v43 }
 0x368   : > { %4862 = vmatmul.mubr.bf16.gmra.mrb[120].mxu1 %v9667_v43  ;;  %4582 = vmatprep.mubr.bf16.mxu0 %v10648_v20 }
 0x369   : > { %4870 = vmatprep.mubr.bf16.mxu1 %v10648_v20 }
 0x36a   : > { %v4350_v13 = vpop.f32.mrb[0].mxu0 }
 0x36b   : > { %v4647_v16 = vpop.f32.mrb[16].mxu1  ;;  %v4351_v3 = vpop.f32.mrb[1].mxu0 }
 0x36c   : > { %v4648_v26 = vpop.f32.mrb[17].mxu1  ;;  %v4352_v11 = vpop.f32.mrb[2].mxu0 }
 0x36d   : > { %v4649_v22 = vpop.f32.mrb[18].mxu1  ;;  %v4353_v53 = vpop.f32.mrb[3].mxu0 }
 0x36e   : > { %v4650_v62 = vpop.f32.mrb[19].mxu1 }
 0x36f   : > { %4583 = vmatmul.mubr.bf16.gmra.mrb[108].mxu0 %v9683_v38 }
 0x370   : > { %4871 = vmatmul.mubr.bf16.gmra.mrb[124].mxu1 %v9683_v38  ;;  %4588 = vmatprep.mubr.bf16.mxu0 %v10648_v20 }
 0x371   : > { %4880 = vmatprep.mubr.bf16.mxu1 %v10648_v20 }
 0x372   : > { %v4356_v36 = vpop.f32.mrb[4].mxu0 }
 0x373   : > { %v4653_v54 = vpop.f32.mrb[20].mxu1  ;;  %v4357_v48 = vpop.f32.mrb[5].mxu0 }
 0x374   : > { %v4654_v42 = vpop.f32.mrb[21].mxu1  ;;  %v4358_v32 = vpop.f32.mrb[6].mxu0 }
 0x375   : > { %v4655_v5 = vpop.f32.mrb[22].mxu1  ;;  %v4359_v13 = vpop.f32.mrb[7].mxu0 }
 0x376   : > { %v4656_v16 = vpop.f32.mrb[23].mxu1 }
 0x377   : > { %4589 = vmatmul.mubr.bf16.gmra.mrb[112].mxu0 %v9695_v7 }
 0x378   : > { %4881 = vmatmul.mubr.bf16.gmra.mrb[128].mxu1 %v9695_v7  ;;  %4594 = vmatprep.mubr.bf16.mxu0 %v10648_v20 }
 0x379   : > { %4890 = vmatprep.mubr.bf16.mxu1 %v10648_v20 }
 0x37a   : > { %v4362_v3 = vpop.f32.mrb[8].mxu0 }
 0x37b   : > { %v4659_v26 = vpop.f32.mrb[24].mxu1  ;;  %v4363_v11 = vpop.f32.mrb[9].mxu0 }
 0x37c   : > { %v4660_v22 = vpop.f32.mrb[25].mxu1  ;;  %v4364_v53 = vpop.f32.mrb[10].mxu0 }
 0x37d   : > { %v4661_v62 = vpop.f32.mrb[26].mxu1  ;;  %v5178_v36 = vadd.f32 %v9782_v15, %v4364_v53  ;;  %v4366_v54 = vpop.f32.mrb[11].mxu0  ;;  %v7863_v15 = vld [vmem:[%s10451_s5 + $0x58] sm:$0xff]  }
 0x37e   : > { %v4662_v48 = vpop.f32.mrb[27].mxu1  ;;  %7099 = vmatprep.subr.bf16.mxu1 %v7863_v15 }
 0x37f   : > { %4595 = vmatmul.mubr.bf16.gmra.mrb[116].mxu0 %v9708_v58 }
 0x380   : > { %4891 = vmatmul.mubr.bf16.gmra.mrb[132].mxu1 %v9708_v58  ;;  %7622 = vmatprep.mubr.bf16.mxu0 %v10761_v47  ;;  %v7864_v47 = vld [vmem:[%s10451_s5 + $0x18] sm:$0xff]  }
 0x381   : > { %7100 = vmatpush3.bf16.msra.mxu1 %v7864_v47 }
 0x382   : > { %v4369_v42 = vpop.f32.mrb[12].mxu0 }
 0x383   : > { %v4665_v32 = vpop.f32.mrb[28].mxu1  ;;  %v5179_v20 = vadd.f32 %v9784_v19, %v4369_v42  ;;  %v4371_v5 = vpop.f32.mrb[13].mxu0 }
 0x384   : > { %v4666_v13 = vpop.f32.mrb[29].mxu1  ;;  %v5184_v16 = vadd.f32 %v5178_v36, %v4371_v5  ;;  %v4373_v3 = vpop.f32.mrb[14].mxu0 }
 0x385   : > { %v4667_v26 = vpop.f32.mrb[30].mxu1  ;;  %v5180_v11 = vadd.f32 %v9792_v33, %v4373_v3  ;;  %v4375_v22 = vpop.f32.mrb[15].mxu0 }
 0x386   : > { %v4668_v53 = vpop.f32.mrb[31].mxu1  ;;  %v5185_v62 = vadd.f32 %v5179_v20, %v4375_v22 }
 0x387   : > { %7623 = vmatmul.mubr.bf16.vlgmr.msra.gmra.mrb[120].mxu0 %v10762_v0 }
 0x388   : > { %7626 = vmatprep.mubr.bf16.mxu0 %v10763_v27 }
 0x38a   : > { %v4379_v19 = vpop.f32.mrb[16].mxu0 }
 0x38b   : > { %v4671_v36 = vpop.f32.mrb[32].mxu1  ;;  %v5181_v54 = vadd.f32 %v9797_v23, %v4379_v19  ;;  %v4381_v48 = vpop.f32.mrb[17].mxu0 }
 0x38c   : > { %v4672_v42 = vpop.f32.mrb[33].mxu1  ;;  %v5186_v33 = vadd.f32 %v5180_v11, %v4381_v48  ;;  %v4383_v32 = vpop.f32.mrb[18].mxu0 }
 0x38d   : > { %v4673_v5 = vpop.f32.mrb[34].mxu1  ;;  %v5182_v13 = vadd.f32 %v9807_v57, %v4383_v32  ;;  %v4385_v3 = vpop.f32.mrb[19].mxu0 }
 0x38e   : > { %v4674_v26 = vpop.f32.mrb[35].mxu1  ;;  %v5187_v20 = vadd.f32 %v5181_v54, %v4385_v3 }
 0x38f   : > { %7627 = vmatmul.mubr.bf16.gmra.mrb[124].mxu0 %v10764_v29 }
 0x390   : > { %7630 = vmatprep.mubr.bf16.mxu0 %v10765_v49 }
 0x392   : > { %v4389_v0 = vpop.f32.mrb[20].mxu0 }
 0x393   : > { %v4677_v27 = vpop.f32.mrb[36].mxu1  ;;  %v5183_v15 = vadd.f32 %v9809_v28, %v4389_v0  ;;  %v4391_v22 = vpop.f32.mrb[21].mxu0 }
 0x394   : > { %v4678_v23 = vpop.f32.mrb[37].mxu1  ;;  %v5188_v53 = vadd.f32 %v5182_v13, %v4391_v22  ;;  %v4393_v47 = vpop.f32.mrb[22].mxu0 }
 0x395   : > { %v4679_v11 = vpop.f32.mrb[38].mxu1  ;;  %v4394_v19 = vpop.f32.mrb[23].mxu0 }
 0x396   : > { %v4680_v36 = vpop.f32.mrb[39].mxu1  ;;  %v5189_v48 = vadd.f32 %v5183_v15, %v4394_v19  ;;  %v7865_v11 = vld [vmem:[%s10451_s5 + $0x60] sm:$0xff]  }
 0x397   : > { %7631 = vmatmul.mubr.bf16.gmra.mrb[128].mxu0 %v10768_v56  ;;  %7101 = vmatprep.subr.bf16.mxu1 %v7865_v11 }
 0x398   : > { %7634 = vmatprep.mubr.bf16.mxu0 %v10769_v24 }
 0x39a   : > { %v4398_v57 = vpop.f32.mrb[24].mxu0 }
 0x39b   : > { %v4683_v29 = vpop.f32.mrb[40].mxu1  ;;  %v4399_v49 = vpop.f32.mrb[25].mxu0 }
 0x39c   : > { %v5190_v54 = vadd.f32 %v5184_v16, %v4683_v29  ;;  %v4685_v42 = vpop.f32.mrb[41].mxu1  ;;  %v4400_v32 = vpop.f32.mrb[26].mxu0 }
 0x39d   : > { %v4686_v5 = vpop.f32.mrb[42].mxu1  ;;  %v5226_v28 = vadd.f32 %v9826_v37, %v4400_v32  ;;  %v4402_v13 = vpop.f32.mrb[27].mxu0 }
 0x39e   : > { %v5191_v3 = vadd.f32 %v5185_v62, %v4686_v5  ;;  %v4688_v26 = vpop.f32.mrb[43].mxu1  ;;  %v10787_v13 = vld [vmem:[#allocation23_spill] sm:$0xff] }
 0x39f   : > { %v10047_v0 = vadd.f32 %v5190_v54, %v4688_v26  ;;  %7635 = vmatmul.mubr.bf16.gmra.mrb[132].mxu0 %v9309_v31 }
 0x3a0   : > { %7638 = vmatprep.mubr.bf16.mxu0 %v9325_v1 }
 0x3a2   : > { %v4405_v56 = vpop.f32.mrb[28].mxu0 }
 0x3a3   : > { %v4692_v24 = vpop.f32.mrb[44].mxu1  ;;  %v5227_v27 = vadd.f32 %v9828_v25, %v4405_v56  ;;  %v4407_v15 = vpop.f32.mrb[29].mxu0  ;;  %v7866_v25 = vld [vmem:[%s10451_s5 + $0x20] sm:$0xff]  }
 0x3a4   : > { %v5192_v16 = vadd.f32 %v5186_v33, %v4692_v24  ;;  %v4694_v22 = vpop.f32.mrb[45].mxu1  ;;  %v5232_v23 = vadd.f32 %v5226_v28, %v4407_v15  ;;  %v4409_v37 = vpop.f32.mrb[30].mxu0  ;;  %7102 = vmatpush3.bf16.msra.mxu1 %v7866_v25 }
 0x3a5   : > { %v10052_v47 = vadd.f32 %v5191_v3, %v4694_v22  ;;  %v4696_v62 = vpop.f32.mrb[46].mxu1  ;;  %v5228_v31 = vadd.f32 %v9834_v41, %v4409_v37  ;;  %v4411_v1 = vpop.f32.mrb[31].mxu0 }
 0x3a6   : > { %v5193_v19 = vadd.f32 %v5187_v20, %v4696_v62  ;;  %v4698_v36 = vpop.f32.mrb[47].mxu1  ;;  %v5233_v33 = vadd.f32 %v5227_v27, %v4411_v1 }
 0x3a7   : > { %v10061_v57 = vadd.f32 %v5192_v16, %v4698_v36  ;;  %7639 = vmatmul.mubr.bf16.gmra.mrb[136].mxu0 %v9357_v39 }
 0x3a8   : > { %7642 = vmatprep.mubr.bf16.mxu0 %v9373_v6 }
 0x3aa   : > { %v4415_v29 = vpop.f32.mrb[32].mxu0 }
 0x3ab   : > { %v4702_v54 = vpop.f32.mrb[48].mxu1  ;;  %v5229_v41 = vadd.f32 %v9836_v50, %v4415_v29  ;;  %v4417_v49 = vpop.f32.mrb[33].mxu0 }
 0x3ac   : > { %v5194_v20 = vadd.f32 %v5188_v53, %v4702_v54  ;;  %v4704_v42 = vpop.f32.mrb[49].mxu1  ;;  %v5234_v32 = vadd.f32 %v5228_v31, %v4417_v49  ;;  %v4419_v28 = vpop.f32.mrb[34].mxu0  ;;  %v10788_v53 = vld [vmem:[#allocation13_spill] sm:$0xff] }
 0x3ad   : > { %v10066_v5 = vadd.f32 %v5193_v19, %v4704_v42  ;;  %v4706_v3 = vpop.f32.mrb[50].mxu1  ;;  %v5230_v26 = vadd.f32 %v10787_v13, %v4419_v28  ;;  %v4421_v24 = vpop.f32.mrb[35].mxu0  ;;  %v10789_v49 = vld [vmem:[#allocation25_spill] sm:$0xff] }
 0x3ae   : > { %v5195_v56 = vadd.f32 %v5189_v48, %v4706_v3  ;;  %v4708_v39 = vpop.f32.mrb[51].mxu1  ;;  %v5235_v27 = vadd.f32 %v5229_v41, %v4421_v24 }
 0x3af   : > { %v10069_v16 = vadd.f32 %v5194_v20, %v4708_v39  ;;  %7643 = vmatmul.mubr.bf16.gmra.mrb[140].mxu0 %v9393_v18 }
 0x3b0   : > { %7646 = vmatprep.mubr.bf16.mxu0 %v9409_v60 }
 0x3b2   : > { %v4425_v6 = vpop.f32.mrb[36].mxu0 }
 0x3b3   : > { %v4712_v50 = vpop.f32.mrb[52].mxu1  ;;  %v5231_v15 = vadd.f32 %v10788_v53, %v4425_v6  ;;  %v4427_v22 = vpop.f32.mrb[37].mxu0 }
 0x3b4   : > { %v4713_v37 = vpop.f32.mrb[53].mxu1  ;;  %v5236_v62 = vadd.f32 %v5230_v26, %v4427_v22  ;;  %v4429_v31 = vpop.f32.mrb[38].mxu0  ;;  %v7867_v22 = vld [vmem:[%s10451_s5 + $0x68] sm:$0xff]  }
 0x3b5   : > { %v10074_v11 = vadd.f32 %v5195_v56, %v4713_v37  ;;  %v4715_v48 = vpop.f32.mrb[54].mxu1  ;;  %v4430_v19 = vpop.f32.mrb[39].mxu0  ;;  %v10790_v56 = vld [vmem:[#allocation14_spill] sm:$0xff]  ;;  %v10791_v37 = vld [vmem:[#allocation27_spill] sm:$0xff]  ;;  %7103 = vmatprep.subr.bf16.mxu1 %v7867_v22 }
 0x3b6   : > { %v4716_v1 = vpop.f32.mrb[55].mxu1  ;;  %v5237_v36 = vadd.f32 %v5231_v15, %v4430_v19 }
 0x3b7   : > { %7647 = vmatmul.mubr.bf16.gmra.mrb[144].mxu0 %v9429_v34 }
 0x3b8   : > { %7650 = vmatprep.mubr.bf16.mxu0 %v9445_v8 }
 0x3ba   : > { %v4434_v18 = vpop.f32.mrb[40].mxu0 }
 0x3bb   : > { %v4719_v60 = vpop.f32.mrb[56].mxu1  ;;  %v4435_v29 = vpop.f32.mrb[41].mxu0 }
 0x3bc   : > { %v5238_v25 = vadd.f32 %v5232_v23, %v4719_v60  ;;  %v4721_v54 = vpop.f32.mrb[57].mxu1  ;;  %v4436_v41 = vpop.f32.mrb[42].mxu0 }
 0x3bd   : > { %v4722_v20 = vpop.f32.mrb[58].mxu1  ;;  %v5295_v42 = vadd.f32 %v10789_v49, %v4436_v41  ;;  %v4438_v3 = vpop.f32.mrb[43].mxu0 }
 0x3be   : > { %v5239_v28 = vadd.f32 %v5233_v33, %v4722_v20  ;;  %v4724_v13 = vpop.f32.mrb[59].mxu1  ;;  %v10793_v3 = vld [vmem:[#allocation29_spill] sm:$0xff] }
 0x3bf   : > { %v10079_v26 = vadd.f32 %v5238_v25, %v4724_v13  ;;  %7651 = vmatmul.mubr.bf16.gmra.mrb[148].mxu0 %v9465_v14  ;;  %v10792_v25 = vld [vmem:[#allocation15_spill] sm:$0xff] }
 0x3c0   : > { %7654 = vmatprep.mubr.bf16.mxu0 %v9481_v2 }
 0x3c2   : > { %v4441_v34 = vpop.f32.mrb[44].mxu0 }
 0x3c3   : > { %v4728_v8 = vpop.f32.mrb[60].mxu1  ;;  %v5296_v24 = vadd.f32 %v10790_v56, %v4441_v34  ;;  %v4443_v39 = vpop.f32.mrb[45].mxu0 }
 0x3c4   : > { %v5240_v23 = vadd.f32 %v5234_v32, %v4728_v8  ;;  %v4730_v6 = vpop.f32.mrb[61].mxu1  ;;  %v5301_v50 = vadd.f32 %v5295_v42, %v4443_v39  ;;  %v4445_v15 = vpop.f32.mrb[46].mxu0  ;;  %v7868_v32 = vld [vmem:[%s10451_s5 + $0x28] sm:$0xff]  }
 0x3c5   : > { %v10084_v53 = vadd.f32 %v5239_v28, %v4730_v6  ;;  %v4732_v33 = vpop.f32.mrb[62].mxu1  ;;  %v5297_v14 = vadd.f32 %v10791_v37, %v4445_v15  ;;  %v4447_v2 = vpop.f32.mrb[47].mxu0  ;;  %7104 = vmatpush3.bf16.msra.mxu1 %v7868_v32 }
 0x3c6   : > { %v5241_v31 = vadd.f32 %v5235_v27, %v4732_v33  ;;  %v4734_v48 = vpop.f32.mrb[63].mxu1  ;;  %v5302_v19 = vadd.f32 %v5296_v24, %v4447_v2 }
 0x3c7   : > { %v10093_v1 = vadd.f32 %v5240_v23, %v4734_v48  ;;  %7655 = vmatmul.mubr.bf16.gmra.mrb[152].mxu0 %v9513_v17  ;;  %v10794_v23 = vld [vmem:[#allocation16_spill] sm:$0xff] }
 0x3c8   : > { %7658 = vmatprep.mubr.bf16.mxu0 %v9529_v44 }
 0x3ca   : > { %v4451_v18 = vpop.f32.mrb[48].mxu0 }
 0x3cb   : > { %v4738_v60 = vpop.f32.mrb[64].mxu1  ;;  %v5298_v29 = vadd.f32 %v10792_v25, %v4451_v18  ;;  %v4453_v54 = vpop.f32.mrb[49].mxu0 }
 0x3cc   : > { %v5242_v27 = vadd.f32 %v5236_v62, %v4738_v60  ;;  %v4740_v41 = vpop.f32.mrb[65].mxu1  ;;  %v5303_v20 = vadd.f32 %v5297_v14, %v4453_v54  ;;  %v4455_v42 = vpop.f32.mrb[50].mxu0 }
 0x3cd   : > { %v10098_v49 = vadd.f32 %v5241_v31, %v4740_v41  ;;  %v4742_v28 = vpop.f32.mrb[66].mxu1  ;;  %v5299_v13 = vadd.f32 %v10793_v3, %v4455_v42  ;;  %v4457_v8 = vpop.f32.mrb[51].mxu0  ;;  %v10796_v3 = vld [vmem:[#allocation18_spill] sm:$0xff] }
 0x3ce   : > { %v5243_v34 = vadd.f32 %v5237_v36, %v4742_v28  ;;  %v4744_v17 = vpop.f32.mrb[67].mxu1  ;;  %v5304_v56 = vadd.f32 %v5298_v29, %v4457_v8  ;;  %v10795_v29 = vld [vmem:[#allocation31_spill] sm:$0xff] }
 0x3cf   : > { %v10101_v24 = vadd.f32 %v5242_v27, %v4744_v17  ;;  %7659 = vmatmul.mubr.bf16.gmra.mrb[156].mxu0 %v9549_v52  ;;  %v7869_v17 = vld [vmem:[%s10451_s5 + $0x70] sm:$0xff]  }
 0x3d0   : > { %7662 = vmatprep.mubr.bf16.mxu0 %v9565_v10  ;;  %7105 = vmatprep.subr.bf16.mxu1 %v7869_v17 }
 0x3d2   : > { %v4461_v44 = vpop.f32.mrb[52].mxu0 }
 0x3d3   : > { %v4748_v62 = vpop.f32.mrb[68].mxu1  ;;  %v5300_v39 = vadd.f32 %v10794_v23, %v4461_v44  ;;  %v4463_v6 = vpop.f32.mrb[53].mxu0 }
 0x3d4   : > { %v4749_v15 = vpop.f32.mrb[69].mxu1  ;;  %v5305_v33 = vadd.f32 %v5299_v13, %v4463_v6  ;;  %v4465_v37 = vpop.f32.mrb[54].mxu0 }
 0x3d5   : > { %v10106_v22 = vadd.f32 %v5243_v34, %v4749_v15  ;;  %v4751_v36 = vpop.f32.mrb[70].mxu1  ;;  %v4466_v14 = vpop.f32.mrb[55].mxu0 }
 0x3d6   : > { %v4752_v31 = vpop.f32.mrb[71].mxu1  ;;  %v5306_v2 = vadd.f32 %v5300_v39, %v4466_v14 }
 0x3d7   : > { %7663 = vmatmul.mubr.bf16.gmra.mrb[160].mxu0 %v9585_v9 }
 0x3d8   : > { %7666 = vmatprep.mubr.bf16.mxu0 %v9601_v63 }
 0x3da   : > { %v4470_v52 = vpop.f32.mrb[56].mxu0 }
 0x3db   : > { %v4755_v10 = vpop.f32.mrb[72].mxu1  ;;  %v4471_v32 = vpop.f32.mrb[57].mxu0  ;;  %v10798_v52 = vld [vmem:[#allocation20_spill] sm:$0xff] }
 0x3dc   : > { %v5307_v48 = vadd.f32 %v5301_v50, %v4755_v10  ;;  %v4757_v18 = vpop.f32.mrb[73].mxu1  ;;  %v4472_v60 = vpop.f32.mrb[58].mxu0 }
 0x3dd   : > { %v4758_v25 = vpop.f32.mrb[74].mxu1  ;;  %v5343_v27 = vadd.f32 %v10795_v29, %v4472_v60  ;;  %v4474_v41 = vpop.f32.mrb[59].mxu0 }
 0x3de   : > { %v5308_v54 = vadd.f32 %v5302_v19, %v4758_v25  ;;  %v4760_v42 = vpop.f32.mrb[75].mxu1 }
 0x3df   : > { %v10111_v28 = vadd.f32 %v5307_v48, %v4760_v42  ;;  %7667 = vmatmul.mubr.bf16.gmra.mrb[164].mxu0 %v9611_v4  ;;  %v7870_v4 = vld [vmem:[%s10451_s5 + $0x30] sm:$0xff]  }
 0x3e0   : > { %7670 = vmatprep.mubr.bf16.mxu0 %v9617_v55  ;;  %v10797_v55 = vld [vmem:[#allocation33_spill] sm:$0xff]  ;;  %7106 = vmatpush3.bf16.msra.mxu1 %v7870_v4 }
 0x3e2   : > { %v4477_v9 = vpop.f32.mrb[60].mxu0 }
 0x3e3   : > { %v4764_v63 = vpop.f32.mrb[76].mxu1  ;;  %v5344_v13 = vadd.f32 %v10796_v3, %v4477_v9  ;;  %v4479_v34 = vpop.f32.mrb[61].mxu0  ;;  %v10800_v3 = vld [vmem:[#allocation22_spill] sm:$0xff] }
 0x3e4   : > { %v5309_v50 = vadd.f32 %v5303_v20, %v4764_v63  ;;  %v4766_v8 = vpop.f32.mrb[77].mxu1  ;;  %v5349_v19 = vadd.f32 %v5343_v27, %v4479_v34  ;;  %v4481_v62 = vpop.f32.mrb[62].mxu0  ;;  %v10799_v27 = vld [vmem:[#allocation35_spill] sm:$0xff] }
 0x3e5   : > { %v10119_v44 = vadd.f32 %v5308_v54, %v4766_v8  ;;  %v4768_v23 = vpop.f32.mrb[78].mxu1  ;;  %v5345_v39 = vadd.f32 %v10797_v55, %v4481_v62  ;;  %v4483_v15 = vpop.f32.mrb[63].mxu0 }
 0x3e6   : > { %v5310_v6 = vadd.f32 %v5304_v56, %v4768_v23  ;;  %v4770_v20 = vpop.f32.mrb[79].mxu1  ;;  %v5350_v37 = vadd.f32 %v5344_v13, %v4483_v15 }
 0x3e7   : > { %v10125_v36 = vadd.f32 %v5309_v50, %v4770_v20  ;;  %7671 = vmatmul.mubr.bf16.gmra.mrb[168].mxu0 %v9633_v61 }
 0x3e8   : > { %7674 = vmatprep.mubr.bf16.mxu0 %v9642_v46 }
 0x3ea   : > { %v4487_v14 = vpop.f32.mrb[64].mxu0 }
 0x3eb   : > { %v4774_v31 = vpop.f32.mrb[80].mxu1  ;;  %v5346_v10 = vadd.f32 %v10798_v52, %v4487_v14  ;;  %v4489_v32 = vpop.f32.mrb[65].mxu0 }
 0x3ec   : > { %v5311_v48 = vadd.f32 %v5305_v33, %v4774_v31  ;;  %v4776_v18 = vpop.f32.mrb[81].mxu1  ;;  %v5351_v60 = vadd.f32 %v5345_v39, %v4489_v32  ;;  %v4491_v25 = vpop.f32.mrb[66].mxu0  ;;  %v10801_v31 = vld [vmem:[#allocation37_spill] sm:$0xff] }
 0x3ed   : > { %v10130_v56 = vadd.f32 %v5310_v6, %v4776_v18  ;;  %v4778_v29 = vpop.f32.mrb[82].mxu1  ;;  %v5347_v54 = vadd.f32 %v10799_v27, %v4491_v25  ;;  %v4493_v42 = vpop.f32.mrb[67].mxu0 }
 0x3ee   : > { %v5312_v41 = vadd.f32 %v5306_v2, %v4778_v29  ;;  %v4780_v9 = vpop.f32.mrb[83].mxu1  ;;  %v5352_v61 = vadd.f32 %v5346_v10, %v4493_v42  ;;  %v10802_v29 = vld [vmem:[#allocation24_spill] sm:$0xff] }
 0x3ef   : > { %v10133_v63 = vadd.f32 %v5311_v48, %v4780_v9  ;;  %7675 = vmatmul.mubr.bf16.gmra.mrb[172].mxu0 %v9655_v35 }
 0x3f0   : > { %7678 = vmatprep.mubr.bf16.mxu0 %v9667_v43 }
 0x3f2   : > { %v4497_v46 = vpop.f32.mrb[68].mxu0 }
 0x3f3   : > { %v4784_v33 = vpop.f32.mrb[84].mxu1  ;;  %v5348_v13 = vadd.f32 %v10800_v3, %v4497_v46  ;;  %v4499_v50 = vpop.f32.mrb[69].mxu0 }
 0x3f4   : > { %v4785_v34 = vpop.f32.mrb[85].mxu1  ;;  %v5353_v8 = vadd.f32 %v5347_v54, %v4499_v50  ;;  %v4501_v62 = vpop.f32.mrb[70].mxu0  ;;  %v10803_v33 = vld [vmem:[#allocation39_spill] sm:$0xff] }
 0x3f5   : > { %v10138_v17 = vadd.f32 %v5312_v41, %v4785_v34  ;;  %v4787_v2 = vpop.f32.mrb[86].mxu1  ;;  %v4502_v23 = vpop.f32.mrb[71].mxu0 }
 0x3f6   : > { %v4788_v4 = vpop.f32.mrb[87].mxu1  ;;  %v5354_v55 = vadd.f32 %v5348_v13, %v4502_v23  ;;  %v7873_v2 = vld [vmem:[%s10451_s5 + $0x200] sm:$0xff]   ;;  %v7938_v23 = vmov 0.0  }
 0x3f7   : > { %7679 = vmatmul.mubr.bf16.gmra.mrb[176].mxu0 %v9683_v38  ;;  %7686 = vmatprep.subr.bf16.mxu0 %v7938_v23 }
 0x3f8   : > { %7682 = vmatprep.mubr.bf16.mxu0 %v9695_v7  ;;  %7687 = vmatpush3.bf16.msra.mxu0 %v7873_v2 }
 0x3f9   : > { %7688 = vmatprep.subr.bf16.mxu0 %v7938_v23 }
 0x3fa   : > { %v4506_v35 = vpop.f32.mrb[72].mxu0 }
 0x3fb   : > { %v4791_v43 = vpop.f32.mrb[88].mxu1  ;;  %v4507_v6 = vpop.f32.mrb[73].mxu0  ;;  %v10804_v35 = vld [vmem:[#allocation26_spill] sm:$0xff] }
 0x3fc   : > { %v5355_v39 = vadd.f32 %v5349_v19, %v4791_v43  ;;  %v4793_v15 = vpop.f32.mrb[89].mxu1  ;;  %v4508_v20 = vpop.f32.mrb[74].mxu0 }
 0x3fd   : > { %v4794_v14 = vpop.f32.mrb[90].mxu1  ;;  %v5406_v52 = vadd.f32 %v10801_v31, %v4508_v20  ;;  %v4510_v48 = vpop.f32.mrb[75].mxu0 }
 0x3fe   : > { %v5356_v10 = vadd.f32 %v5350_v37, %v4794_v14  ;;  %v4796_v32 = vpop.f32.mrb[91].mxu1  ;;  %v7871_v37 = vld [vmem:[%s10451_s5 + $0x78] sm:$0xff]  }
 0x3ff   : > { %v10143_v18 = vadd.f32 %v5355_v39, %v4796_v32  ;;  %7683 = vmatmul.mubr.bf16.gmra.mrb[180].mxu0 %v9708_v58  ;;  %7107 = vmatprep.subr.bf16.mxu1 %v7871_v37 }
 0x400   : > { %7702 = vmatprep.mubr.msk.bf16.mxu0 %vm7939_vm1, %v7938_v23 }
 0x402   : > { %v4513_v25 = vpop.f32.mrb[76].mxu0 }
 0x403   : > { %v4800_v38 = vpop.f32.mrb[92].mxu1  ;;  %v5407_v7 = vadd.f32 %v10802_v29, %v4513_v25  ;;  %v4515_v54 = vpop.f32.mrb[77].mxu0 }
 0x404   : > { %v5357_v27 = vadd.f32 %v5351_v60, %v4800_v38  ;;  %v4802_v19 = vpop.f32.mrb[93].mxu1  ;;  %v5412_v41 = vadd.f32 %v5406_v52, %v4515_v54  ;;  %v4517_v9 = vpop.f32.mrb[78].mxu0  ;;  %v7872_v60 = vld [vmem:[%s10451_s5 + $0x38] sm:$0xff]  }
 0x405   : > { %v10147_v42 = vadd.f32 %v5356_v10, %v4802_v19  ;;  %v4804_v46 = vpop.f32.mrb[94].mxu1  ;;  %v5408_v3 = vadd.f32 %v10803_v33, %v4517_v9  ;;  %v4519_v58 = vpop.f32.mrb[79].mxu0  ;;  %7108 = vmatpush3.bf16.msra.mxu1 %v7872_v60  ;;  %v10805_v10 = vld [vmem:[#allocation41_spill] sm:$0xff] }
 0x406   : > { %v5358_v13 = vadd.f32 %v5352_v61, %v4804_v46  ;;  %v4806_v50 = vpop.f32.mrb[95].mxu1  ;;  %v5413_v34 = vadd.f32 %v5407_v7, %v4519_v58 }
 0x407   : > { %v10156_v62 = vadd.f32 %v5357_v27, %v4806_v50 }
 0x40a   : > { %v4523_v61 = vpop.f32.mrb[80].mxu0 }
 0x40b   : > { %v4810_v4 = vpop.f32.mrb[96].mxu1  ;;  %v5409_v43 = vadd.f32 %v10804_v35, %v4523_v61  ;;  %v4525_v6 = vpop.f32.mrb[81].mxu0 }
 0x40c   : > { %v5359_v39 = vadd.f32 %v5353_v8, %v4810_v4  ;;  %v4812_v15 = vpop.f32.mrb[97].mxu1  ;;  %v5414_v20 = vadd.f32 %v5408_v3, %v4525_v6  ;;  %v4527_v31 = vpop.f32.mrb[82].mxu0 }
 0x40d   : > { %v10164_v14 = vadd.f32 %v5358_v13, %v4812_v15  ;;  %v4814_v52 = vpop.f32.mrb[98].mxu1  ;;  %v5410_v48 = vadd.f32 %v10805_v10, %v4527_v31  ;;  %v4529_v25 = vpop.f32.mrb[83].mxu0  ;;  %v7875_v10 = vld [vmem:[%s10451_s5 + $0xc0] sm:$0xff]  }
 0x40e   : > { %v5360_v32 = vadd.f32 %v5354_v55, %v4814_v52  ;;  %v4816_v38 = vpop.f32.mrb[99].mxu1  ;;  %v5415_v29 = vadd.f32 %v5409_v43, %v4529_v25  ;;  %v7874_v52 = vld [vmem:[%s10451_s5 + $0x208] sm:$0xff]   ;;  %7115 = vmatprep.subr.bf16.mxu1 %v7875_v10 }
 0x40f   : > { %v10167_v7 = vadd.f32 %v5359_v39, %v4816_v38  ;;  %7689 = vmatpush3.bf16.msra.mxu0 %v7874_v52 }
 0x410   : > { %7690 = vmatprep.subr.bf16.mxu0 %v7938_v23 }
 0x412   : > { %v4533_v27 = vpop.f32.mrb[84].mxu0 }
 0x413   : > { %v4820_v54 = vpop.f32.mrb[100].mxu1  ;;  %v5411_v19 = vadd.f32 %v9937_v21, %v4533_v27  ;;  %v4535_v8 = vpop.f32.mrb[85].mxu0 }
 0x414   : > { %v4821_v9 = vpop.f32.mrb[101].mxu1  ;;  %v5416_v46 = vadd.f32 %v5410_v48, %v4535_v8  ;;  %v4537_v33 = vpop.f32.mrb[86].mxu0 }
 0x415   : > { %v10170_v37 = vadd.f32 %v5360_v32, %v4821_v9  ;;  %v4823_v3 = vpop.f32.mrb[102].mxu1  ;;  %v4538_v13 = vpop.f32.mrb[87].mxu0 }
 0x416   : > { %v4824_v58 = vpop.f32.mrb[103].mxu1  ;;  %v5417_v50 = vadd.f32 %v5411_v19, %v4538_v13 }
 0x41a   : > { %v4542_v55 = vpop.f32.mrb[88].mxu0 }
 0x41b   : > { %v4827_v60 = vpop.f32.mrb[104].mxu1  ;;  %v4543_v61 = vpop.f32.mrb[89].mxu0 }
 0x41c   : > { %v5418_v2 = vadd.f32 %v5412_v41, %v4827_v60  ;;  %v4829_v4 = vpop.f32.mrb[105].mxu1  ;;  %v4544_v35 = vpop.f32.mrb[90].mxu0 }
 0x41d   : > { %v4830_v43 = vpop.f32.mrb[106].mxu1  ;;  %v5454_v39 = vadd.f32 %v9947_v45, %v4544_v35  ;;  %v4546_v6 = vpop.f32.mrb[91].mxu0 }
 0x41e   : > { %v5419_v21 = vadd.f32 %v5413_v34, %v4830_v43  ;;  %v4832_v15 = vpop.f32.mrb[107].mxu1 }
 0x41f   : > { %v10173_v31 = vadd.f32 %v5418_v2, %v4832_v15 }
 0x422   : > { %v4549_v41 = vpop.f32.mrb[92].mxu0 }
 0x423   : > { %v4836_v48 = vpop.f32.mrb[108].mxu1  ;;  %v5455_v45 = vadd.f32 %v9949_v51, %v4549_v41  ;;  %v4551_v32 = vpop.f32.mrb[93].mxu0  ;;  %v7879_v51 = vld [vmem:[%s10451_s5 + $0x210] sm:$0xff]  }
 0x424   : > { %v5420_v34 = vadd.f32 %v5414_v20, %v4836_v48  ;;  %v4838_v25 = vpop.f32.mrb[109].mxu1  ;;  %v5460_v38 = vadd.f32 %v5454_v39, %v4551_v32  ;;  %v4553_v54 = vpop.f32.mrb[94].mxu0  ;;  %7691 = vmatpush3.bf16.msra.mxu0 %v7879_v51 }
 0x425   : > { %v10183_v27 = vadd.f32 %v5419_v21, %v4838_v25  ;;  %v4840_v19 = vpop.f32.mrb[110].mxu1  ;;  %v5456_v8 = vadd.f32 %v9955_v30, %v4553_v54  ;;  %v4555_v33 = vpop.f32.mrb[95].mxu0  ;;  %7692 = vmatprep.subr.bf16.mxu0 %v7938_v23 }
 0x426   : > { %v5421_v9 = vadd.f32 %v5415_v29, %v4840_v19  ;;  %v4842_v3 = vpop.f32.mrb[111].mxu1  ;;  %v5461_v13 = vadd.f32 %v5455_v45, %v4555_v33 }
 0x427   : > { %v10186_v58 = vadd.f32 %v5420_v34, %v4842_v3 }
 0x42a   : > { %v4559_v20 = vpop.f32.mrb[96].mxu0 }
 0x42b   : > { %v4846_v55 = vpop.f32.mrb[112].mxu1  ;;  %v5457_v60 = vadd.f32 %v9963_v40, %v4559_v20  ;;  %v4561_v61 = vpop.f32.mrb[97].mxu0 }
 0x42c   : > { %v5422_v2 = vadd.f32 %v5416_v46, %v4846_v55  ;;  %v4848_v4 = vpop.f32.mrb[113].mxu1  ;;  %v5462_v30 = vadd.f32 %v5456_v8, %v4561_v61  ;;  %v4563_v35 = vpop.f32.mrb[98].mxu0 }
 0x42d   : > { %v10193_v29 = vadd.f32 %v5421_v9, %v4848_v4  ;;  %v4850_v43 = vpop.f32.mrb[114].mxu1  ;;  %v5458_v39 = vadd.f32 %v9969_v59, %v4563_v35  ;;  %v4565_v6 = vpop.f32.mrb[99].mxu0  ;;  %v7888_v4 = vld [vmem:[%s10451_s5 + $0x218] sm:$0xff]  }
 0x42e   : > { %v5423_v21 = vadd.f32 %v5417_v50, %v4850_v43  ;;  %v4852_v15 = vpop.f32.mrb[115].mxu1  ;;  %v5463_v52 = vadd.f32 %v5457_v60, %v4565_v6  ;;  %7693 = vmatpush3.bf16.msra.mxu0 %v7888_v4 }
 0x42f   : > { %v10196_v10 = vadd.f32 %v5422_v2, %v4852_v15  ;;  %7694 = vmatprep.subr.bf16.mxu0 %v7938_v23 }
 0x432   : > { %v4569_v41 = vpop.f32.mrb[100].mxu0 }
 0x433   : > { %v4856_v40 = vpop.f32.mrb[116].mxu1  ;;  %v5459_v46 = vadd.f32 %v9971_v12, %v4569_v41  ;;  %v4571_v48 = vpop.f32.mrb[101].mxu0 }
 0x434   : > { %v4857_v45 = vpop.f32.mrb[117].mxu1  ;;  %v5464_v34 = vadd.f32 %v5458_v39, %v4571_v48  ;;  %v4573_v25 = vpop.f32.mrb[102].mxu0 }
 0x435   : > { %v10199_v32 = vadd.f32 %v5423_v21, %v4857_v45  ;;  %v4859_v54 = vpop.f32.mrb[118].mxu1  ;;  %v4574_v19 = vpop.f32.mrb[103].mxu0  ;;  %v7897_v45 = vld [vmem:[%s10451_s5 + $0x220] sm:$0xff]  }
 0x436   : > { %v4860_v8 = vpop.f32.mrb[119].mxu1  ;;  %v5465_v59 = vadd.f32 %v5459_v46, %v4574_v19  ;;  %7695 = vmatpush3.bf16.msra.mxu0 %v7897_v45 }
 0x437   : > { %7696 = vmatprep.subr.bf16.mxu0 %v7938_v23 }
 0x43a   : > { %v4578_v50 = vpop.f32.mrb[104].mxu0 }
 0x43b   : > { %v4863_v9 = vpop.f32.mrb[120].mxu1  ;;  %v4579_v3 = vpop.f32.mrb[105].mxu0 }
 0x43c   : > { %v5466_v33 = vadd.f32 %v5460_v38, %v4863_v9  ;;  %v4865_v51 = vpop.f32.mrb[121].mxu1  ;;  %v4580_v20 = vpop.f32.mrb[106].mxu0 }
 0x43d   : > { %v4866_v55 = vpop.f32.mrb[122].mxu1  ;;  %v4581_v2 = vpop.f32.mrb[107].mxu0 }
 0x43e   : > { %v5467_v60 = vadd.f32 %v5461_v13, %v4866_v55  ;;  %v4868_v12 = vpop.f32.mrb[123].mxu1 }
 0x43f   : > { %v10201_v61 = vadd.f32 %v5466_v33, %v4868_v12 }
 0x442   : > { %v4584_v35 = vpop.f32.mrb[108].mxu0 }
 0x443   : > { %v4872_v43 = vpop.f32.mrb[124].mxu1  ;;  %v4585_v21 = vpop.f32.mrb[109].mxu0 }
 0x444   : > { %v5468_v39 = vadd.f32 %v5462_v30, %v4872_v43  ;;  %v4874_v6 = vpop.f32.mrb[125].mxu1  ;;  %v4586_v15 = vpop.f32.mrb[110].mxu0  ;;  %v7905_v21 = vld [vmem:[%s10451_s5 + $0x228] sm:$0xff]  }
 0x445   : > { %v10207_v38 = vadd.f32 %v5467_v60, %v4874_v6  ;;  %v4876_v13 = vpop.f32.mrb[126].mxu1  ;;  %v4587_v40 = vpop.f32.mrb[111].mxu0  ;;  %7697 = vmatpush3.bf16.msra.mxu0 %v7905_v21 }
 0x446   : > { %v5469_v41 = vadd.f32 %v5463_v52, %v4876_v13  ;;  %v4878_v46 = vpop.f32.mrb[127].mxu1  ;;  %7698 = vmatprep.subr.bf16.mxu0 %v7938_v23  ;;  %v7911_v40 = vld [vmem:[%s10451_s5 + $0x238] sm:$0xff]  }
 0x447   : > { %v10209_v48 = vadd.f32 %v5468_v39, %v4878_v46 }
 0x44a   : > { %v4590_v25 = vpop.f32.mrb[112].mxu0 }
 0x44b   : > { %v4882_v54 = vpop.f32.mrb[128].mxu1  ;;  %v4591_v19 = vpop.f32.mrb[113].mxu0 }
 0x44c   : > { %v5470_v30 = vadd.f32 %v5464_v34, %v4882_v54  ;;  %v4884_v8 = vpop.f32.mrb[129].mxu1  ;;  %v4592_v9 = vpop.f32.mrb[114].mxu0 }
 0x44d   : > { %v10215_v50 = vadd.f32 %v5469_v41, %v4884_v8  ;;  %v4886_v52 = vpop.f32.mrb[130].mxu1  ;;  %v4593_v3 = vpop.f32.mrb[115].mxu0 }
 0x44e   : > { %v5471_v33 = vadd.f32 %v5465_v59, %v4886_v52  ;;  %v4888_v51 = vpop.f32.mrb[131].mxu1  ;;  %v7908_v59 = vld [vmem:[%s10451_s5 + $0x230] sm:$0xff]  }
 0x44f   : > { %v10217_v20 = vadd.f32 %v5470_v30, %v4888_v51  ;;  %7699 = vmatpush3.bf16.msra.mxu0 %v7908_v59 }
 0x450   : > { %7700 = vmatprep.subr.bf16.mxu0 %v7938_v23 }
 0x452   : > { %v4596_v55 = vpop.f32.mrb[116].mxu0 }
 0x453   : > { %v4892_v60 = vpop.f32.mrb[132].mxu1  ;;  %v4597_v2 = vpop.f32.mrb[117].mxu0  ;;  %7701 = vmatpush3.bf16.msra.mxu0 %v7911_v40 }
 0x454   : > { %v4893_v12 = vpop.f32.mrb[133].mxu1  ;;  %v4598_v34 = vpop.f32.mrb[118].mxu0 }
 0x455   : > { %v10219_v4 = vadd.f32 %v5471_v33, %v4893_v12  ;;  %v4895_v35 = vpop.f32.mrb[134].mxu1  ;;  %v4599_v43 = vpop.f32.mrb[119].mxu0 }
 0x456   : > { %v4896_v39 = vpop.f32.mrb[135].mxu1 }
 0x45a   : > { %v7624_v6 = vpop.f32.mrb[120].mxu0 }
 0x45b   : > { %v4932_v15 = vpop.f32.mrb[121].mxu0 }
 0x45c   : > { %v7625_v13 = vpop.f32.mrb[122].mxu0 }
 0x45d   : > { %v4934_v41 = vpop.f32.mrb[123].mxu0 }
 0x462   : > { %v7628_v46 = vpop.f32.mrb[124].mxu0 }
 0x463   : > { %v4944_v45 = vpop.f32.mrb[125].mxu0 }
 0x464   : > { %v7629_v25 = vpop.f32.mrb[126].mxu0 }
 0x465   : > { %v4946_v54 = vpop.f32.mrb[127].mxu0 }
 0x46a   : > { %v7632_v30 = vpop.f32.mrb[128].mxu0 }
 0x46b   : > { %v4956_v19 = vpop.f32.mrb[129].mxu0 }
 0x46c   : > { %v7633_v8 = vpop.f32.mrb[130].mxu0 }
 0x46d   : > { %v4958_v9 = vpop.f32.mrb[131].mxu0 }
 0x472   : > { %v7636_v52 = vpop.f32.mrb[132].mxu0 }
 0x473   : > { %v4968_v33 = vpop.f32.mrb[133].mxu0 }
 0x474   : > { %v7637_v3 = vpop.f32.mrb[134].mxu0 }
 0x475   : > { %v4970_v51 = vpop.f32.mrb[135].mxu0 }
 0x47a   : > { %v7640_v55 = vpop.f32.mrb[136].mxu0 }
 0x47b   : > { %v5202_v60 = vadd.f32 %v7640_v55, %v10047_v0  ;;  %v4980_v2 = vpop.f32.mrb[137].mxu0 }
 0x47c   : > { %v7641_v12 = vpop.f32.mrb[138].mxu0 }
 0x47d   : > { %v5203_v34 = vadd.f32 %v7641_v12, %v10052_v47  ;;  %v4982_v23 = vpop.f32.mrb[139].mxu0 }
 0x482   : > { %v7644_v35 = vpop.f32.mrb[140].mxu0 }
 0x483   : > { %v5206_v43 = vadd.f32 %v7644_v35, %v10069_v16  ;;  %v4994_v39 = vpop.f32.mrb[141].mxu0 }
 0x484   : > { %v5204_v21 = vadd.f32 %v10061_v57, %v4994_v39  ;;  %v7645_v59 = vpop.f32.mrb[142].mxu0 }
 0x485   : > { %v5207_v6 = vadd.f32 %v7645_v59, %v10074_v11  ;;  %v4997_v15 = vpop.f32.mrb[143].mxu0 }
 0x486   : > { %v5205_v13 = vadd.f32 %v10066_v5, %v4997_v15 }
 0x48a   : > { %v7648_v41 = vpop.f32.mrb[144].mxu0 }
 0x48b   : > { %v5250_v0 = vadd.f32 %v7648_v41, %v10079_v26  ;;  %v5010_v40 = vpop.f32.mrb[145].mxu0  ;;  %v10247_v26 = vld [vmem:[%s10450_s4] ss:$0 sm:$0xff] }
 0x48c   : > { %v7649_v46 = vpop.f32.mrb[146].mxu0 }
 0x48d   : > { %v5256_v45 = vmax.f32 %v5202_v60, %v5250_v0  ;;  %v5251_v47 = vadd.f32 %v7649_v46, %v10084_v53  ;;  %v5012_v25 = vpop.f32.mrb[147].mxu0  ;;  %v7878_v0 = vld [vmem:[%s10451_s5 + $0x88] sm:$0xff]  }
 0x48f   : > { %v5257_v54 = vmax.f32 %v5203_v34, %v5251_v47  ;;  %v7882_v47 = vld [vmem:[%s10451_s5 + $0xd8] sm:$0xff]  }
 0x491   : > { %v5262_v16 = vmax.f32 %v5256_v45, %v5257_v54  ;;  %v7880_v45 = vld [vmem:[%s10451_s5 + $0xd0] sm:$0xff]  }
 0x492   : > { %v7652_v30 = vpop.f32.mrb[148].mxu0 }
 0x493   : > { %v5254_v57 = vadd.f32 %v7652_v30, %v10101_v24  ;;  %v5024_v19 = vpop.f32.mrb[149].mxu0  ;;  %v5269_v24 = vadd.f32 %v10247_v26, %v5262_v16 }
 0x494   : > { %v5252_v11 = vadd.f32 %v10093_v1, %v5024_v19  ;;  %v7653_v8 = vpop.f32.mrb[150].mxu0 }
 0x495   : > { %v5260_v9 = vmax.f32 %v5206_v43, %v5254_v57  ;;  %v5255_v5 = vadd.f32 %v7653_v8, %v10106_v22  ;;  %v5027_v52 = vpop.f32.mrb[151].mxu0  ;;  %v5270_v23 = vmax.f32 %v5269_v24, 0.0  ;;  %v7887_v24 = vld [vmem:[%s10451_s5 + $0xa8] sm:$0xff]  }
 0x496   : > { %v5258_v53 = vmax.f32 %v5204_v21, %v5252_v11  ;;  %v5253_v33 = vadd.f32 %v10098_v49, %v5027_v52  ;;  %v7876_v21 = vld [vmem:[%s10451_s5 + $0x80] sm:$0xff]  }
 0x497   : > { %v5261_v3 = vmax.f32 %v5207_v6, %v5255_v5  ;;  %v5499_v59 = vpack.c.bf16 %v5270_v23, %v5270_v23  ;;  %v7877_v6 = vld [vmem:[%s10451_s5 + $0xc8] sm:$0xff]   ;;  %v7884_v11 = vld [vmem:[%s10451_s5 + $0xe0] sm:$0xff]  }
 0x498   : > { %v5259_v51 = vmax.f32 %v5205_v13, %v5253_v33  ;;  %v7886_v5 = vld [vmem:[%s10451_s5 + $0xe8] sm:$0xff]  }
 0x499   : > { %v10251_v55 = vmax.f32 %v5260_v9, %v5261_v3 }
 0x49a   : > { %v5271_v1 = vmax.f32 %v5258_v53, %v5259_v51  ;;  %v7656_v60 = vpop.f32.mrb[152].mxu0 }
 0x49b   : > { %v5319_v2 = vadd.f32 %v7656_v60, %v10111_v28  ;;  %v5040_v22 = vpop.f32.mrb[153].mxu0 }
 0x49c   : > { %v7657_v12 = vpop.f32.mrb[154].mxu0  ;;  %v5272_v34 = vadd.f32 %v10247_v26, %v5271_v1 }
 0x49d   : > { %v5320_v35 = vadd.f32 %v7657_v12, %v10119_v44  ;;  %v5042_v43 = vpop.f32.mrb[155].mxu0 }
 0x49e   : > { %v5273_v39 = vmax.f32 %v5272_v34, 0.0  ;;  %v7890_v43 = vld [vmem:[%s10451_s5 + $0xb0] sm:$0xff]  }
 0x4a0   : > { %v5500_v49 = vpack.c.bf16 %v5273_v39, %v5273_v39 }
 0x4a2   : > { %v7660_v28 = vpop.f32.mrb[156].mxu0  ;;  %6123 = vmatprep.mubr.bf16.mxu1 %v5500_v49  ;;  %v7891_v49 = vld [vmem:[%s10451_s5 + $0xf8] sm:$0xff]  }
 0x4a3   : > { %v5323_v15 = vadd.f32 %v7660_v28, %v10133_v63  ;;  %v5054_v13 = vpop.f32.mrb[157].mxu0  ;;  %6124 = vmatmul.mubr.bf16.vlgmr.msra.gmra.mrb[136].mxu1 %v5499_v59 }
 0x4a4   : > { %v5321_v44 = vadd.f32 %v10125_v36, %v5054_v13  ;;  %7116 = vmatpush3.bf16.msra.mxu1 %v7876_v21  ;;  %v7661_v41 = vpop.f32.mrb[158].mxu0  ;;  %v7881_v36 = vld [vmem:[%s10451_s5 + $0x90] sm:$0xff]  }
 0x4a5   : > { %v5324_v40 = vadd.f32 %v7661_v41, %v10138_v17  ;;  %v5057_v46 = vpop.f32.mrb[159].mxu0  ;;  %7117 = vmatprep.subr.bf16.mxu1 %v7877_v6 }
 0x4a6   : > { %v5322_v63 = vadd.f32 %v10130_v56, %v5057_v46  ;;  %v7883_v56 = vld [vmem:[%s10451_s5 + $0x98] sm:$0xff]  }
 0x4a8   : > { %7118 = vmatpush3.bf16.msra.mxu1 %v7878_v0  ;;  %v7893_v0 = vld [vmem:[%s10451_s5 + $0x140] sm:$0xff]  }
 0x4a9   : > { %7119 = vmatprep.subr.bf16.mxu1 %v7880_v45  ;;  %v7895_v45 = vld [vmem:[%s10451_s5 + $0x148] sm:$0xff]  }
 0x4aa   : > { %v7664_v25 = vpop.f32.mrb[160].mxu0 }
 0x4ab   : > { %v5367_v17 = vadd.f32 %v7664_v25, %v10143_v18  ;;  %v5070_v54 = vpop.f32.mrb[161].mxu0  ;;  %v7885_v18 = vld [vmem:[%s10451_s5 + $0xa0] sm:$0xff]  }
 0x4ac   : > { %7120 = vmatpush3.bf16.msra.mxu1 %v7881_v36  ;;  %v7665_v16 = vpop.f32.mrb[162].mxu0  ;;  %v7896_v54 = vld [vmem:[%s10451_s5 + $0x108] sm:$0xff]  }
 0x4ad   : > { %v5373_v30 = vmax.f32 %v5319_v2, %v5367_v17  ;;  %v5368_v57 = vadd.f32 %v7665_v16, %v10147_v42  ;;  %v5072_v19 = vpop.f32.mrb[163].mxu0  ;;  %7121 = vmatprep.subr.bf16.mxu1 %v7882_v47 }
 0x4af   : > { %v5374_v8 = vmax.f32 %v5320_v35, %v5368_v57  ;;  %v7900_v57 = vld [vmem:[%s10451_s5 + $0x158] sm:$0xff]  }
 0x4b0   : > { %7122 = vmatpush3.bf16.msra.mxu1 %v7883_v56 }
 0x4b1   : > { %v5379_v9 = vmax.f32 %v5373_v30, %v5374_v8  ;;  %7123 = vmatprep.subr.bf16.mxu1 %v7884_v11  ;;  %v7898_v30 = vld [vmem:[%s10451_s5 + $0x150] sm:$0xff]  }
 0x4b2   : > { %v7668_v52 = vpop.f32.mrb[164].mxu0 }
 0x4b3   : > { %v5371_v42 = vadd.f32 %v7668_v52, %v10167_v7  ;;  %v5084_v53 = vpop.f32.mrb[165].mxu0  ;;  %v5380_v33 = vadd.f32 %v10247_v26, %v5379_v9  ;;  %v7889_v7 = vld [vmem:[%s10451_s5 + $0xf0] sm:$0xff]   ;;  %v7902_v52 = vld [vmem:[%s10451_s5 + $0x160] sm:$0xff]  }
 0x4b4   : > { %v5369_v3 = vadd.f32 %v10156_v62, %v5084_v53  ;;  %7124 = vmatpush3.bf16.msra.mxu1 %v7885_v18  ;;  %v7669_v51 = vpop.f32.mrb[166].mxu0 }
 0x4b5   : > { %v5377_v1 = vmax.f32 %v5323_v15, %v5371_v42  ;;  %v5372_v60 = vadd.f32 %v7669_v51, %v10170_v37  ;;  %v5087_v2 = vpop.f32.mrb[167].mxu0  ;;  %7125 = vmatprep.subr.bf16.mxu1 %v7886_v5  ;;  %v5381_v22 = vmax.f32 %v5380_v33, 0.0  ;;  %v5275_v37 = vadd.f32 %v10247_v26, %v10251_v55  ;;  %v7892_v55 = vld [vmem:[%s10451_s5 + $0xb8] sm:$0xff]   ;;  %v7904_v33 = vld [vmem:[%s10451_s5 + $0x168] sm:$0xff]  }
 0x4b6   : > { %v5375_v12 = vmax.f32 %v5321_v44, %v5369_v3  ;;  %v5370_v34 = vadd.f32 %v10164_v14, %v5087_v2 }
 0x4b7   : > { %v5378_v62 = vmax.f32 %v5324_v40, %v5372_v60  ;;  %v5502_v23 = vpack.c.bf16 %v5381_v22, %v5381_v22  ;;  %v5276_v13 = vmax.f32 %v5275_v37, 0.0  ;;  %v7906_v60 = vld [vmem:[%s10451_s5 + $0x128] sm:$0xff]  }
 0x4b8   : > { %v5376_v35 = vmax.f32 %v5322_v63, %v5370_v34  ;;  %7126 = vmatpush3.bf16.msra.mxu1 %v7887_v24 }
 0x4b9   : > { %v5385_v39 = vmax.f32 %v5377_v1, %v5378_v62  ;;  %6163 = vmatprep.mubr.bf16.mxu1 %v5502_v23  ;;  %7127 = vmatprep.subr.bf16.mxu1 %v7889_v7  ;;  %v5501_v46 = vpack.c.bf16 %v5276_v13, %v5276_v13  ;;  %v7909_v23 = vld [vmem:[%s10451_s5 + $0x130] sm:$0xff]  }
 0x4ba   : > { %v10311_v21 = vmax.f32 %v5375_v12, %v5376_v35  ;;  %v7672_v14 = vpop.f32.mrb[168].mxu0  ;;  %v7907_v12 = vld [vmem:[%s10451_s5 + $0x170] sm:$0xff]  }
 0x4bb   : > { %v5430_v59 = vadd.f32 %v7672_v14, %v10173_v31  ;;  %v5100_v6 = vpop.f32.mrb[169].mxu0  ;;  %v5386_v28 = vadd.f32 %v10247_v26, %v5385_v39  ;;  %v7894_v31 = vld [vmem:[%s10451_s5 + $0x100] sm:$0xff]  }
 0x4bc   : > { %7128 = vmatpush3.bf16.msra.mxu1 %v7890_v43  ;;  %v7673_v15 = vpop.f32.mrb[170].mxu0  ;;  %v5383_v35 = vadd.f32 %v10247_v26, %v10311_v21  ;;  %v7910_v43 = vld [vmem:[%s10451_s5 + $0x178] sm:$0xff]   ;;  %v7913_v21 = vld [vmem:[%s10451_s5 + $0x1c0] sm:$0xff]  }
 0x4bd   : > { %v5431_v44 = vadd.f32 %v7673_v15, %v10183_v27  ;;  %v5102_v41 = vpop.f32.mrb[171].mxu0  ;;  %7129 = vmatprep.subr.bf16.mxu1 %v7891_v49  ;;  %v5387_v40 = vmax.f32 %v5386_v28, 0.0  ;;  %v7914_v15 = vld [vmem:[%s10451_s5 + $0x180] sm:$0xff]  }
 0x4be   : > { %v5384_v14 = vmax.f32 %v5383_v35, 0.0  ;;  %v7916_v41 = vld [vmem:[%s10451_s5 + $0x188] sm:$0xff]  }
 0x4bf   : > { %v5504_v27 = vpack.c.bf16 %v5387_v40, %v5387_v40  ;;  %v7918_v40 = vld [vmem:[%s10451_s5 + $0x190] sm:$0xff]  }
 0x4c0   : > { %7130 = vmatpush3.bf16.msra.mxu1 %v7892_v55  ;;  %v5503_v13 = vpack.c.bf16 %v5384_v14, %v5384_v14 }
 0x4c1   : > { %7137 = vmatprep.subr.bf16.mxu1 %v7893_v0  ;;  %v7917_v0 = vld [vmem:[%s10451_s5 + $0x1d0] sm:$0xff]  }
 0x4c2   : > { %v7676_v63 = vpop.f32.mrb[172].mxu0 }
 0x4c3   : > { %v5434_v36 = vadd.f32 %v7676_v63, %v10196_v10  ;;  %6164 = vmatmul.mubr.bf16.vlgmr.msra.gmra.mrb[140].mxu1 %v5501_v46  ;;  %v5114_v47 = vpop.f32.mrb[173].mxu0  ;;  %v7920_v46 = vld [vmem:[%s10451_s5 + $0x198] sm:$0xff]   ;;  %v7922_v63 = vld [vmem:[%s10451_s5 + $0x1a0] sm:$0xff]  }
 0x4c4   : > { %v5432_v25 = vadd.f32 %v10186_v58, %v5114_v47  ;;  %7138 = vmatpush3.bf16.msra.mxu1 %v7894_v31  ;;  %6203 = vmatprep.mubr.bf16.mxu1 %v5504_v27  ;;  %v7677_v17 = vpop.f32.mrb[174].mxu0  ;;  %v7899_v58 = vld [vmem:[%s10451_s5 + $0x110] sm:$0xff]   ;;  %v7919_v31 = vld [vmem:[%s10451_s5 + $0x1d8] sm:$0xff]   ;;  %v7923_v27 = vld [vmem:[%s10451_s5 + $0x1e8] sm:$0xff]  }
 0x4c5   : > { %v5435_v16 = vadd.f32 %v7677_v17, %v10199_v32  ;;  %v5117_v56 = vpop.f32.mrb[175].mxu0  ;;  %7139 = vmatprep.subr.bf16.mxu1 %v7895_v45  ;;  %v7921_v45 = vld [vmem:[%s10451_s5 + $0x1e0] sm:$0xff]   ;;  %v7925_v47 = vld [vmem:[%s10451_s5 + $0x1f0] sm:$0xff]  }
 0x4c6   : > { %v5433_v10 = vadd.f32 %v10193_v29, %v5117_v56  ;;  %v7901_v29 = vld [vmem:[%s10451_s5 + $0x118] sm:$0xff]  }
 0x4c8   : > { %7140 = vmatpush3.bf16.msra.mxu1 %v7896_v54  ;;  %v7927_v54 = vld [vmem:[%s10451_s5 + $0x1f8] sm:$0xff]  }
 0x4c9   : > { %7141 = vmatprep.subr.bf16.mxu1 %v7898_v30 }
 0x4ca   : > { %v7680_v19 = vpop.f32.mrb[176].mxu0 }
 0x4cb   : > { %v5478_v32 = vadd.f32 %v7680_v19, %v10201_v61  ;;  %v5130_v11 = vpop.f32.mrb[177].mxu0  ;;  %v7903_v61 = vld [vmem:[%s10451_s5 + $0x120] sm:$0xff]  }
 0x4cc   : > { %7142 = vmatpush3.bf16.msra.mxu1 %v7899_v58  ;;  %v7681_v8 = vpop.f32.mrb[178].mxu0 }
 0x4cd   : > { %v5484_v18 = vmax.f32 %v5430_v59, %v5478_v32  ;;  %v5479_v9 = vadd.f32 %v7681_v8, %v10207_v38  ;;  %v5132_v5 = vpop.f32.mrb[179].mxu0  ;;  %7143 = vmatprep.subr.bf16.mxu1 %v7900_v57  ;;  %v6703_v32 = vld [vmem:[%s10452_s6] ss:$0 sm:$0xff] }
 0x4cf   : > { %v5485_v42 = vmax.f32 %v5431_v44, %v5479_v9  ;;  %v7915_v44 = vld [vmem:[%s10451_s5 + $0x1c8] sm:$0xff]  }
 0x4d0   : > { %7144 = vmatpush3.bf16.msra.mxu1 %v7901_v29 }
 0x4d1   : > { %v10355_v53 = vmax.f32 %v5484_v18, %v5485_v42  ;;  %7145 = vmatprep.subr.bf16.mxu1 %v7902_v52 }
 0x4d2   : > { %v7684_v38 = vpop.f32.mrb[180].mxu0 }
 0x4d3   : > { %v5482_v3 = vadd.f32 %v7684_v38, %v10217_v20  ;;  %v5144_v51 = vpop.f32.mrb[181].mxu0  ;;  %v5491_v17 = vadd.f32 %v10247_v26, %v10355_v53 }
 0x4d4   : > { %v5480_v24 = vadd.f32 %v10209_v48, %v5144_v51  ;;  %7146 = vmatpush3.bf16.msra.mxu1 %v7903_v61  ;;  %v7685_v1 = vpop.f32.mrb[182].mxu0 }
 0x4d5   : > { %v5488_v2 = vmax.f32 %v5434_v36, %v5482_v3  ;;  %v5483_v22 = vadd.f32 %v7685_v1, %v10219_v4  ;;  %v5147_v7 = vpop.f32.mrb[183].mxu0  ;;  %7147 = vmatprep.subr.bf16.mxu1 %v7904_v33  ;;  %v7924_v36 = vld [vmem:[%s10451_s5 + $0x1a8] sm:$0xff]   ;;  %v5492_v56 = vmax.f32 %v5491_v17, 0.0 }
 0x4d6   : > { %v5486_v34 = vmax.f32 %v5432_v25, %v5480_v24  ;;  %v5481_v20 = vadd.f32 %v10215_v50, %v5147_v7  ;;  %v7912_v50 = vld [vmem:[%s10451_s5 + $0x138] sm:$0xff]   ;;  %v7926_v25 = vld [vmem:[%s10451_s5 + $0x1b0] sm:$0xff]  }
 0x4d7   : > { %v5489_v62 = vmax.f32 %v5435_v16, %v5483_v22  ;;  %v7928_v16 = vld [vmem:[%s10451_s5 + $0x1b8] sm:$0xff]   ;;  %v5505_v30 = vpack.c.bf16 %v5492_v56, %v5492_v56 }
 0x4d8   : > { %v5487_v48 = vmax.f32 %v5433_v10, %v5481_v20  ;;  %7148 = vmatpush3.bf16.msra.mxu1 %v7906_v60 }
 0x4d9   : > { %v5496_v4 = vmax.f32 %v5488_v2, %v5489_v62  ;;  %7149 = vmatprep.subr.bf16.mxu1 %v7907_v12 }
 0x4da   : > { %v5493_v37 = vmax.f32 %v5486_v34, %v5487_v48  ;;  %v6776_v48 = vld [vmem:[%s10453_s7] ss:$0 sm:$0xff] }
 0x4db   : > { %v5497_v39 = vadd.f32 %v10247_v26, %v5496_v4  ;;  %v6777_v4 = vld [vmem:[#allocation2] ss:$0 sm:$0xff] }
 0x4dc   : > { %7150 = vmatpush3.bf16.msra.mxu1 %v7909_v23  ;;  %v5494_v49 = vadd.f32 %v10247_v26, %v5493_v37 }
 0x4dd   : > { %v5498_v59 = vmax.f32 %v5497_v39, 0.0  ;;  %7151 = vmatprep.subr.bf16.mxu1 %v7910_v43 }
 0x4de   : > { %v5495_v6 = vmax.f32 %v5494_v49, 0.0 }
 0x4df   : > { %v5507_v28 = vpack.c.bf16 %v5498_v59, %v5498_v59 }
 0x4e0   : > { %7152 = vmatpush3.bf16.msra.mxu1 %v7912_v50  ;;  %v5506_v55 = vpack.c.bf16 %v5495_v6, %v5495_v6 }
 0x4e1   : > { %7703 = vmatmul.mubr.bf16.vlgmr.msra.gmra.mrb[184].mxu0 %v5507_v28  ;;  %7159 = vmatprep.subr.bf16.mxu1 %v7913_v21 }
 0x4e3   : > { %6204 = vmatmul.mubr.bf16.vlgmr.msra.gmra.mrb[144].mxu1 %v5503_v13 }
 0x4e4   : > { %7160 = vmatpush3.bf16.msra.mxu1 %v7914_v15  ;;  %6243 = vmatprep.mubr.bf16.mxu1 %v5506_v55 }
 0x4e5   : > { %7161 = vmatprep.subr.bf16.mxu1 %v7915_v44 }
 0x4e8   : > { %7162 = vmatpush3.bf16.msra.mxu1 %v7916_v41 }
 0x4e9   : > { %7163 = vmatprep.subr.bf16.mxu1 %v7917_v0 }
 0x4ec   : > { %7164 = vmatpush3.bf16.msra.mxu1 %v7918_v40 }
 0x4ed   : > { %7165 = vmatprep.subr.bf16.mxu1 %v7919_v31 }
 0x4f0   : > { %7166 = vmatpush3.bf16.msra.mxu1 %v7920_v46 }
 0x4f1   : > { %7167 = vmatprep.subr.bf16.mxu1 %v7921_v45 }
 0x4f4   : > { %7168 = vmatpush3.bf16.msra.mxu1 %v7922_v63 }
 0x4f5   : > { %7169 = vmatprep.subr.bf16.mxu1 %v7923_v27 }
 0x4f8   : > { %7170 = vmatpush3.bf16.msra.mxu1 %v7924_v36 }
 0x4f9   : > { %7171 = vmatprep.subr.bf16.mxu1 %v7925_v47 }
 0x4fc   : > { %7172 = vmatpush3.bf16.msra.mxu1 %v7926_v25 }
 0x4fd   : > { %7173 = vmatprep.subr.bf16.mxu1 %v7927_v54 }
 0x500   : > { %7174 = vmatpush3.bf16.msra.mxu1 %v7928_v16 }
 0x503   : > { %6244 = vmatmul.mubr.bf16.vlgmr.msra.gmra.mrb[148].mxu1 %v5505_v30 }
 0x576   : > { %v7109_v10 = vpop.f32.mrb[136].mxu1 }
 0x577   : > { %v7110_v58 = vpop.f32.mrb[137].mxu1 }
 0x578   : > { %v7111_v57 = vadd.f32 %v7110_v58, %v7109_v10  ;;  %v7112_v19 = vpop.f32.mrb[138].mxu1 }
 0x579   : > { %v7113_v26 = vpop.f32.mrb[139].mxu1 }
 0x57a   : > { %v6126_v29 = vadd.f32 %v7111_v57, %v6703_v32 }
 0x596   : > { %v7131_v11 = vpop.f32.mrb[140].mxu1 }
 0x597   : > { %v7132_v8 = vpop.f32.mrb[141].mxu1 }
 0x598   : > { %v7133_v18 = vadd.f32 %v7132_v8, %v7131_v11  ;;  %v7134_v9 = vpop.f32.mrb[142].mxu1 }
 0x599   : > { %v7135_v5 = vpop.f32.mrb[143].mxu1 }
 0x59a   : > { %v6166_v52 = vadd.f32 %v7133_v18, %v6126_v29 }
 0x5b4   : > { %v6285_v42 = vpop.f32.mrb[184].mxu0 }
 0x5b5   : > { %v7704_v61 = vpop.f32.mrb[185].mxu0 }
 0x5b6   : > { %v7153_v53 = vpop.f32.mrb[144].mxu1  ;;  %v6288_v33 = vpop.f32.mrb[186].mxu0 }
 0x5b7   : > { %v7154_v38 = vpop.f32.mrb[145].mxu1  ;;  %v7705_v3 = vpop.f32.mrb[187].mxu0 }
 0x5b8   : > { %v7155_v51 = vadd.f32 %v7154_v38, %v7153_v53  ;;  %v7156_v24 = vpop.f32.mrb[146].mxu1 }
 0x5b9   : > { %v7157_v1 = vpop.f32.mrb[147].mxu1 }
 0x5ba   : > { %v6206_v60 = vadd.f32 %v7155_v51, %v6166_v52 }
 0x5d6   : > { %v7175_v2 = vpop.f32.mrb[148].mxu1 }
 0x5d7   : > { %v7176_v22 = vpop.f32.mrb[149].mxu1 }
 0x5d8   : > { %v7177_v7 = vadd.f32 %v7176_v22, %v7175_v2  ;;  %v7178_v12 = vpop.f32.mrb[150].mxu1 }
 0x5d9   : > { %v7179_v34 = vpop.f32.mrb[151].mxu1 }
 0x5da   : > { %v6246_v20 = vadd.f32 %v7177_v7, %v6206_v60 }
 0x5dc   : > { %v6286_v62 = vadd.f32 %v6285_v42, %v6246_v20 }
 0x5de   : > { %v6291_v23 = vmax.f32 %v6286_v62, 0.0 }
 0x5e0   : > { %v6299_v35 = vmul.f32 %v6776_v48, %v6291_v23 }
 0x5e2   : > { %6300 = vadd.xlane.f32.xlu0 %v6299_v35 }
 0x66f   : > { %v6301_v43 = vpop.xlane.xlu0 %6300 }
 0x670   : > { %v6309_v37 = vadd.f32 %v6777_v4, %v6301_v43 }
 0x672   : > { %6311 = vst.msk [vmem:[%s332_s26] sm:$0xff] %vm6310_vm2, %v6309_v37 }
 0x673 PF: > { %s21_s11 = sadd.s32 1, %s7935_s11  }
 0x674   : > { %p18_p4 = scmp.ge.s32.totalorder %s21_s11, 4  }
 0x676   :  { %20 = sbr.rel (!%p18_p4) target bundleno = 3 (0x3), region = 86 }

</bundles_post_ra>
